<compile_context>
chip_gen: v6e
topology: v6e:2x2x1
jax: 0.10.0
libtpu: 0.0.40
codegen_flags: <defaults>
</compile_context>

<pallas_src>
import functools

import jax
import jax.numpy as jnp
from jax.experimental import pallas as pl
from jax.experimental.pallas import tpu as pltpu


# ---------------------------------------------------------------------------
# small helpers (static, trace-time)
# ---------------------------------------------------------------------------
def _round_up(x, m):
    return (x + m - 1) // m * m


def _pick_div(n, candidates, unit=1, limit=None):
    for c in candidates:
        if n % c == 0 and (limit is None or c * unit <= limit):
            return c
    return n


def _k_tiling(K):
    # keep the full K in one block while it is small, otherwise tile by 512
    if K <= 1024:
        return K, K
    return _round_up(K, 512), 512


def _m_tiling(M):
    Mp = _round_up(M, 16)
    return Mp, _pick_div(Mp, (256, 128, 64, 32, 16))


# ---------------------------------------------------------------------------
# Pallas kernels
# ---------------------------------------------------------------------------
def _matmul_kernel(x_ref, w_ref, b_ref, o_ref, acc_ref, *, act):
    @pl.when(pl.program_id(2) == 0)
    def _():
        acc_ref[...] = jnp.zeros_like(acc_ref)

    acc_ref[...] += jnp.dot(x_ref[...], w_ref[...],
                            preferred_element_type=jnp.float32)

    @pl.when(pl.program_id(2) == pl.num_programs(2) - 1)
    def _():
        y = acc_ref[...] + b_ref[...]
        if act == "relu":
            y = jnp.maximum(y, 0.0)
        elif act == "tanh":
            y = jnp.tanh(y)
        o_ref[...] = y.astype(o_ref.dtype)


def _matmul_bias_act(x, w, b, act, n_true):
    """x:(M,K) bf16, w:(Kp,Np) bf16 (pre-padded), b:(1,Np) f32 -> (M, n_true) f32."""
    M, K = x.shape
    Kp, Np = w.shape
    Mp, tm = _m_tiling(M)
    Kp2, tk = _k_tiling(K)
    assert Kp2 == Kp, (K, Kp, Kp2)
    tn = _pick_div(Np, (512, 256, 128))
    if (Mp, Kp) != (M, K):
        x = jnp.pad(x, ((0, Mp - M), (0, Kp - K)))
    grid = (Mp // tm, Np // tn, Kp // tk)
    out = pl.pallas_call(
        functools.partial(_matmul_kernel, act=act),
        out_shape=jax.ShapeDtypeStruct((Mp, Np), jnp.float32),
        grid=grid,
        in_specs=[
            pl.BlockSpec((tm, tk), lambda i, j, k: (i, k)),
            pl.BlockSpec((tk, tn), lambda i, j, k: (k, j)),
            pl.BlockSpec((1, tn), lambda i, j, k: (0, j)),
        ],
        out_specs=pl.BlockSpec((tm, tn), lambda i, j, k: (i, j)),
        scratch_shapes=[pltpu.VMEM((tm, tn), jnp.float32)],
        compiler_params=pltpu.CompilerParams(
            dimension_semantics=("parallel", "parallel", "arbitrary"),
            vmem_limit_bytes=48 * 1024 * 1024),
    )(x, w, b)
    return out[:M, :n_true]


def _colstats_kernel(x_ref, s_ref):
    @pl.when(pl.program_id(1) == 0)
    def _():
        s_ref[...] = jnp.zeros_like(s_ref)

    x = x_ref[...].astype(jnp.float32)
    s_ref[0:1, :] = s_ref[0:1, :] + jnp.sum(x, axis=0, keepdims=True)
    s_ref[1:2, :] = s_ref[1:2, :] + jnp.sum(x * x, axis=0, keepdims=True)


def _colstats(y):
    """Per-column sum and sum-of-squares: y (M, C) -> (2, C) f32."""
    M, C = y.shape
    tc = _pick_div(C, (512, 256, 128))
    tm = _pick_div(M, (512, 256, 128, 64, 32, 16, 8),
                   unit=tc * 4, limit=4 * 1024 * 1024)
    return pl.pallas_call(
        _colstats_kernel,
        out_shape=jax.ShapeDtypeStruct((2, C), jnp.float32),
        grid=(C // tc, M // tm),
        in_specs=[pl.BlockSpec((tm, tc), lambda c, m: (m, c))],
        out_specs=pl.BlockSpec((2, tc), lambda c, m: (0, c)),
        compiler_params=pltpu.CompilerParams(
            dimension_semantics=("parallel", "arbitrary")),
    )(y)


def _affine_act_kernel(x_ref, s_ref, t_ref, o_ref, *, act):
    y = x_ref[...].astype(jnp.float32) * s_ref[...] + t_ref[...]
    if act == "relu":
        y = jnp.maximum(y, 0.0)
    o_ref[...] = y.astype(o_ref.dtype)


def _affine_act(y, scale, shift, act, out_dtype):
    M, C = y.shape
    tc = _pick_div(C, (512, 256, 128))
    tm = _pick_div(M, (512, 256, 128, 64, 32, 16),
                   unit=tc * 4, limit=4 * 1024 * 1024)
    return pl.pallas_call(
        functools.partial(_affine_act_kernel, act=act),
        out_shape=jax.ShapeDtypeStruct((M, C), out_dtype),
        grid=(M // tm, C // tc),
        in_specs=[
            pl.BlockSpec((tm, tc), lambda i, j: (i, j)),
            pl.BlockSpec((1, tc), lambda i, j: (0, j)),
            pl.BlockSpec((1, tc), lambda i, j: (0, j)),
        ],
        out_specs=pl.BlockSpec((tm, tc), lambda i, j: (i, j)),
        compiler_params=pltpu.CompilerParams(
            dimension_semantics=("parallel", "parallel")),
    )(y, scale, shift)


# ---------------------------------------------------------------------------
# BatchNorm2d (training-mode) + ReLU on the (M, group*Cout) matmul layout
# ---------------------------------------------------------------------------
def _batchnorm_relu(y, gamma, beta, group, eps=1e-5):
    """Column j corresponds to channel j % Cout; per-channel stats pool over the M rows
    and the `group` column groups (spatial positions / output phases). Returns bf16."""
    M, C = y.shape
    cout = gamma.shape[0]
    assert C == group * cout
    stats = _colstats(y)                                      # (2, C) f32
    s = jnp.sum(stats[0].reshape(group, cout), axis=0)
    ss = jnp.sum(stats[1].reshape(group, cout), axis=0)
    count = float(M * group)
    mean = s / count
    var = jnp.maximum(ss / count - mean * mean, 0.0)          # biased variance
    scale = gamma.astype(jnp.float32) * jax.lax.rsqrt(var + eps)
    shift = beta.astype(jnp.float32) - mean * scale
    scale_r = jnp.tile(scale, group).reshape(1, C)
    shift_r = jnp.tile(shift, group).reshape(1, C)
    return _affine_act(y, scale_r, shift_r, "relu", jnp.bfloat16)


# ---------------------------------------------------------------------------
# layout glue (plain JAX, no heavy compute)
# ---------------------------------------------------------------------------
def _im2col_3x3(x):
    """3x3 / stride-1 / pad-1 patches of NHWC x, columns ordered (kh, kw, cin)."""
    N, H, W, C = x.shape
    xp = jnp.pad(x, ((0, 0), (1, 1), (1, 1), (0, 0)))
    cols = [xp[:, i:i + H, j:j + W, :] for i in range(3) for j in range(3)]
    p = jnp.stack(cols, axis=3)                               # (N, H, W, 9, C)
    return p.reshape(N * H * W, 9 * C)


def _phase_interleave(y, n, h, w, cout):
    """(n*h*w, 4*cout) with columns ordered (ph, pw, c) -> NHWC (n, 2h, 2w, cout)."""
    y = y.reshape(n, h, w, 2, 2, cout)
    y = jnp.transpose(y, (0, 1, 3, 2, 4, 5))
    return y.reshape(n, 2 * h, 2 * w, cout)


# ---------------------------------------------------------------------------
# forward pass
# ---------------------------------------------------------------------------
def netG_forward(z, P, meta):
    """_netG.forward: z (N, nz, 1, 1) -> NCHW float32 image."""
    cs = meta["cout"]
    n = z.shape[0]

    # layer 1: ConvTranspose2d(nz, ngf*8, 4, 1, 0) on 1x1 input == matmul; + BN + ReLU
    x = z.reshape(n, -1).astype(jnp.bfloat16)
    y = _matmul_bias_act(x, P["w1"], P["b1"], "none", 16 * cs[0])
    y = _batchnorm_relu(y, P["g1"], P["bt1"], group=16)
    xh = y.reshape(n, 4, 4, cs[0])                            # NHWC, bf16

    # layers 2-4: ConvTranspose2d(Cin, Cout, 4, 2, 1) + BN + ReLU
    for i in (2, 3, 4):
        _, h, w, _ = xh.shape
        patches = _im2col_3x3(xh)
        y = _matmul_bias_act(patches, P[f"w{i}"], P[f"b{i}"], "none", 4 * cs[i - 1])
        y = _batchnorm_relu(y, P[f"g{i}"], P[f"bt{i}"], group=4)
        xh = _phase_interleave(y, n, h, w, cs[i - 1])

    # layer 5: ConvTranspose2d(ngf, nc, 4, 2, 1) + Tanh
    _, h, w, _ = xh.shape
    patches = _im2col_3x3(xh)
    y = _matmul_bias_act(patches, P["w5"], P["b5"], "tanh", 4 * cs[4])
    out = _phase_interleave(y, n, h, w, cs[4])
    return jnp.transpose(out, (0, 3, 1, 2))                   # NCHW


# ---------------------------------------------------------------------------
# one-time parameter preparation (hoisted out of the forward path)
# ---------------------------------------------------------------------------
def prepare_params(raw):
    P, cout = {}, []

    # layer 1: (nz, C1, 4, 4) -> (nz, 16*C1), columns ordered (kh, kw, c)
    W1 = raw["w1"].astype(jnp.float32)
    nz, C1 = W1.shape[0], W1.shape[1]
    n1 = 16 * C1
    Kp, _ = _k_tiling(nz)
    Np = _round_up(n1, 128)
    w1m = jnp.transpose(W1, (0, 2, 3, 1)).reshape(nz, n1)
    P["w1"] = jnp.pad(w1m, ((0, Kp - nz), (0, Np - n1))).astype(jnp.bfloat16)
    P["b1"] = jnp.pad(jnp.tile(raw["b1"].astype(jnp.float32), 16),
                      (0, Np - n1)).reshape(1, Np)
    P["g1"], P["bt1"] = raw["g1"], raw["bt1"]
    cout.append(C1)

    # layers 2-5: combined 4-phase matrix (9*Cin, 4*Cout), columns ordered (ph, pw, c)
    for i in (2, 3, 4, 5):
        W = raw[f"w{i}"].astype(jnp.float32)                  # (Cin, Cout, 4, 4)
        Cin, Co = W.shape[0], W.shape[1]
        Wc = jnp.zeros((3, 3, Cin, 2, 2, Co), jnp.float32)
        for ph in range(2):
            for pw in range(2):
                for th in range(2):
                    for tw in range(2):
                        Wc = Wc.at[ph + th, pw + tw, :, ph, pw, :].set(
                            W[:, :, 3 - ph - 2 * th, 3 - pw - 2 * tw])
        K, nt = 9 * Cin, 4 * Co
        Kp, _ = _k_tiling(K)
        Np = _round_up(nt, 128)
        Wm = Wc.reshape(K, nt)
        P[f"w{i}"] = jnp.pad(Wm, ((0, Kp - K), (0, Np - nt))).astype(jnp.bfloat16)
        P[f"b{i}"] = jnp.pad(jnp.tile(raw[f"b{i}"].astype(jnp.float32), 4),
                             (0, Np - nt)).reshape(1, Np)
        if i < 5:
            P[f"g{i}"], P[f"bt{i}"] = raw[f"g{i}"], raw[f"bt{i}"]
        cout.append(Co)

    return P, {"cout": tuple(cout)}


def init_raw_params(key, nz, nc, ngf):
    """DCGAN-style init: conv ~ N(0, 0.02), BN gamma ~ N(1, 0.02), beta = 0."""
    ks = jax.random.split(key, 16)
    chans = [nz, ngf * 8, ngf * 4, ngf * 2, ngf, nc]
    raw, ki = {}, 0
    for i in range(1, 6):
        raw[f"w{i}"] = (0.02 * jax.random.normal(
            ks[ki], (chans[i - 1], chans[i], 4, 4))).astype(jnp.float32); ki += 1
        raw[f"b{i}"] = (0.02 * jax.random.normal(
            ks[ki], (chans[i],))).astype(jnp.float32); ki += 1
        if i < 5:
            raw[f"g{i}"] = (1.0 + 0.02 * jax.random.normal(
                ks[ki], (chans[i],))).astype(jnp.float32); ki += 1
            raw[f"bt{i}"] = jnp.zeros((chans[i],), jnp.float32)
    return raw


# ---------------------------------------------------------------------------
# pure-JAX reference (correctness check)
# ---------------------------------------------------------------------------
def reference_forward(z, raw):
    def convT(x, W, b, stride, pad):
        k = W.shape[2]
        Wc = jnp.transpose(jnp.flip(W, (2, 3)), (1, 0, 2, 3))  # OIHW
        y = jax.lax.conv_general_dilated(
            x, Wc, window_strides=(1, 1),
            padding=[(k - 1 - pad, k - 1 - pad)] * 2,
            lhs_dilation=(stride, stride),
            dimension_numbers=("NCHW", "OIHW", "NCHW"),
            precision=jax.lax.Precision.HIGHEST)
        return y + b.reshape(1, -1, 1, 1)

    def bn(x, g, b, eps=1e-5):
        mean = jnp.mean(x, axis=(0, 2, 3), keepdims=True)
        var = jnp.mean((x - mean) ** 2, axis=(0, 2, 3), keepdims=True)
        xh = (x - mean) * jax.lax.rsqrt(var + eps)
        return xh * g.reshape(1, -1, 1, 1) + b.reshape(1, -1, 1, 1)

    relu = jax.nn.relu
    x = z.astype(jnp.float32)
    x = relu(bn(convT(x, raw["w1"], raw["b1"], 1, 0), raw["g1"], raw["bt1"]))
    x = relu(bn(convT(x, raw["w2"], raw["b2"], 2, 1), raw["g2"], raw["bt2"]))
    x = relu(bn(convT(x, raw["w3"], raw["b3"], 2, 1), raw["g3"], raw["bt3"]))
    x = relu(bn(convT(x, raw["w4"], raw["b4"], 2, 1), raw["g4"], raw["bt4"]))
    x = jnp.tanh(convT(x, raw["w5"], raw["b5"], 2, 1))
    return x


if __name__ == "__main__":
    # Small shape consistent with the module: latent z is (N, nz, 1, 1); output 64x64.
    batch, nz, ngf, nc = 2, 16, 8, 3

    key = jax.random.PRNGKey(0)
    k_z, k_p = jax.random.split(key)
    z = jax.random.normal(k_z, (batch, nz, 1, 1), dtype=jnp.float32)
    raw = init_raw_params(k_p, nz, nc, ngf)

    params, meta = prepare_params(raw)
    fwd = jax.jit(functools.partial(netG_forward, meta=meta))

    out = jax.block_until_ready(fwd(z, params))
    assert out.shape == (batch, nc, 64, 64), f"bad output shape {out.shape}"
    assert bool(jnp.all(jnp.isfinite(out)))

    ref = jax.block_until_ready(reference_forward(z, raw))
    max_diff = float(jnp.max(jnp.abs(out - ref)))
    # bf16 MXU inputs -> allow a few e-2 absolute slack on the tanh output
    assert max_diff < 5e-2, f"mismatch vs reference: max |diff| = {max_diff}"

    print("KERNEL_OK")
</pallas_src>

<mosaic_0001>
module attributes {stable_mosaic.version = 11 : i64} {
  func.func @_matmul_kernel(%arg0: i32, %arg1: i32, %arg2: i32, %arg3: memref<16x16xbf16, #tpu.memory_space<vmem>>, %arg4: memref<16x512xbf16, #tpu.memory_space<vmem>>, %arg5: memref<1x512xf32, #tpu.memory_space<vmem>>, %arg6: memref<16x512xf32, #tpu.memory_space<vmem>>, %arg7: memref<16x512xf32, #tpu.memory_space<vmem>>) attributes {dimension_semantics = [#tpu.dimension_semantics<parallel>, #tpu.dimension_semantics<parallel>, #tpu.dimension_semantics<arbitrary>], iteration_bounds = array<i64: 1, 2, 1>, scalar_prefetch = 0 : i64, scratch_operands = 1 : i64, tpu.core_type = #tpu.core_type<tc>, window_params = [{transform_indices = @transform_0, window_bounds = array<i64: 16, 16>}, {transform_indices = @transform_1, window_bounds = array<i64: 16, 512>}, {transform_indices = @transform_2, window_bounds = array<i64: 1, 512>}, {transform_indices = @transform_3, window_bounds = array<i64: 16, 512>}]} {
    %c0_i32 = arith.constant 0 : i32
    %0 = arith.cmpi eq, %arg2, %c0_i32 : i32
    %1 = arith.extui %0 : i1 to i32
    %c0_i32_0 = arith.constant 0 : i32
    %2 = arith.cmpi ne, %1, %c0_i32_0 : i32
    scf.if %2 {
      %cst_10 = arith.constant 0.000000e+00 : f32
      %12 = vector.broadcast %cst_10 : f32 to vector<16x512xf32>
      %c0_11 = arith.constant 0 : index
      %c0_12 = arith.constant 0 : index
      %13 = vector.load %arg7[%c0_11, %c0_12] : memref<16x512xf32, #tpu.memory_space<vmem>>, vector<16x512xf32>
      tpu.vector_store %arg7[%c0_11, %c0_12], %12 {strides = array<i32>} : memref<16x512xf32, #tpu.memory_space<vmem>>, vector<16x512xf32>,
    } else {
    }
    %c0 = arith.constant 0 : index
    %c0_1 = arith.constant 0 : index
    %3 = vector.load %arg7[%c0, %c0_1] : memref<16x512xf32, #tpu.memory_space<vmem>>, vector<16x512xf32>
    %c0_2 = arith.constant 0 : index
    %c0_3 = arith.constant 0 : index
    %4 = vector.load %arg3[%c0_2, %c0_3] : memref<16x16xbf16, #tpu.memory_space<vmem>>, vector<16x16xbf16>
    %c0_4 = arith.constant 0 : index
    %c0_5 = arith.constant 0 : index
    %5 = vector.load %arg4[%c0_4, %c0_5] : memref<16x512xbf16, #tpu.memory_space<vmem>>, vector<16x512xbf16>
    %cst = arith.constant dense<0.000000e+00> : vector<16x512xf32>
    %6 = tpu.matmul %4, %5, %cst {dimension_numbers = #tpu.dot_dimension_numbers<[1], [0], [0], [1], [0, 0, 1, 1], [], []>} : vector<16x16xbf16>, vector<16x512xbf16>, vector<16x512xf32> -> vector<16x512xf32>
    %7 = arith.addf %3, %6 : vector<16x512xf32>
    %c0_6 = arith.constant 0 : index
    %c0_7 = arith.constant 0 : index
    %8 = vector.load %arg7[%c0_6, %c0_7] : memref<16x512xf32, #tpu.memory_space<vmem>>, vector<16x512xf32>
    tpu.vector_store %arg7[%c0_6, %c0_7], %7 {strides = array<i32>} : memref<16x512xf32, #tpu.memory_space<vmem>>, vector<16x512xf32>,
    %c0_i32_8 = arith.constant 0 : i32
    %9 = arith.cmpi eq, %arg2, %c0_i32_8 : i32
    %10 = arith.extui %9 : i1 to i32
    %c0_i32_9 = arith.constant 0 : i32
    %11 = arith.cmpi ne, %10, %c0_i32_9 : i32
    scf.if %11 {
      %c0_10 = arith.constant 0 : index
      %c0_11 = arith.constant 0 : index
      %12 = vector.load %arg7[%c0_10, %c0_11] : memref<16x512xf32, #tpu.memory_space<vmem>>, vector<16x512xf32>
      %c0_12 = arith.constant 0 : index
      %c0_13 = arith.constant 0 : index
      %13 = vector.load %arg5[%c0_12, %c0_13] : memref<1x512xf32, #tpu.memory_space<vmem>>, vector<1x512xf32>
      %14 = vector.broadcast %13 : vector<1x512xf32> to vector<16x512xf32>
      %15 = arith.addf %12, %14 : vector<16x512xf32>
      %c0_14 = arith.constant 0 : index
      %c0_15 = arith.constant 0 : index
      %16 = vector.load %arg6[%c0_14, %c0_15] : memref<16x512xf32, #tpu.memory_space<vmem>>, vector<16x512xf32>
      tpu.vector_store %arg6[%c0_14, %c0_15], %15 {strides = array<i32>} : memref<16x512xf32, #tpu.memory_space<vmem>>, vector<16x512xf32>,
    } else {
    }
    return
  }
  func.func @transform_0(%arg0: i32, %arg1: i32, %arg2: i32) -> (i32, i32) {
    %c0_i32 = arith.constant 0 : i32
    return %arg0, %arg2 : i32, i32
  }
  func.func @transform_1(%arg0: i32, %arg1: i32, %arg2: i32) -> (i32, i32) {
    %c0_i32 = arith.constant 0 : i32
    return %arg2, %arg1 : i32, i32
  }
  func.func @transform_2(%arg0: i32, %arg1: i32, %arg2: i32) -> (i32, i32) {
    %c0_i32 = arith.constant 0 : i32
    %c0_i32_0 = arith.constant 0 : i32
    return %c0_i32, %arg1 : i32, i32
  }
  func.func @transform_3(%arg0: i32, %arg1: i32, %arg2: i32) -> (i32, i32) {
    %c0_i32 = arith.constant 0 : i32
    return %arg0, %arg1 : i32, i32
  }
}

module attributes {stable_mosaic.version = 11 : i64} {
  func.func @_colstats_kernel(%arg0: i32, %arg1: i32, %arg2: memref<2x512xf32, #tpu.memory_space<vmem>>, %arg3: memref<2x512xf32, #tpu.memory_space<vmem>>) attributes {dimension_semantics = [#tpu.dimension_semantics<parallel>, #tpu.dimension_semantics<arbitrary>], iteration_bounds = array<i64: 2, 1>, scalar_prefetch = 0 : i64, scratch_operands = 0 : i64, tpu.core_type = #tpu.core_type<tc>, window_params = [{transform_indices = @transform_0, window_bounds = array<i64: 2, 512>}, {transform_indices = @transform_1, window_bounds = array<i64: 2, 512>}]} {
    %c0_i32 = arith.constant 0 : i32
    %0 = arith.cmpi eq, %arg1, %c0_i32 : i32
    %1 = arith.extui %0 : i1 to i32
    %c0_i32_0 = arith.constant 0 : i32
    %2 = arith.cmpi ne, %1, %c0_i32_0 : i32
    scf.if %2 {
      %cst_10 = arith.constant 0.000000e+00 : f32
      %15 = vector.broadcast %cst_10 : f32 to vector<2x512xf32>
      %c0_11 = arith.constant 0 : index
      %c0_12 = arith.constant 0 : index
      %16 = vector.load %arg3[%c0_11, %c0_12] : memref<2x512xf32, #tpu.memory_space<vmem>>, vector<2x512xf32>
      tpu.vector_store %arg3[%c0_11, %c0_12], %15 {strides = array<i32>} : memref<2x512xf32, #tpu.memory_space<vmem>>, vector<2x512xf32>,
    } else {
    }
    %c0 = arith.constant 0 : index
    %c0_1 = arith.constant 0 : index
    %3 = vector.load %arg2[%c0, %c0_1] : memref<2x512xf32, #tpu.memory_space<vmem>>, vector<2x512xf32>
    %c0_2 = arith.constant 0 : index
    %c0_3 = arith.constant 0 : index
    %4 = vector.load %arg3[%c0_2, %c0_3] : memref<2x512xf32, #tpu.memory_space<vmem>>, vector<1x512xf32>
    %cst = arith.constant dense<0.000000e+00> : vector<512xf32>
    %5 = vector.multi_reduction <add>, %3, %cst [0] : vector<2x512xf32> to vector<512xf32>
    %6 = vector.shape_cast %5 : vector<512xf32> to vector<1x512xf32>
    %7 = arith.addf %4, %6 : vector<1x512xf32>
    %c0_4 = arith.constant 0 : index
    %c0_5 = arith.constant 0 : index
    %8 = vector.load %arg3[%c0_4, %c0_5] : memref<2x512xf32, #tpu.memory_space<vmem>>, vector<1x512xf32>
    tpu.vector_store %arg3[%c0_4, %c0_5], %7 {strides = array<i32>} : memref<2x512xf32, #tpu.memory_space<vmem>>, vector<1x512xf32>,
    %c1 = arith.constant 1 : index
    %c0_6 = arith.constant 0 : index
    %9 = vector.load %arg3[%c1, %c0_6] : memref<2x512xf32, #tpu.memory_space<vmem>>, vector<1x512xf32>
    %10 = arith.mulf %3, %3 : vector<2x512xf32>
    %cst_7 = arith.constant dense<0.000000e+00> : vector<512xf32>
    %11 = vector.multi_reduction <add>, %10, %cst_7 [0] : vector<2x512xf32> to vector<512xf32>
    %12 = vector.shape_cast %11 : vector<512xf32> to vector<1x512xf32>
    %13 = arith.addf %9, %12 : vector<1x512xf32>
    %c1_8 = arith.constant 1 : index
    %c0_9 = arith.constant 0 : index
    %14 = vector.load %arg3[%c1_8, %c0_9] : memref<2x512xf32, #tpu.memory_space<vmem>>, vector<1x512xf32>
    tpu.vector_store %arg3[%c1_8, %c0_9], %13 {strides = array<i32>} : memref<2x512xf32, #tpu.memory_space<vmem>>, vector<1x512xf32>,
    return
  }
  func.func @transform_0(%arg0: i32, %arg1: i32) -> (i32, i32) {
    %c0_i32 = arith.constant 0 : i32
    return %arg1, %arg0 : i32, i32
  }
  func.func @transform_1(%arg0: i32, %arg1: i32) -> (i32, i32) {
    %c0_i32 = arith.constant 0 : i32
    %c0_i32_0 = arith.constant 0 : i32
    return %c0_i32, %arg0 : i32, i32
  }
}

module attributes {stable_mosaic.version = 11 : i64} {
  func.func @_affine_act_kernel(%arg0: i32, %arg1: i32, %arg2: memref<2x512xf32, #tpu.memory_space<vmem>>, %arg3: memref<1x512xf32, #tpu.memory_space<vmem>>, %arg4: memref<1x512xf32, #tpu.memory_space<vmem>>, %arg5: memref<2x512xbf16, #tpu.memory_space<vmem>>) attributes {dimension_semantics = [#tpu.dimension_semantics<parallel>, #tpu.dimension_semantics<parallel>], iteration_bounds = array<i64: 1, 2>, scalar_prefetch = 0 : i64, scratch_operands = 0 : i64, tpu.core_type = #tpu.core_type<tc>, window_params = [{transform_indices = @transform_0, window_bounds = array<i64: 2, 512>}, {transform_indices = @transform_1, window_bounds = array<i64: 1, 512>}, {transform_indices = @transform_2, window_bounds = array<i64: 1, 512>}, {transform_indices = @transform_3, window_bounds = array<i64: 2, 512>}]} {
    %c0 = arith.constant 0 : index
    %c0_0 = arith.constant 0 : index
    %0 = vector.load %arg2[%c0, %c0_0] : memref<2x512xf32, #tpu.memory_space<vmem>>, vector<2x512xf32>
    %c0_1 = arith.constant 0 : index
    %c0_2 = arith.constant 0 : index
    %1 = vector.load %arg3[%c0_1, %c0_2] : memref<1x512xf32, #tpu.memory_space<vmem>>, vector<1x512xf32>
    %2 = vector.broadcast %1 : vector<1x512xf32> to vector<2x512xf32>
    %3 = arith.mulf %0, %2 : vector<2x512xf32>
    %c0_3 = arith.constant 0 : index
    %c0_4 = arith.constant 0 : index
    %4 = vector.load %arg4[%c0_3, %c0_4] : memref<1x512xf32, #tpu.memory_space<vmem>>, vector<1x512xf32>
    %5 = vector.broadcast %4 : vector<1x512xf32> to vector<2x512xf32>
    %6 = arith.addf %3, %5 : vector<2x512xf32>
    %cst = arith.constant 0.000000e+00 : f32
    %7 = vector.broadcast %cst : f32 to vector<2x512xf32>
    %8 = arith.maximumf %6, %7 : vector<2x512xf32>
    %9 = arith.truncf %8 : vector<2x512xf32> to vector<2x512xbf16>
    %c0_5 = arith.constant 0 : index
    %c0_6 = arith.constant 0 : index
    %10 = vector.load %arg5[%c0_5, %c0_6] : memref<2x512xbf16, #tpu.memory_space<vmem>>, vector<2x512xbf16>
    tpu.vector_store %arg5[%c0_5, %c0_6], %9 {strides = array<i32>} : memref<2x512xbf16, #tpu.memory_space<vmem>>, vector<2x512xbf16>,
    return
  }
  func.func @transform_0(%arg0: i32, %arg1: i32) -> (i32, i32) {
    %c0_i32 = arith.constant 0 : i32
    return %arg0, %arg1 : i32, i32
  }
  func.func @transform_1(%arg0: i32, %arg1: i32) -> (i32, i32) {
    %c0_i32 = arith.constant 0 : i32
    %c0_i32_0 = arith.constant 0 : i32
    return %c0_i32, %arg1 : i32, i32
  }
  func.func @transform_2(%arg0: i32, %arg1: i32) -> (i32, i32) {
    %c0_i32 = arith.constant 0 : i32
    %c0_i32_0 = arith.constant 0 : i32
    return %c0_i32, %arg1 : i32, i32
  }
  func.func @transform_3(%arg0: i32, %arg1: i32) -> (i32, i32) {
    %c0_i32 = arith.constant 0 : i32
    return %arg0, %arg1 : i32, i32
  }
}

module attributes {stable_mosaic.version = 11 : i64} {
  func.func @_colstats_kernel(%arg0: i32, %arg1: i32, %arg2: memref<32x128xf32, #tpu.memory_space<vmem>>, %arg3: memref<2x128xf32, #tpu.memory_space<vmem>>) attributes {dimension_semantics = [#tpu.dimension_semantics<parallel>, #tpu.dimension_semantics<arbitrary>], iteration_bounds = array<i64: 1, 1>, scalar_prefetch = 0 : i64, scratch_operands = 0 : i64, tpu.core_type = #tpu.core_type<tc>, window_params = [{transform_indices = @transform_0, window_bounds = array<i64: 32, 128>}, {transform_indices = @transform_1, window_bounds = array<i64: 2, 128>}]} {
    %c0_i32 = arith.constant 0 : i32
    %0 = arith.cmpi eq, %arg1, %c0_i32 : i32
    %1 = arith.extui %0 : i1 to i32
    %c0_i32_0 = arith.constant 0 : i32
    %2 = arith.cmpi ne, %1, %c0_i32_0 : i32
    scf.if %2 {
      %cst_10 = arith.constant 0.000000e+00 : f32
      %15 = vector.broadcast %cst_10 : f32 to vector<2x128xf32>
      %c0_11 = arith.constant 0 : index
      %c0_12 = arith.constant 0 : index
      %16 = vector.load %arg3[%c0_11, %c0_12] : memref<2x128xf32, #tpu.memory_space<vmem>>, vector<2x128xf32>
      tpu.vector_store %arg3[%c0_11, %c0_12], %15 {strides = array<i32>} : memref<2x128xf32, #tpu.memory_space<vmem>>, vector<2x128xf32>,
    } else {
    }
    %c0 = arith.constant 0 : index
    %c0_1 = arith.constant 0 : index
    %3 = vector.load %arg2[%c0, %c0_1] : memref<32x128xf32, #tpu.memory_space<vmem>>, vector<32x128xf32>
    %c0_2 = arith.constant 0 : index
    %c0_3 = arith.constant 0 : index
    %4 = vector.load %arg3[%c0_2, %c0_3] : memref<2x128xf32, #tpu.memory_space<vmem>>, vector<1x128xf32>
    %cst = arith.constant dense<0.000000e+00> : vector<128xf32>
    %5 = vector.multi_reduction <add>, %3, %cst [0] : vector<32x128xf32> to vector<128xf32>
    %6 = vector.shape_cast %5 : vector<128xf32> to vector<1x128xf32>
    %7 = arith.addf %4, %6 : vector<1x128xf32>
    %c0_4 = arith.constant 0 : index
    %c0_5 = arith.constant 0 : index
    %8 = vector.load %arg3[%c0_4, %c0_5] : memref<2x128xf32, #tpu.memory_space<vmem>>, vector<1x128xf32>
    tpu.vector_store %arg3[%c0_4, %c0_5], %7 {strides = array<i32>} : memref<2x128xf32, #tpu.memory_space<vmem>>, vector<1x128xf32>,
    %c1 = arith.constant 1 : index
    %c0_6 = arith.constant 0 : index
    %9 = vector.load %arg3[%c1, %c0_6] : memref<2x128xf32, #tpu.memory_space<vmem>>, vector<1x128xf32>
    %10 = arith.mulf %3, %3 : vector<32x128xf32>
    %cst_7 = arith.constant dense<0.000000e+00> : vector<128xf32>
    %11 = vector.multi_reduction <add>, %10, %cst_7 [0] : vector<32x128xf32> to vector<128xf32>
    %12 = vector.shape_cast %11 : vector<128xf32> to vector<1x128xf32>
    %13 = arith.addf %9, %12 : vector<1x128xf32>
    %c1_8 = arith.constant 1 : index
    %c0_9 = arith.constant 0 : index
    %14 = vector.load %arg3[%c1_8, %c0_9] : memref<2x128xf32, #tpu.memory_space<vmem>>, vector<1x128xf32>
    tpu.vector_store %arg3[%c1_8, %c0_9], %13 {strides = array<i32>} : memref<2x128xf32, #tpu.memory_space<vmem>>, vector<1x128xf32>,
    return
  }
  func.func @transform_0(%arg0: i32, %arg1: i32) -> (i32, i32) {
    %c0_i32 = arith.constant 0 : i32
    return %arg1, %arg0 : i32, i32
  }
  func.func @transform_1(%arg0: i32, %arg1: i32) -> (i32, i32) {
    %c0_i32 = arith.constant 0 : i32
    %c0_i32_0 = arith.constant 0 : i32
    return %c0_i32, %arg0 : i32, i32
  }
}

module attributes {stable_mosaic.version = 11 : i64} {
  func.func @_matmul_kernel(%arg0: i32, %arg1: i32, %arg2: i32, %arg3: memref<32x576xbf16, #tpu.memory_space<vmem>>, %arg4: memref<576x128xbf16, #tpu.memory_space<vmem>>, %arg5: memref<1x128xf32, #tpu.memory_space<vmem>>, %arg6: memref<32x128xf32, #tpu.memory_space<vmem>>, %arg7: memref<32x128xf32, #tpu.memory_space<vmem>>) attributes {dimension_semantics = [#tpu.dimension_semantics<parallel>, #tpu.dimension_semantics<parallel>, #tpu.dimension_semantics<arbitrary>], iteration_bounds = array<i64: 1, 1, 1>, scalar_prefetch = 0 : i64, scratch_operands = 1 : i64, tpu.core_type = #tpu.core_type<tc>, window_params = [{transform_indices = @transform_0, window_bounds = array<i64: 32, 576>}, {transform_indices = @transform_1, window_bounds = array<i64: 576, 128>}, {transform_indices = @transform_2, window_bounds = array<i64: 1, 128>}, {transform_indices = @transform_3, window_bounds = array<i64: 32, 128>}]} {
    %c0_i32 = arith.constant 0 : i32
    %0 = arith.cmpi eq, %arg2, %c0_i32 : i32
    %1 = arith.extui %0 : i1 to i32
    %c0_i32_0 = arith.constant 0 : i32
    %2 = arith.cmpi ne, %1, %c0_i32_0 : i32
    scf.if %2 {
      %cst_10 = arith.constant 0.000000e+00 : f32
      %12 = vector.broadcast %cst_10 : f32 to vector<32x128xf32>
      %c0_11 = arith.constant 0 : index
      %c0_12 = arith.constant 0 : index
      %13 = vector.load %arg7[%c0_11, %c0_12] : memref<32x128xf32, #tpu.memory_space<vmem>>, vector<32x128xf32>
      tpu.vector_store %arg7[%c0_11, %c0_12], %12 {strides = array<i32>} : memref<32x128xf32, #tpu.memory_space<vmem>>, vector<32x128xf32>,
    } else {
    }
    %c0 = arith.constant 0 : index
    %c0_1 = arith.constant 0 : index
    %3 = vector.load %arg7[%c0, %c0_1] : memref<32x128xf32, #tpu.memory_space<vmem>>, vector<32x128xf32>
    %c0_2 = arith.constant 0 : index
    %c0_3 = arith.constant 0 : index
    %4 = vector.load %arg3[%c0_2, %c0_3] : memref<32x576xbf16, #tpu.memory_space<vmem>>, vector<32x576xbf16>
    %c0_4 = arith.constant 0 : index
    %c0_5 = arith.constant 0 : index
    %5 = vector.load %arg4[%c0_4, %c0_5] : memref<576x128xbf16, #tpu.memory_space<vmem>>, vector<576x128xbf16>
    %cst = arith.constant dense<0.000000e+00> : vector<32x128xf32>
    %6 = tpu.matmul %4, %5, %cst {dimension_numbers = #tpu.dot_dimension_numbers<[1], [0], [0], [1], [0, 0, 1, 1], [], []>} : vector<32x576xbf16>, vector<576x128xbf16>, vector<32x128xf32> -> vector<32x128xf32>
    %7 = arith.addf %3, %6 : vector<32x128xf32>
    %c0_6 = arith.constant 0 : index
    %c0_7 = arith.constant 0 : index
    %8 = vector.load %arg7[%c0_6, %c0_7] : memref<32x128xf32, #tpu.memory_space<vmem>>, vector<32x128xf32>
    tpu.vector_store %arg7[%c0_6, %c0_7], %7 {strides = array<i32>} : memref<32x128xf32, #tpu.memory_space<vmem>>, vector<32x128xf32>,
    %c0_i32_8 = arith.constant 0 : i32
    %9 = arith.cmpi eq, %arg2, %c0_i32_8 : i32
    %10 = arith.extui %9 : i1 to i32
    %c0_i32_9 = arith.constant 0 : i32
    %11 = arith.cmpi ne, %10, %c0_i32_9 : i32
    scf.if %11 {
      %c0_10 = arith.constant 0 : index
      %c0_11 = arith.constant 0 : index
      %12 = vector.load %arg7[%c0_10, %c0_11] : memref<32x128xf32, #tpu.memory_space<vmem>>, vector<32x128xf32>
      %c0_12 = arith.constant 0 : index
      %c0_13 = arith.constant 0 : index
      %13 = vector.load %arg5[%c0_12, %c0_13] : memref<1x128xf32, #tpu.memory_space<vmem>>, vector<1x128xf32>
      %14 = vector.broadcast %13 : vector<1x128xf32> to vector<32x128xf32>
      %15 = arith.addf %12, %14 : vector<32x128xf32>
      %c0_14 = arith.constant 0 : index
      %c0_15 = arith.constant 0 : index
      %16 = vector.load %arg6[%c0_14, %c0_15] : memref<32x128xf32, #tpu.memory_space<vmem>>, vector<32x128xf32>
      tpu.vector_store %arg6[%c0_14, %c0_15], %15 {strides = array<i32>} : memref<32x128xf32, #tpu.memory_space<vmem>>, vector<32x128xf32>,
    } else {
    }
    return
  }
  func.func @transform_0(%arg0: i32, %arg1: i32, %arg2: i32) -> (i32, i32) {
    %c0_i32 = arith.constant 0 : i32
    return %arg0, %arg2 : i32, i32
  }
  func.func @transform_1(%arg0: i32, %arg1: i32, %arg2: i32) -> (i32, i32) {
    %c0_i32 = arith.constant 0 : i32
    return %arg2, %arg1 : i32, i32
  }
  func.func @transform_2(%arg0: i32, %arg1: i32, %arg2: i32) -> (i32, i32) {
    %c0_i32 = arith.constant 0 : i32
    %c0_i32_0 = arith.constant 0 : i32
    return %c0_i32, %arg1 : i32, i32
  }
  func.func @transform_3(%arg0: i32, %arg1: i32, %arg2: i32) -> (i32, i32) {
    %c0_i32 = arith.constant 0 : i32
    return %arg0, %arg1 : i32, i32
  }
}

module attributes {stable_mosaic.version = 11 : i64} {
  func.func @_affine_act_kernel(%arg0: i32, %arg1: i32, %arg2: memref<32x128xf32, #tpu.memory_space<vmem>>, %arg3: memref<1x128xf32, #tpu.memory_space<vmem>>, %arg4: memref<1x128xf32, #tpu.memory_space<vmem>>, %arg5: memref<32x128xbf16, #tpu.memory_space<vmem>>) attributes {dimension_semantics = [#tpu.dimension_semantics<parallel>, #tpu.dimension_semantics<parallel>], iteration_bounds = array<i64: 1, 1>, scalar_prefetch = 0 : i64, scratch_operands = 0 : i64, tpu.core_type = #tpu.core_type<tc>, window_params = [{transform_indices = @transform_0, window_bounds = array<i64: 32, 128>}, {transform_indices = @transform_1, window_bounds = array<i64: 1, 128>}, {transform_indices = @transform_2, window_bounds = array<i64: 1, 128>}, {transform_indices = @transform_3, window_bounds = array<i64: 32, 128>}]} {
    %c0 = arith.constant 0 : index
    %c0_0 = arith.constant 0 : index
    %0 = vector.load %arg2[%c0, %c0_0] : memref<32x128xf32, #tpu.memory_space<vmem>>, vector<32x128xf32>
    %c0_1 = arith.constant 0 : index
    %c0_2 = arith.constant 0 : index
    %1 = vector.load %arg3[%c0_1, %c0_2] : memref<1x128xf32, #tpu.memory_space<vmem>>, vector<1x128xf32>
    %2 = vector.broadcast %1 : vector<1x128xf32> to vector<32x128xf32>
    %3 = arith.mulf %0, %2 : vector<32x128xf32>
    %c0_3 = arith.constant 0 : index
    %c0_4 = arith.constant 0 : index
    %4 = vector.load %arg4[%c0_3, %c0_4] : memref<1x128xf32, #tpu.memory_space<vmem>>, vector<1x128xf32>
    %5 = vector.broadcast %4 : vector<1x128xf32> to vector<32x128xf32>
    %6 = arith.addf %3, %5 : vector<32x128xf32>
    %cst = arith.constant 0.000000e+00 : f32
    %7 = vector.broadcast %cst : f32 to vector<32x128xf32>
    %8 = arith.maximumf %6, %7 : vector<32x128xf32>
    %9 = arith.truncf %8 : vector<32x128xf32> to vector<32x128xbf16>
    %c0_5 = arith.constant 0 : index
    %c0_6 = arith.constant 0 : index
    %10 = vector.load %arg5[%c0_5, %c0_6] : memref<32x128xbf16, #tpu.memory_space<vmem>>, vector<32x128xbf16>
    tpu.vector_store %arg5[%c0_5, %c0_6], %9 {strides = array<i32>} : memref<32x128xbf16, #tpu.memory_space<vmem>>, vector<32x128xbf16>,
    return
  }
  func.func @transform_0(%arg0: i32, %arg1: i32) -> (i32, i32) {
    %c0_i32 = arith.constant 0 : i32
    return %arg0, %arg1 : i32, i32
  }
  func.func @transform_1(%arg0: i32, %arg1: i32) -> (i32, i32) {
    %c0_i32 = arith.constant 0 : i32
    %c0_i32_0 = arith.constant 0 : i32
    return %c0_i32, %arg1 : i32, i32
  }
  func.func @transform_2(%arg0: i32, %arg1: i32) -> (i32, i32) {
    %c0_i32 = arith.constant 0 : i32
    %c0_i32_0 = arith.constant 0 : i32
    return %c0_i32, %arg1 : i32, i32
  }
  func.func @transform_3(%arg0: i32, %arg1: i32) -> (i32, i32) {
    %c0_i32 = arith.constant 0 : i32
    return %arg0, %arg1 : i32, i32
  }
}

module attributes {stable_mosaic.version = 11 : i64} {
  func.func @_matmul_kernel(%arg0: i32, %arg1: i32, %arg2: i32, %arg3: memref<128x288xbf16, #tpu.memory_space<vmem>>, %arg4: memref<288x128xbf16, #tpu.memory_space<vmem>>, %arg5: memref<1x128xf32, #tpu.memory_space<vmem>>, %arg6: memref<128x128xf32, #tpu.memory_space<vmem>>, %arg7: memref<128x128xf32, #tpu.memory_space<vmem>>) attributes {dimension_semantics = [#tpu.dimension_semantics<parallel>, #tpu.dimension_semantics<parallel>, #tpu.dimension_semantics<arbitrary>], iteration_bounds = array<i64: 1, 1, 1>, scalar_prefetch = 0 : i64, scratch_operands = 1 : i64, tpu.core_type = #tpu.core_type<tc>, window_params = [{transform_indices = @transform_0, window_bounds = array<i64: 128, 288>}, {transform_indices = @transform_1, window_bounds = array<i64: 288, 128>}, {transform_indices = @transform_2, window_bounds = array<i64: 1, 128>}, {transform_indices = @transform_3, window_bounds = array<i64: 128, 128>}]} {
    %c0_i32 = arith.constant 0 : i32
    %0 = arith.cmpi eq, %arg2, %c0_i32 : i32
    %1 = arith.extui %0 : i1 to i32
    %c0_i32_0 = arith.constant 0 : i32
    %2 = arith.cmpi ne, %1, %c0_i32_0 : i32
    scf.if %2 {
      %cst_10 = arith.constant 0.000000e+00 : f32
      %12 = vector.broadcast %cst_10 : f32 to vector<128x128xf32>
      %c0_11 = arith.constant 0 : index
      %c0_12 = arith.constant 0 : index
      %13 = vector.load %arg7[%c0_11, %c0_12] : memref<128x128xf32, #tpu.memory_space<vmem>>, vector<128x128xf32>
      tpu.vector_store %arg7[%c0_11, %c0_12], %12 {strides = array<i32>} : memref<128x128xf32, #tpu.memory_space<vmem>>, vector<128x128xf32>,
    } else {
    }
    %c0 = arith.constant 0 : index
    %c0_1 = arith.constant 0 : index
    %3 = vector.load %arg7[%c0, %c0_1] : memref<128x128xf32, #tpu.memory_space<vmem>>, vector<128x128xf32>
    %c0_2 = arith.constant 0 : index
    %c0_3 = arith.constant 0 : index
    %4 = vector.load %arg3[%c0_2, %c0_3] : memref<128x288xbf16, #tpu.memory_space<vmem>>, vector<128x288xbf16>
    %c0_4 = arith.constant 0 : index
    %c0_5 = arith.constant 0 : index
    %5 = vector.load %arg4[%c0_4, %c0_5] : memref<288x128xbf16, #tpu.memory_space<vmem>>, vector<288x128xbf16>
    %cst = arith.constant dense<0.000000e+00> : vector<128x128xf32>
    %6 = tpu.matmul %4, %5, %cst {dimension_numbers = #tpu.dot_dimension_numbers<[1], [0], [0], [1], [0, 0, 1, 1], [], []>} : vector<128x288xbf16>, vector<288x128xbf16>, vector<128x128xf32> -> vector<128x128xf32>
    %7 = arith.addf %3, %6 : vector<128x128xf32>
    %c0_6 = arith.constant 0 : index
    %c0_7 = arith.constant 0 : index
    %8 = vector.load %arg7[%c0_6, %c0_7] : memref<128x128xf32, #tpu.memory_space<vmem>>, vector<128x128xf32>
    tpu.vector_store %arg7[%c0_6, %c0_7], %7 {strides = array<i32>} : memref<128x128xf32, #tpu.memory_space<vmem>>, vector<128x128xf32>,
    %c0_i32_8 = arith.constant 0 : i32
    %9 = arith.cmpi eq, %arg2, %c0_i32_8 : i32
    %10 = arith.extui %9 : i1 to i32
    %c0_i32_9 = arith.constant 0 : i32
    %11 = arith.cmpi ne, %10, %c0_i32_9 : i32
    scf.if %11 {
      %c0_10 = arith.constant 0 : index
      %c0_11 = arith.constant 0 : index
      %12 = vector.load %arg7[%c0_10, %c0_11] : memref<128x128xf32, #tpu.memory_space<vmem>>, vector<128x128xf32>
      %c0_12 = arith.constant 0 : index
      %c0_13 = arith.constant 0 : index
      %13 = vector.load %arg5[%c0_12, %c0_13] : memref<1x128xf32, #tpu.memory_space<vmem>>, vector<1x128xf32>
      %14 = vector.broadcast %13 : vector<1x128xf32> to vector<128x128xf32>
      %15 = arith.addf %12, %14 : vector<128x128xf32>
      %c0_14 = arith.constant 0 : index
      %c0_15 = arith.constant 0 : index
      %16 = vector.load %arg6[%c0_14, %c0_15] : memref<128x128xf32, #tpu.memory_space<vmem>>, vector<128x128xf32>
      tpu.vector_store %arg6[%c0_14, %c0_15], %15 {strides = array<i32>} : memref<128x128xf32, #tpu.memory_space<vmem>>, vector<128x128xf32>,
    } else {
    }
    return
  }
  func.func @transform_0(%arg0: i32, %arg1: i32, %arg2: i32) -> (i32, i32) {
    %c0_i32 = arith.constant 0 : i32
    return %arg0, %arg2 : i32, i32
  }
  func.func @transform_1(%arg0: i32, %arg1: i32, %arg2: i32) -> (i32, i32) {
    %c0_i32 = arith.constant 0 : i32
    return %arg2, %arg1 : i32, i32
  }
  func.func @transform_2(%arg0: i32, %arg1: i32, %arg2: i32) -> (i32, i32) {
    %c0_i32 = arith.constant 0 : i32
    %c0_i32_0 = arith.constant 0 : i32
    return %c0_i32, %arg1 : i32, i32
  }
  func.func @transform_3(%arg0: i32, %arg1: i32, %arg2: i32) -> (i32, i32) {
    %c0_i32 = arith.constant 0 : i32
    return %arg0, %arg1 : i32, i32
  }
}

module attributes {stable_mosaic.version = 11 : i64} {
  func.func @_colstats_kernel(%arg0: i32, %arg1: i32, %arg2: memref<128x64xf32, #tpu.memory_space<vmem>>, %arg3: memref<2x64xf32, #tpu.memory_space<vmem>>) attributes {dimension_semantics = [#tpu.dimension_semantics<parallel>, #tpu.dimension_semantics<arbitrary>], iteration_bounds = array<i64: 1, 1>, scalar_prefetch = 0 : i64, scratch_operands = 0 : i64, tpu.core_type = #tpu.core_type<tc>, window_params = [{transform_indices = @transform_0, window_bounds = array<i64: 128, 64>}, {transform_indices = @transform_1, window_bounds = array<i64: 2, 64>}]} {
    %c0_i32 = arith.constant 0 : i32
    %0 = arith.cmpi eq, %arg1, %c0_i32 : i32
    %1 = arith.extui %0 : i1 to i32
    %c0_i32_0 = arith.constant 0 : i32
    %2 = arith.cmpi ne, %1, %c0_i32_0 : i32
    scf.if %2 {
      %cst_10 = arith.constant 0.000000e+00 : f32
      %15 = vector.broadcast %cst_10 : f32 to vector<2x64xf32>
      %c0_11 = arith.constant 0 : index
      %c0_12 = arith.constant 0 : index
      %16 = vector.load %arg3[%c0_11, %c0_12] : memref<2x64xf32, #tpu.memory_space<vmem>>, vector<2x64xf32>
      tpu.vector_store %arg3[%c0_11, %c0_12], %15 {strides = array<i32>} : memref<2x64xf32, #tpu.memory_space<vmem>>, vector<2x64xf32>,
    } else {
    }
    %c0 = arith.constant 0 : index
    %c0_1 = arith.constant 0 : index
    %3 = vector.load %arg2[%c0, %c0_1] : memref<128x64xf32, #tpu.memory_space<vmem>>, vector<128x64xf32>
    %c0_2 = arith.constant 0 : index
    %c0_3 = arith.constant 0 : index
    %4 = vector.load %arg3[%c0_2, %c0_3] : memref<2x64xf32, #tpu.memory_space<vmem>>, vector<1x64xf32>
    %cst = arith.constant dense<0.000000e+00> : vector<64xf32>
    %5 = vector.multi_reduction <add>, %3, %cst [0] : vector<128x64xf32> to vector<64xf32>
    %6 = vector.shape_cast %5 : vector<64xf32> to vector<1x64xf32>
    %7 = arith.addf %4, %6 : vector<1x64xf32>
    %c0_4 = arith.constant 0 : index
    %c0_5 = arith.constant 0 : index
    %8 = vector.load %arg3[%c0_4, %c0_5] : memref<2x64xf32, #tpu.memory_space<vmem>>, vector<1x64xf32>
    tpu.vector_store %arg3[%c0_4, %c0_5], %7 {strides = array<i32>} : memref<2x64xf32, #tpu.memory_space<vmem>>, vector<1x64xf32>,
    %c1 = arith.constant 1 : index
    %c0_6 = arith.constant 0 : index
    %9 = vector.load %arg3[%c1, %c0_6] : memref<2x64xf32, #tpu.memory_space<vmem>>, vector<1x64xf32>
    %10 = arith.mulf %3, %3 : vector<128x64xf32>
    %cst_7 = arith.constant dense<0.000000e+00> : vector<64xf32>
    %11 = vector.multi_reduction <add>, %10, %cst_7 [0] : vector<128x64xf32> to vector<64xf32>
    %12 = vector.shape_cast %11 : vector<64xf32> to vector<1x64xf32>
    %13 = arith.addf %9, %12 : vector<1x64xf32>
    %c1_8 = arith.constant 1 : index
    %c0_9 = arith.constant 0 : index
    %14 = vector.load %arg3[%c1_8, %c0_9] : memref<2x64xf32, #tpu.memory_space<vmem>>, vector<1x64xf32>
    tpu.vector_store %arg3[%c1_8, %c0_9], %13 {strides = array<i32>} : memref<2x64xf32, #tpu.memory_space<vmem>>, vector<1x64xf32>,
    return
  }
  func.func @transform_0(%arg0: i32, %arg1: i32) -> (i32, i32) {
    %c0_i32 = arith.constant 0 : i32
    return %arg1, %arg0 : i32, i32
  }
  func.func @transform_1(%arg0: i32, %arg1: i32) -> (i32, i32) {
    %c0_i32 = arith.constant 0 : i32
    %c0_i32_0 = arith.constant 0 : i32
    return %c0_i32, %arg0 : i32, i32
  }
}

module attributes {stable_mosaic.version = 11 : i64} {
  func.func @_affine_act_kernel(%arg0: i32, %arg1: i32, %arg2: memref<128x64xf32, #tpu.memory_space<vmem>>, %arg3: memref<1x64xf32, #tpu.memory_space<vmem>>, %arg4: memref<1x64xf32, #tpu.memory_space<vmem>>, %arg5: memref<128x64xbf16, #tpu.memory_space<vmem>>) attributes {dimension_semantics = [#tpu.dimension_semantics<parallel>, #tpu.dimension_semantics<parallel>], iteration_bounds = array<i64: 1, 1>, scalar_prefetch = 0 : i64, scratch_operands = 0 : i64, tpu.core_type = #tpu.core_type<tc>, window_params = [{transform_indices = @transform_0, window_bounds = array<i64: 128, 64>}, {transform_indices = @transform_1, window_bounds = array<i64: 1, 64>}, {transform_indices = @transform_2, window_bounds = array<i64: 1, 64>}, {transform_indices = @transform_3, window_bounds = array<i64: 128, 64>}]} {
    %c0 = arith.constant 0 : index
    %c0_0 = arith.constant 0 : index
    %0 = vector.load %arg2[%c0, %c0_0] : memref<128x64xf32, #tpu.memory_space<vmem>>, vector<128x64xf32>
    %c0_1 = arith.constant 0 : index
    %c0_2 = arith.constant 0 : index
    %1 = vector.load %arg3[%c0_1, %c0_2] : memref<1x64xf32, #tpu.memory_space<vmem>>, vector<1x64xf32>
    %2 = vector.broadcast %1 : vector<1x64xf32> to vector<128x64xf32>
    %3 = arith.mulf %0, %2 : vector<128x64xf32>
    %c0_3 = arith.constant 0 : index
    %c0_4 = arith.constant 0 : index
    %4 = vector.load %arg4[%c0_3, %c0_4] : memref<1x64xf32, #tpu.memory_space<vmem>>, vector<1x64xf32>
    %5 = vector.broadcast %4 : vector<1x64xf32> to vector<128x64xf32>
    %6 = arith.addf %3, %5 : vector<128x64xf32>
    %cst = arith.constant 0.000000e+00 : f32
    %7 = vector.broadcast %cst : f32 to vector<128x64xf32>
    %8 = arith.maximumf %6, %7 : vector<128x64xf32>
    %9 = arith.truncf %8 : vector<128x64xf32> to vector<128x64xbf16>
    %c0_5 = arith.constant 0 : index
    %c0_6 = arith.constant 0 : index
    %10 = vector.load %arg5[%c0_5, %c0_6] : memref<128x64xbf16, #tpu.memory_space<vmem>>, vector<128x64xbf16>
    tpu.vector_store %arg5[%c0_5, %c0_6], %9 {strides = array<i32>} : memref<128x64xbf16, #tpu.memory_space<vmem>>, vector<128x64xbf16>,
    return
  }
  func.func @transform_0(%arg0: i32, %arg1: i32) -> (i32, i32) {
    %c0_i32 = arith.constant 0 : i32
    return %arg0, %arg1 : i32, i32
  }
  func.func @transform_1(%arg0: i32, %arg1: i32) -> (i32, i32) {
    %c0_i32 = arith.constant 0 : i32
    %c0_i32_0 = arith.constant 0 : i32
    return %c0_i32, %arg1 : i32, i32
  }
  func.func @transform_2(%arg0: i32, %arg1: i32) -> (i32, i32) {
    %c0_i32 = arith.constant 0 : i32
    %c0_i32_0 = arith.constant 0 : i32
    return %c0_i32, %arg1 : i32, i32
  }
  func.func @transform_3(%arg0: i32, %arg1: i32) -> (i32, i32) {
    %c0_i32 = arith.constant 0 : i32
    return %arg0, %arg1 : i32, i32
  }
}

module attributes {stable_mosaic.version = 11 : i64} {
  func.func @_matmul_kernel(%arg0: i32, %arg1: i32, %arg2: i32, %arg3: memref<256x144xbf16, #tpu.memory_space<vmem>>, %arg4: memref<144x128xbf16, #tpu.memory_space<vmem>>, %arg5: memref<1x128xf32, #tpu.memory_space<vmem>>, %arg6: memref<256x128xf32, #tpu.memory_space<vmem>>, %arg7: memref<256x128xf32, #tpu.memory_space<vmem>>) attributes {dimension_semantics = [#tpu.dimension_semantics<parallel>, #tpu.dimension_semantics<parallel>, #tpu.dimension_semantics<arbitrary>], iteration_bounds = array<i64: 2, 1, 1>, scalar_prefetch = 0 : i64, scratch_operands = 1 : i64, tpu.core_type = #tpu.core_type<tc>, window_params = [{transform_indices = @transform_0, window_bounds = array<i64: 256, 144>}, {transform_indices = @transform_1, window_bounds = array<i64: 144, 128>}, {transform_indices = @transform_2, window_bounds = array<i64: 1, 128>}, {transform_indices = @transform_3, window_bounds = array<i64: 256, 128>}]} {
    %c0_i32 = arith.constant 0 : i32
    %0 = arith.cmpi eq, %arg2, %c0_i32 : i32
    %1 = arith.extui %0 : i1 to i32
    %c0_i32_0 = arith.constant 0 : i32
    %2 = arith.cmpi ne, %1, %c0_i32_0 : i32
    scf.if %2 {
      %cst_10 = arith.constant 0.000000e+00 : f32
      %12 = vector.broadcast %cst_10 : f32 to vector<256x128xf32>
      %c0_11 = arith.constant 0 : index
      %c0_12 = arith.constant 0 : index
      %13 = vector.load %arg7[%c0_11, %c0_12] : memref<256x128xf32, #tpu.memory_space<vmem>>, vector<256x128xf32>
      tpu.vector_store %arg7[%c0_11, %c0_12], %12 {strides = array<i32>} : memref<256x128xf32, #tpu.memory_space<vmem>>, vector<256x128xf32>,
    } else {
    }
    %c0 = arith.constant 0 : index
    %c0_1 = arith.constant 0 : index
    %3 = vector.load %arg7[%c0, %c0_1] : memref<256x128xf32, #tpu.memory_space<vmem>>, vector<256x128xf32>
    %c0_2 = arith.constant 0 : index
    %c0_3 = arith.constant 0 : index
    %4 = vector.load %arg3[%c0_2, %c0_3] : memref<256x144xbf16, #tpu.memory_space<vmem>>, vector<256x144xbf16>
    %c0_4 = arith.constant 0 : index
    %c0_5 = arith.constant 0 : index
    %5 = vector.load %arg4[%c0_4, %c0_5] : memref<144x128xbf16, #tpu.memory_space<vmem>>, vector<144x128xbf16>
    %cst = arith.constant dense<0.000000e+00> : vector<256x128xf32>
    %6 = tpu.matmul %4, %5, %cst {dimension_numbers = #tpu.dot_dimension_numbers<[1], [0], [0], [1], [0, 0, 1, 1], [], []>} : vector<256x144xbf16>, vector<144x128xbf16>, vector<256x128xf32> -> vector<256x128xf32>
    %7 = arith.addf %3, %6 : vector<256x128xf32>
    %c0_6 = arith.constant 0 : index
    %c0_7 = arith.constant 0 : index
    %8 = vector.load %arg7[%c0_6, %c0_7] : memref<256x128xf32, #tpu.memory_space<vmem>>, vector<256x128xf32>
    tpu.vector_store %arg7[%c0_6, %c0_7], %7 {strides = array<i32>} : memref<256x128xf32, #tpu.memory_space<vmem>>, vector<256x128xf32>,
    %c0_i32_8 = arith.constant 0 : i32
    %9 = arith.cmpi eq, %arg2, %c0_i32_8 : i32
    %10 = arith.extui %9 : i1 to i32
    %c0_i32_9 = arith.constant 0 : i32
    %11 = arith.cmpi ne, %10, %c0_i32_9 : i32
    scf.if %11 {
      %c0_10 = arith.constant 0 : index
      %c0_11 = arith.constant 0 : index
      %12 = vector.load %arg7[%c0_10, %c0_11] : memref<256x128xf32, #tpu.memory_space<vmem>>, vector<256x128xf32>
      %c0_12 = arith.constant 0 : index
      %c0_13 = arith.constant 0 : index
      %13 = vector.load %arg5[%c0_12, %c0_13] : memref<1x128xf32, #tpu.memory_space<vmem>>, vector<1x128xf32>
      %14 = vector.broadcast %13 : vector<1x128xf32> to vector<256x128xf32>
      %15 = arith.addf %12, %14 : vector<256x128xf32>
      %c0_14 = arith.constant 0 : index
      %c0_15 = arith.constant 0 : index
      %16 = vector.load %arg6[%c0_14, %c0_15] : memref<256x128xf32, #tpu.memory_space<vmem>>, vector<256x128xf32>
      tpu.vector_store %arg6[%c0_14, %c0_15], %15 {strides = array<i32>} : memref<256x128xf32, #tpu.memory_space<vmem>>, vector<256x128xf32>,
    } else {
    }
    return
  }
  func.func @transform_0(%arg0: i32, %arg1: i32, %arg2: i32) -> (i32, i32) {
    %c0_i32 = arith.constant 0 : i32
    return %arg0, %arg2 : i32, i32
  }
  func.func @transform_1(%arg0: i32, %arg1: i32, %arg2: i32) -> (i32, i32) {
    %c0_i32 = arith.constant 0 : i32
    return %arg2, %arg1 : i32, i32
  }
  func.func @transform_2(%arg0: i32, %arg1: i32, %arg2: i32) -> (i32, i32) {
    %c0_i32 = arith.constant 0 : i32
    %c0_i32_0 = arith.constant 0 : i32
    return %c0_i32, %arg1 : i32, i32
  }
  func.func @transform_3(%arg0: i32, %arg1: i32, %arg2: i32) -> (i32, i32) {
    %c0_i32 = arith.constant 0 : i32
    return %arg0, %arg1 : i32, i32
  }
}

module attributes {stable_mosaic.version = 11 : i64} {
  func.func @_colstats_kernel(%arg0: i32, %arg1: i32, %arg2: memref<512x32xf32, #tpu.memory_space<vmem>>, %arg3: memref<2x32xf32, #tpu.memory_space<vmem>>) attributes {dimension_semantics = [#tpu.dimension_semantics<parallel>, #tpu.dimension_semantics<arbitrary>], iteration_bounds = array<i64: 1, 1>, scalar_prefetch = 0 : i64, scratch_operands = 0 : i64, tpu.core_type = #tpu.core_type<tc>, window_params = [{transform_indices = @transform_0, window_bounds = array<i64: 512, 32>}, {transform_indices = @transform_1, window_bounds = array<i64: 2, 32>}]} {
    %c0_i32 = arith.constant 0 : i32
    %0 = arith.cmpi eq, %arg1, %c0_i32 : i32
    %1 = arith.extui %0 : i1 to i32
    %c0_i32_0 = arith.constant 0 : i32
    %2 = arith.cmpi ne, %1, %c0_i32_0 : i32
    scf.if %2 {
      %cst_10 = arith.constant 0.000000e+00 : f32
      %15 = vector.broadcast %cst_10 : f32 to vector<2x32xf32>
      %c0_11 = arith.constant 0 : index
      %c0_12 = arith.constant 0 : index
      %16 = vector.load %arg3[%c0_11, %c0_12] : memref<2x32xf32, #tpu.memory_space<vmem>>, vector<2x32xf32>
      tpu.vector_store %arg3[%c0_11, %c0_12], %15 {strides = array<i32>} : memref<2x32xf32, #tpu.memory_space<vmem>>, vector<2x32xf32>,
    } else {
    }
    %c0 = arith.constant 0 : index
    %c0_1 = arith.constant 0 : index
    %3 = vector.load %arg2[%c0, %c0_1] : memref<512x32xf32, #tpu.memory_space<vmem>>, vector<512x32xf32>
    %c0_2 = arith.constant 0 : index
    %c0_3 = arith.constant 0 : index
    %4 = vector.load %arg3[%c0_2, %c0_3] : memref<2x32xf32, #tpu.memory_space<vmem>>, vector<1x32xf32>
    %cst = arith.constant dense<0.000000e+00> : vector<32xf32>
    %5 = vector.multi_reduction <add>, %3, %cst [0] : vector<512x32xf32> to vector<32xf32>
    %6 = vector.shape_cast %5 : vector<32xf32> to vector<1x32xf32>
    %7 = arith.addf %4, %6 : vector<1x32xf32>
    %c0_4 = arith.constant 0 : index
    %c0_5 = arith.constant 0 : index
    %8 = vector.load %arg3[%c0_4, %c0_5] : memref<2x32xf32, #tpu.memory_space<vmem>>, vector<1x32xf32>
    tpu.vector_store %arg3[%c0_4, %c0_5], %7 {strides = array<i32>} : memref<2x32xf32, #tpu.memory_space<vmem>>, vector<1x32xf32>,
    %c1 = arith.constant 1 : index
    %c0_6 = arith.constant 0 : index
    %9 = vector.load %arg3[%c1, %c0_6] : memref<2x32xf32, #tpu.memory_space<vmem>>, vector<1x32xf32>
    %10 = arith.mulf %3, %3 : vector<512x32xf32>
    %cst_7 = arith.constant dense<0.000000e+00> : vector<32xf32>
    %11 = vector.multi_reduction <add>, %10, %cst_7 [0] : vector<512x32xf32> to vector<32xf32>
    %12 = vector.shape_cast %11 : vector<32xf32> to vector<1x32xf32>
    %13 = arith.addf %9, %12 : vector<1x32xf32>
    %c1_8 = arith.constant 1 : index
    %c0_9 = arith.constant 0 : index
    %14 = vector.load %arg3[%c1_8, %c0_9] : memref<2x32xf32, #tpu.memory_space<vmem>>, vector<1x32xf32>
    tpu.vector_store %arg3[%c1_8, %c0_9], %13 {strides = array<i32>} : memref<2x32xf32, #tpu.memory_space<vmem>>, vector<1x32xf32>,
    return
  }
  func.func @transform_0(%arg0: i32, %arg1: i32) -> (i32, i32) {
    %c0_i32 = arith.constant 0 : i32
    return %arg1, %arg0 : i32, i32
  }
  func.func @transform_1(%arg0: i32, %arg1: i32) -> (i32, i32) {
    %c0_i32 = arith.constant 0 : i32
    %c0_i32_0 = arith.constant 0 : i32
    return %c0_i32, %arg0 : i32, i32
  }
}

module attributes {stable_mosaic.version = 11 : i64} {
  func.func @_affine_act_kernel(%arg0: i32, %arg1: i32, %arg2: memref<512x32xf32, #tpu.memory_space<vmem>>, %arg3: memref<1x32xf32, #tpu.memory_space<vmem>>, %arg4: memref<1x32xf32, #tpu.memory_space<vmem>>, %arg5: memref<512x32xbf16, #tpu.memory_space<vmem>>) attributes {dimension_semantics = [#tpu.dimension_semantics<parallel>, #tpu.dimension_semantics<parallel>], iteration_bounds = array<i64: 1, 1>, scalar_prefetch = 0 : i64, scratch_operands = 0 : i64, tpu.core_type = #tpu.core_type<tc>, window_params = [{transform_indices = @transform_0, window_bounds = array<i64: 512, 32>}, {transform_indices = @transform_1, window_bounds = array<i64: 1, 32>}, {transform_indices = @transform_2, window_bounds = array<i64: 1, 32>}, {transform_indices = @transform_3, window_bounds = array<i64: 512, 32>}]} {
    %c0 = arith.constant 0 : index
    %c0_0 = arith.constant 0 : index
    %0 = vector.load %arg2[%c0, %c0_0] : memref<512x32xf32, #tpu.memory_space<vmem>>, vector<512x32xf32>
    %c0_1 = arith.constant 0 : index
    %c0_2 = arith.constant 0 : index
    %1 = vector.load %arg3[%c0_1, %c0_2] : memref<1x32xf32, #tpu.memory_space<vmem>>, vector<1x32xf32>
    %2 = vector.broadcast %1 : vector<1x32xf32> to vector<512x32xf32>
    %3 = arith.mulf %0, %2 : vector<512x32xf32>
    %c0_3 = arith.constant 0 : index
    %c0_4 = arith.constant 0 : index
    %4 = vector.load %arg4[%c0_3, %c0_4] : memref<1x32xf32, #tpu.memory_space<vmem>>, vector<1x32xf32>
    %5 = vector.broadcast %4 : vector<1x32xf32> to vector<512x32xf32>
    %6 = arith.addf %3, %5 : vector<512x32xf32>
    %cst = arith.constant 0.000000e+00 : f32
    %7 = vector.broadcast %cst : f32 to vector<512x32xf32>
    %8 = arith.maximumf %6, %7 : vector<512x32xf32>
    %9 = arith.truncf %8 : vector<512x32xf32> to vector<512x32xbf16>
    %c0_5 = arith.constant 0 : index
    %c0_6 = arith.constant 0 : index
    %10 = vector.load %arg5[%c0_5, %c0_6] : memref<512x32xbf16, #tpu.memory_space<vmem>>, vector<512x32xbf16>
    tpu.vector_store %arg5[%c0_5, %c0_6], %9 {strides = array<i32>} : memref<512x32xbf16, #tpu.memory_space<vmem>>, vector<512x32xbf16>,
    return
  }
  func.func @transform_0(%arg0: i32, %arg1: i32) -> (i32, i32) {
    %c0_i32 = arith.constant 0 : i32
    return %arg0, %arg1 : i32, i32
  }
  func.func @transform_1(%arg0: i32, %arg1: i32) -> (i32, i32) {
    %c0_i32 = arith.constant 0 : i32
    %c0_i32_0 = arith.constant 0 : i32
    return %c0_i32, %arg1 : i32, i32
  }
  func.func @transform_2(%arg0: i32, %arg1: i32) -> (i32, i32) {
    %c0_i32 = arith.constant 0 : i32
    %c0_i32_0 = arith.constant 0 : i32
    return %c0_i32, %arg1 : i32, i32
  }
  func.func @transform_3(%arg0: i32, %arg1: i32) -> (i32, i32) {
    %c0_i32 = arith.constant 0 : i32
    return %arg0, %arg1 : i32, i32
  }
}

module attributes {stable_mosaic.version = 11 : i64} {
  func.func @_matmul_kernel(%arg0: i32, %arg1: i32, %arg2: i32, %arg3: memref<256x72xbf16, #tpu.memory_space<vmem>>, %arg4: memref<72x128xbf16, #tpu.memory_space<vmem>>, %arg5: memref<1x128xf32, #tpu.memory_space<vmem>>, %arg6: memref<256x128xf32, #tpu.memory_space<vmem>>, %arg7: memref<256x128xf32, #tpu.memory_space<vmem>>) attributes {dimension_semantics = [#tpu.dimension_semantics<parallel>, #tpu.dimension_semantics<parallel>, #tpu.dimension_semantics<arbitrary>], iteration_bounds = array<i64: 8, 1, 1>, scalar_prefetch = 0 : i64, scratch_operands = 1 : i64, tpu.core_type = #tpu.core_type<tc>, window_params = [{transform_indices = @transform_0, window_bounds = array<i64: 256, 72>}, {transform_indices = @transform_1, window_bounds = array<i64: 72, 128>}, {transform_indices = @transform_2, window_bounds = array<i64: 1, 128>}, {transform_indices = @transform_3, window_bounds = array<i64: 256, 128>}]} {
    %c0_i32 = arith.constant 0 : i32
    %0 = arith.cmpi eq, %arg2, %c0_i32 : i32
    %1 = arith.extui %0 : i1 to i32
    %c0_i32_0 = arith.constant 0 : i32
    %2 = arith.cmpi ne, %1, %c0_i32_0 : i32
    scf.if %2 {
      %cst_10 = arith.constant 0.000000e+00 : f32
      %12 = vector.broadcast %cst_10 : f32 to vector<256x128xf32>
      %c0_11 = arith.constant 0 : index
      %c0_12 = arith.constant 0 : index
      %13 = vector.load %arg7[%c0_11, %c0_12] : memref<256x128xf32, #tpu.memory_space<vmem>>, vector<256x128xf32>
      tpu.vector_store %arg7[%c0_11, %c0_12], %12 {strides = array<i32>} : memref<256x128xf32, #tpu.memory_space<vmem>>, vector<256x128xf32>,
    } else {
    }
    %c0 = arith.constant 0 : index
    %c0_1 = arith.constant 0 : index
    %3 = vector.load %arg7[%c0, %c0_1] : memref<256x128xf32, #tpu.memory_space<vmem>>, vector<256x128xf32>
    %c0_2 = arith.constant 0 : index
    %c0_3 = arith.constant 0 : index
    %4 = vector.load %arg3[%c0_2, %c0_3] : memref<256x72xbf16, #tpu.memory_space<vmem>>, vector<256x72xbf16>
    %c0_4 = arith.constant 0 : index
    %c0_5 = arith.constant 0 : index
    %5 = vector.load %arg4[%c0_4, %c0_5] : memref<72x128xbf16, #tpu.memory_space<vmem>>, vector<72x128xbf16>
    %cst = arith.constant dense<0.000000e+00> : vector<256x128xf32>
    %6 = tpu.matmul %4, %5, %cst {dimension_numbers = #tpu.dot_dimension_numbers<[1], [0], [0], [1], [0, 0, 1, 1], [], []>} : vector<256x72xbf16>, vector<72x128xbf16>, vector<256x128xf32> -> vector<256x128xf32>
    %7 = arith.addf %3, %6 : vector<256x128xf32>
    %c0_6 = arith.constant 0 : index
    %c0_7 = arith.constant 0 : index
    %8 = vector.load %arg7[%c0_6, %c0_7] : memref<256x128xf32, #tpu.memory_space<vmem>>, vector<256x128xf32>
    tpu.vector_store %arg7[%c0_6, %c0_7], %7 {strides = array<i32>} : memref<256x128xf32, #tpu.memory_space<vmem>>, vector<256x128xf32>,
    %c0_i32_8 = arith.constant 0 : i32
    %9 = arith.cmpi eq, %arg2, %c0_i32_8 : i32
    %10 = arith.extui %9 : i1 to i32
    %c0_i32_9 = arith.constant 0 : i32
    %11 = arith.cmpi ne, %10, %c0_i32_9 : i32
    scf.if %11 {
      %c0_10 = arith.constant 0 : index
      %c0_11 = arith.constant 0 : index
      %12 = vector.load %arg7[%c0_10, %c0_11] : memref<256x128xf32, #tpu.memory_space<vmem>>, vector<256x128xf32>
      %c0_12 = arith.constant 0 : index
      %c0_13 = arith.constant 0 : index
      %13 = vector.load %arg5[%c0_12, %c0_13] : memref<1x128xf32, #tpu.memory_space<vmem>>, vector<1x128xf32>
      %14 = vector.broadcast %13 : vector<1x128xf32> to vector<256x128xf32>
      %15 = arith.addf %12, %14 : vector<256x128xf32>
      %16 = math.tanh %15 : vector<256x128xf32>
      %c0_14 = arith.constant 0 : index
      %c0_15 = arith.constant 0 : index
      %17 = vector.load %arg6[%c0_14, %c0_15] : memref<256x128xf32, #tpu.memory_space<vmem>>, vector<256x128xf32>
      tpu.vector_store %arg6[%c0_14, %c0_15], %16 {strides = array<i32>} : memref<256x128xf32, #tpu.memory_space<vmem>>, vector<256x128xf32>,
    } else {
    }
    return
  }
  func.func @transform_0(%arg0: i32, %arg1: i32, %arg2: i32) -> (i32, i32) {
    %c0_i32 = arith.constant 0 : i32
    return %arg0, %arg2 : i32, i32
  }
  func.func @transform_1(%arg0: i32, %arg1: i32, %arg2: i32) -> (i32, i32) {
    %c0_i32 = arith.constant 0 : i32
    return %arg2, %arg1 : i32, i32
  }
  func.func @transform_2(%arg0: i32, %arg1: i32, %arg2: i32) -> (i32, i32) {
    %c0_i32 = arith.constant 0 : i32
    %c0_i32_0 = arith.constant 0 : i32
    return %c0_i32, %arg1 : i32, i32
  }
  func.func @transform_3(%arg0: i32, %arg1: i32, %arg2: i32) -> (i32, i32) {
    %c0_i32 = arith.constant 0 : i32
    return %arg0, %arg1 : i32, i32
  }
}

</mosaic_0001>

<bundles_post_ra>
// kernel: squeeze.8
= control target key start
LH: loop header
LB: loop body
LE: loop exit
PB: predicated region body
PF: predicated region fallthrough
CT: control target
= control target key end

     0   :  { %vm3_vm0 = vcmask 523264   ;;  %s13_s9 = smov 64   ;;  %s33_s0 = inlined_call_operand.vmem [shape: f32[1024], index: 0, kind: input, shape index: {}]   ;;  %s34_s1 = inlined_call_operand.vmem [shape: f32[16,64], index: 1, kind: output, shape index: {}]  }
   0x1   :  { %v2_v0 = vld [vmem:[%s33_s0] sm:$0xff]  }
   0x2   :  { %4 = vst.msk [vmem:[%s34_s1] ss:$2 sm:$0xff] %vm3_vm0, %v2_v0   ;;  %6 = vrot.lane.b32.xlu0 %v2_v0, %s13_s9 }
  0x74   :  { %v7_v1 = vpop.permute.xlu0 %6  }
  0x75   :  { %11 = vst.msk [vmem:[%s34_s1 + $0x1] ss:$2 sm:$0xff] %vm3_vm0, %v7_v1  }

// kernel: tile.48
= control target key start
LH: loop header
LB: loop body
LE: loop exit
PB: predicated region body
PF: predicated region fallthrough
CT: control target
= control target key end

     0   :  { %s28_s0 = inlined_call_operand.vmem [shape: f32[64], index: 0, kind: input, shape index: {}]   ;;  %s29_s1 = inlined_call_operand.vmem [shape: f32[16,64], index: 1, kind: output, shape index: {}]  }
   0x1   :  { %v4_v0 = vld [vmem:[%s28_s0] ss:$0 sm:$0xff] }
   0x2   :  { %5 = vst [vmem:[%s29_s1] sm:$0xff] %v4_v0  ;;  %8 = vst [vmem:[%s29_s1 + $0x8] sm:$0xff] %v4_v0 }

// kernel: tile.49
= control target key start
LH: loop header
LB: loop body
LE: loop exit
PB: predicated region body
PF: predicated region fallthrough
CT: control target
= control target key end

     0   :  { %vm3_vm0 = vcmask 523264   ;;  %vm10_vm1 = vcmask 1048064   ;;  %s125_s0 = inlined_call_operand.vmem [shape: f32[16,64], index: 0, kind: input, shape index: {}]   ;;  %s126_s1 = inlined_call_operand.vmem [shape: f32[1,1024], index: 1, kind: output, shape index: {}]  }
   0x1   :  { %v75_v0 = vld [vmem:[%s125_s0 + $0x1] ss:$2 sm:$0xff]   ;;  %v2_v1 = vld [vmem:[%s125_s0] ss:$2 sm:$0xff]   ;;  %s84_s0 = smov 64  }
   0x2   :  { %8 = vrot.lane.b32.xlu0 %v75_v0, %s84_s0  ;;  %4 = vst.msk [vmem:[#allocation0] ss:$8 sm:$0xf] %vm3_vm0, %v2_v1   ;;  %5 = vst.msk [vmem:[#allocation0] ss:$8 sm:$0xf0] %vm3_vm0, %v2_v1  }
  0x74   :  { %v9_v2 = vpop.permute.xlu0 %8  }
  0x75   :  { %11 = vst.msk [vmem:[#allocation0] ss:$8 sm:$0xf] %vm10_vm1, %v9_v2   ;;  %12 = vst.msk [vmem:[#allocation0] ss:$8 sm:$0xf0] %vm10_vm1, %v9_v2  }
  0x7c   :  { %v17_v3 = vld [vmem:[#allocation0] sm:$0x1]  ;;  %v22_v4 = vld [vmem:[#allocation0 + $0x8] sm:$0x1]  ;;  %v28_v5 = vld [vmem:[#allocation0 + $0x10] sm:$0x1] }
  0x7d   :  { %20 = vst [vmem:[%s126_s1] sm:$0x1] %v17_v3  ;;  %76 = vst [vmem:[%s126_s1 + $0x1] sm:$0x1] %v22_v4  ;;  %v35_v6 = vld [vmem:[#allocation0 + $0x18] sm:$0x1] }
  0x7e   :  { %77 = vst [vmem:[%s126_s1 + $0x2] sm:$0x1] %v28_v5  ;;  %v42_v7 = vld [vmem:[#allocation0 + $0x20] sm:$0x1]  ;;  %v49_v8 = vld [vmem:[#allocation0 + $0x28] sm:$0x1] }
  0x7f   :  { %78 = vst [vmem:[%s126_s1 + $0x3] sm:$0x1] %v35_v6  ;;  %79 = vst [vmem:[%s126_s1 + $0x4] sm:$0x1] %v42_v7  ;;  %v56_v9 = vld [vmem:[#allocation0 + $0x30] sm:$0x1] }
  0x80   :  { %80 = vst [vmem:[%s126_s1 + $0x5] sm:$0x1] %v49_v8  ;;  %v63_v10 = vld [vmem:[#allocation0 + $0x38] sm:$0x1]  ;;  %81 = vst [vmem:[%s126_s1 + $0x6] sm:$0x1] %v56_v9 }
  0x81   :  { %82 = vst [vmem:[%s126_s1 + $0x7] sm:$0x1] %v63_v10 }

// kernel: netG_forward.14
= control target key start
LH: loop header
LB: loop body
LE: loop exit
PB: predicated region body
PF: predicated region fallthrough
CT: control target
= control target key end

     0   :  { %s472_s6 = smov 0   ;;  %s474_s7 = smov 0   ;;  %s526_s0 = inlined_call_operand.vmem [shape: f32[2,1024], index: 0, kind: input, shape index: {}]   ;;  %s527_s1 = inlined_call_operand.vmem [shape: f32[2,1024], index: 1, kind: output, shape index: {}]  }
   0x1   :  { %s476_s8 = smov 0  }
   0x2 LB: > { %s23_s9 = sadd.s32 1, %s453_s7  ;;  %p398_p0 = scmp.ge.s32.totalorder %s457_s8, 1  ;;  %s457_s8 = sphi %s476_s8, %s11_s8   ;;  %s453_s7 = sphi %s474_s7, %s529_s7   ;;  %s449_s6 = sphi %s472_s6, %s528_s6  }
   0x3   : > { %p25_p1 = scmp.ge.s32.totalorder %s23_s9, 2  ;;  %p106_p2 = scmp.lt.s32.totalorder %s457_s8, 3 }
   0x5   : > { %s531_s9 = smov (%p25_p1, %s23_s9), 0  ;;  %p107_p3 = pnand %p398_p0, %p106_p2 }
   0x6   : > { %s399_s10 = sshll.u32 (!%p107_p3), %s449_s6, 2 }
   0x7   : > { %110 = sbr.rel (%p107_p3) target bundleno = 50 (0x32), region = 24  ;;  %p133_p4 = scmp.lt.s32.totalorder (!%p107_p3), %s399_s10, 7 }
   0xc   : > { %v158_v0 = vlaneseq  ;;  %v459_v1 = vmov 1983009808   ;;  %s533_s10 = smov (!%p133_p4, %s399_s10), 7  ;;  %v460_v6 = vmov 0.0   ;;  %vm175_vm0 = vcmask 1041408  }
   0xd   : > { %v156_v2 = vunpack.c.l.s4 %v459_v1  ;;  %s400_s11 = sshll.u32 %s533_s10, 1  ;;  %v461_v8 = vmov 1966171168  }
   0xe   : > { %v491_v3 = vshrl.u32 %v158_v0, 7  ;;  %s138_s14 = scalar_lea.vmem %s526_s0, %s400_s11  ;;  %s500_s17 = scalar_lea.vmem %s527_s1, %s400_s11  ;;  %v211_v9 = vunpack.c.l.s4 %v461_v8  ;;  %vm236_vm1 = vcmp.lt.s32.totalorder %v158_v0, 512 }
   0xf   : > { %v157_v4 = vunpack.c.0.s8 %v156_v2  ;;  %150 = vst [vmem:[%s500_s17] sm:$0xff] %v460_v6  ;;  %v151_v7 = vld [vmem:[%s138_s14] sm:$0xff] }
  0x10   : > { %v154_v10 = vcombine.high %v151_v7, %v151_v7  ;;  %v241_v11 = vmul.f32 %v151_v7, %v151_v7  ;;  %v212_v18 = vunpack.c.0.s8 %v211_v9 }
  0x11   : > { %v160_v5 = vsub.s32 %v157_v4, %v491_v3 }
  0x12   : > { %v243_v13 = vcombine.high %v241_v11, %v241_v11 }
  0x13   : > { %v161_v12 = vrot.slane %v151_v7, %v160_v5  ;;  %v168_v14 = vrot.slane %v154_v10, %v160_v5  ;;  %v250_v19 = vrot.slane %v241_v11, %v160_v5 }
  0x14   : > { %v257_v23 = vrot.slane %v243_v13, %v160_v5  ;;  %v215_v5 = vsub.s32 %v212_v18, %v491_v3 }
  0x15   : > { %v169_v15 = vcombine.high %v161_v12, %v161_v12  ;;  %v176_v16 = vsel %vm175_vm0, %v161_v12, 0.0  ;;  %v170_v20 = vcombine.high %v168_v14, %v168_v14  ;;  %v190_v22 = vsel %vm175_vm0, %v168_v14, 0.0 }
  0x16   : > { %v177_v17 = vrot.slane %v176_v16, 4  ;;  %v191_v26 = vrot.slane %v190_v22, 4  ;;  %v258_v27 = vcombine.high %v250_v19, %v250_v19  ;;  %v259_v29 = vcombine.high %v257_v23, %v257_v23 }
  0x17   : > { %v183_v21 = vsel %vm175_vm0, %v169_v15, 0.0  ;;  %v197_v28 = vsel %vm175_vm0, %v170_v20, 0.0  ;;  %v264_v30 = vsel %vm175_vm0, %v250_v19, 0.0  ;;  %v278_v31 = vsel %vm175_vm0, %v257_v23, 0.0 }
  0x18   : > { %v178_v24 = vadd.f32 %v177_v17, %v176_v16  ;;  %v184_v25 = vrot.slane %v183_v21, 4  ;;  %v192_v34 = vadd.f32 %v191_v26, %v190_v22  ;;  %v198_v35 = vrot.slane %v197_v28, 4  ;;  %v152_v23 = vld [vmem:[%s500_s17] ss:$2 sm:$0xf] }
  0x19   : > { %v265_v36 = vrot.slane %v264_v30, 4  ;;  %v271_v37 = vsel %vm175_vm0, %v258_v27, 0.0  ;;  %v279_v38 = vrot.slane %v278_v31, 4  ;;  %v285_v39 = vsel %vm175_vm0, %v259_v29, 0.0 }
  0x1a   : > { %v179_v32 = vrot.slane %v178_v24, 2  ;;  %v185_v33 = vadd.f32 %v184_v25, %v183_v21  ;;  %v193_v42 = vrot.slane %v192_v34, 2  ;;  %v199_v43 = vadd.f32 %v198_v35, %v197_v28  ;;  %v403_v29 = vld [vmem:[%s500_s17 + $0x1] ss:$2 sm:$0xf] }
  0x1b   : > { %v266_v44 = vadd.f32 %v265_v36, %v264_v30  ;;  %v272_v45 = vrot.slane %v271_v37, 4  ;;  %v280_v46 = vadd.f32 %v279_v38, %v278_v31  ;;  %v286_v47 = vrot.slane %v285_v39, 4 }
  0x1c   : > { %v180_v40 = vadd.f32 %v179_v32, %v178_v24  ;;  %v186_v41 = vrot.slane %v185_v33, 2  ;;  %v194_v50 = vadd.f32 %v193_v42, %v192_v34  ;;  %v200_v51 = vrot.slane %v199_v43, 2 }
  0x1d   : > { %v267_v52 = vrot.slane %v266_v44, 2  ;;  %v273_v53 = vadd.f32 %v272_v45, %v271_v37  ;;  %v281_v54 = vrot.slane %v280_v46, 2  ;;  %v287_v55 = vadd.f32 %v286_v47, %v285_v39 }
  0x1e   : > { %v181_v48 = vrot.slane %v180_v40, 1  ;;  %v187_v49 = vadd.f32 %v186_v41, %v185_v33  ;;  %v195_v58 = vrot.slane %v194_v50, 1  ;;  %v201_v59 = vadd.f32 %v200_v51, %v199_v43 }
  0x1f   : > { %v268_v60 = vadd.f32 %v267_v52, %v266_v44  ;;  %v274_v61 = vrot.slane %v273_v53, 2  ;;  %v282_v62 = vadd.f32 %v281_v54, %v280_v46  ;;  %v288_v63 = vrot.slane %v287_v55, 2 }
  0x20   : > { %v182_v56 = vadd.f32 %v181_v48, %v180_v40  ;;  %v188_v57 = vrot.slane %v187_v49, 1  ;;  %v196_v2 = vadd.f32 %v195_v58, %v194_v50  ;;  %v202_v4 = vrot.slane %v201_v59, 1 }
  0x21   : > { %v269_v6 = vrot.slane %v268_v60, 1  ;;  %v275_v7 = vadd.f32 %v274_v61, %v273_v53  ;;  %v283_v8 = vrot.slane %v282_v62, 1  ;;  %v289_v9 = vadd.f32 %v288_v63, %v287_v55 }
  0x22   : > { %v189_v1 = vadd.f32 %v188_v57, %v187_v49  ;;  %v203_v10 = vadd.f32 %v202_v4, %v201_v59 }
  0x23   : > { %v270_v12 = vadd.f32 %v269_v6, %v268_v60  ;;  %v276_v13 = vrot.slane %v275_v7, 1  ;;  %v284_v14 = vadd.f32 %v283_v8, %v282_v62  ;;  %v290_v15 = vrot.slane %v289_v9, 1 }
  0x24   : > { %v208_v11 = vcombine.low %v182_v56, %v189_v1  ;;  %v209_v16 = vcombine.low %v196_v2, %v203_v10 }
  0x25   : > { %v277_v19 = vadd.f32 %v276_v13, %v275_v7  ;;  %v291_v20 = vadd.f32 %v290_v15, %v289_v9 }
  0x26   : > { %v216_v17 = vrot.slane %v208_v11, %v215_v5  ;;  %v223_v21 = vrot.slane %v209_v16, %v215_v5 }
  0x27   : > { %v296_v3 = vcombine.low %v270_v12, %v277_v19  ;;  %v297_v18 = vcombine.low %v284_v14, %v291_v20 }
  0x28   : > { %v224_v22 = vcombine.low %v216_v17, %v223_v21 }
  0x29   : > { %v304_v24 = vrot.slane %v296_v3, %v215_v5  ;;  %v311_v25 = vrot.slane %v297_v18, %v215_v5 }
  0x2a   : > { %v231_v26 = vrot.slane %v224_v22, %v215_v5 }
  0x2b   : > { %v312_v27 = vcombine.low %v304_v24, %v311_v25 }
  0x2c   : > { %v233_v28 = vadd.f32 %v231_v26, %v152_v23 }
  0x2d   : > { %v319_v30 = vrot.slane %v312_v27, %v215_v5 }
  0x2e   : > { %238 = vst.msk [vmem:[%s500_s17] ss:$2 sm:$0xf] %vm236_vm1, %v233_v28 }
  0x2f   : > { %v321_v31 = vadd.f32 %v403_v29, %v319_v30 }
  0x31   : > { %404 = vst.msk [vmem:[%s500_s17 + $0x1] ss:$2 sm:$0xf] %vm236_vm1, %v321_v31 }
  0x32 PF: > { %s11_s8 = sadd.s32 1, %s457_s8   ;;  %s528_s6 = smov %s453_s7 }
  0x33   : > { %p8_p5 = scmp.ge.s32.totalorder %s11_s8, 4   ;;  %s529_s7 = smov %s531_s9 }
  0x35   :  { %10 = sbr.rel (!%p8_p5) target bundleno = 2 (0x2), region = 59 }

// kernel: netG_forward.13
= control target key start
LH: loop header
LB: loop body
LE: loop exit
PB: predicated region body
PF: predicated region fallthrough
CT: control target
= control target key end

     0   :  { %8 = vsyncpa [#allocation4], 0  ;;  %s1056_s0 = inlined_call_operand.vmem [shape: bf16[16,16], index: 0, kind: input, shape index: {}]   ;;  %s1057_s1 = inlined_call_operand.hbm [shape: bf16[16,1024], index: 1, kind: input, shape index: {}]   ;;  %s1058_s2 = inlined_call_operand.hbm [shape: f32[1,1024], index: 2, kind: input, shape index: {}]   ;;  %s1059_s3 = inlined_call_operand.vmem [shape: f32[16,1024], index: 3, kind: output, shape index: {}]  }
   0x1   :  { %10 = vsyncpa [#allocation4 + $0x1], 0 }
   0x2   :  { %11 = vsyncpa [#allocation6], 0 }
   0x3   :  { %13 = vsyncpa [#allocation6 + $0x1], 0  ;;  %s897_s12 = smov 0   ;;  %s899_s13 = smov 0  }
   0x4   :  { %s901_s14 = smov 0   ;;  %s903_s15 = smov 0  }
   0x5   :  { %s905_s16 = smov 0   ;;  %s907_s17 = smov 0  }
   0x6 LB: > { %s658_s18 = sadd.s32 4294967295, %s869_s17   ;;  %s34_s19 = sadd.s32 1, %s865_s16  ;;  %s869_s17 = sphi %s907_s17, %s19_s17   ;;  %s865_s16 = sphi %s905_s16, %s1069_s16   ;;  %s861_s15 = sphi %s903_s15, %s1068_s15   ;;  %s857_s14 = sphi %s901_s14, %s1067_s14   ;;  %s853_s13 = sphi %s899_s13, %s1066_s13   ;;  %s849_s12 = sphi %s897_s12, %s1065_s12  }
   0x7   : > { %p36_p0 = scmp.ge.s32.totalorder %s34_s19, 2  ;;  %s75_s20 = sadd.s32 1, %s857_s14 }
   0x8   : > { %p82_p1 = scmp.ne.s32.totalorder %s857_s14, %s853_s13  ;;  %p83_p2 = scmp.eq.s32.totalorder %s869_s17, 0 }
   0x9   : > { %s1071_s19 = smov (%p36_p0, %s34_s19), 0  ;;  %p88_p4 = scmp.ne.s32.totalorder %s853_s13, %s849_s12 }
   0xa   : > { %p933_p3 = por %p83_p2, %p82_p1  ;;  %s71_s22 = ssub.s32 %s865_s16, %s1071_s19 }
   0xb   : > { %p89_p5 = scmp.eq.s32.totalorder %s658_s18, 0  ;;  %p73_p6 = scmp.eq.s32.totalorder %s71_s22, 0 }
   0xc   : > { %p140_p7 = scmp.eq.s32.totalorder %s658_s18, 1  ;;  %p699_p10 = scmp.lt.s32.totalorder %s869_s17, 2 }
   0xd   : > { %p940_p8 = por %p89_p5, %p88_p4  ;;  %s953_s26 = sand.u32 1, %s857_s14  }
   0xe   : > { %s945_s24 = scalar_select %p73_p6, %s857_s14, %s75_s20  }
   0xf   : > { %p947_p9 = por %p140_p7, %p82_p1  ;;  %s685_s27 = sshll.u32 %s865_s16, 8 }
  0x10   : > { %s663_s28 = sshll.u32 %s953_s26, 5  ;;  %s191_s4 = scalar_lea.hbm %s1057_s1, %s685_s27 }
  0x11   : > { %s182_s5 = scalar_lea.vmem [#allocation3], %s663_s28  ;;  %p962_p11 = pnand %p699_p10, %p933_p3 }
  0x12   : > { %s192_s6 = sshll.u32 %s182_s5, 4  ;;  %p669_p12 = scmp.ge.s32.totalorder %s869_s17, 1  ;;  %s193_s6 = int_to_ptr.vmem [resolvable:$true] %s192_s6 }
  0x13   : > { %s179_s8 = scalar_lea.sflag [#allocation4], %s953_s26  ;;  %p761_p13 = pneg %p962_p11 }
  0x14   : > { %s772_s9 = scalar_lea.vmem %s193_s6, 512  ;;  %s871_s10 = smov [#allocation3]  }
  0x15   : > { %p773_p0 = scmp.ne.s32.totalorder %s193_s6, %s772_s9  ;;  %s777_s11 = sshll.u32 %s871_s10, 4  ;;  %s778_s11 = int_to_ptr.vmem [resolvable:$false] %s777_s11 }
  0x16   : > { %s779_s12 = scalar_lea.vmem %s778_s11, 1024  ;;  %p780_p3 = scmp.lt.s32.totalorder %s193_s6, %s778_s11 }
  0x17   : > { %p775_p1 = pnand %p773_p0, %p761_p13  ;;  %p781_p4 = scmp.lt.s32.totalorder %s779_s12, %s772_s9 }
  0x19   : > { %p776_p2 = pneg %p775_p1  ;;  %p782_p5 = por %p781_p4, %p780_p3 }
  0x1b   : > { %p783_p6 = pnand %p782_p5, %p776_p2 }
  0x1d   : > { %786 = shalt.err (!%p783_p6)
}
  0x1e   : > { %s872_s18 = smov 512   ;;  %s873_s20 = smov 256  }
  0x1f   : > { %s874_s21 = smov 16   ;;  %p219_p7 = scmp.lt.s32.totalorder %s869_s17, 3 }
  0x20   : > { %695 = dma.hbm_to_vmem [thread:$0]  (!%p962_p11), %s191_s4, 512, %s193_s6, %s179_s8, %s872_s18, %s873_s20, %s874_s21  }
  0x21   : > { %s666_s22 = sshll.u32 %s953_s26, 2  ;;  %s686_s27 = sshll.u32 %s865_s16, 6 }
  0x22   : > { %p980_p10 = pnand %p669_p12, %p219_p7  ;;  %s212_s5 = scalar_lea.hbm %s1058_s2, %s686_s27 }
  0x23   : > { %s206_s9 = scalar_lea.vmem [#allocation5], %s666_s22  ;;  %s203_s11 = scalar_lea.sflag [#allocation6], %s953_s26 }
  0x24   : > { %s214_s10 = sshll.u32 %s206_s9, 4  ;;  %s875_s4 = smov [#allocation5]   ;;  %s215_s10 = int_to_ptr.vmem [resolvable:$true] %s214_s10 }
  0x25   : > { %s800_s12 = scalar_lea.vmem %s215_s10, 64  ;;  %s805_s6 = sshll.u32 %s875_s4, 4  ;;  %s806_s6 = int_to_ptr.vmem [resolvable:$false] %s805_s6 }
  0x26   : > { %p801_p0 = scmp.ne.s32.totalorder %s215_s10, %s800_s12  ;;  %s807_s8 = scalar_lea.vmem %s806_s6, 128 }
  0x27   : > { %p808_p12 = scmp.lt.s32.totalorder %s215_s10, %s806_s6  ;;  %p809_p3 = scmp.lt.s32.totalorder %s807_s8, %s800_s12 }
  0x28   : > { %p803_p1 = pnand %p801_p0, %p761_p13 }
  0x29   : > { %p810_p4 = por %p809_p3, %p808_p12 }
  0x2a   : > { %p804_p2 = pneg %p803_p1 }
  0x2c   : > { %p811_p5 = pnand %p810_p4, %p804_p2 }
  0x2e   : > { %814 = shalt.err (!%p811_p5)
}
  0x2f   : > { %698 = dma.hbm_to_vmem [thread:$0]  (!%p962_p11), %s212_s5, 64, %s215_s10, %s203_s11  }
  0x30   : > { %223 = sbr.rel (%p980_p10) target bundleno = 273 (0x111), region = 32  ;;  %s996_s26 = sand.u32 (!%p980_p10), 1, %s853_s13  }
  0x31   : > { %s670_s18 = sshll.u32 (!%p980_p10), %s996_s26, 5  ;;  %s226_s20 = scalar_lea.sflag (!%p980_p10), [#allocation4], %s996_s26 }
  0x32   : > { %s229_s21 = scalar_lea.vmem (!%p980_p10), [#allocation3], %s670_s18 }
  0x35   : > { %840 = dma.done.wait (%p940_p8), %s226_s20, 512  }
  0x36   : > { %842 = vsyncadd (%p940_p8), %s226_s20, 4294966784  ;;  %s671_s7 = sshll.u32 %s996_s26, 2  ;;  %s235_s22 = scalar_lea.sflag [#allocation6], %s996_s26 }
  0x37   : > { %s238_s27 = scalar_lea.vmem [#allocation5], %s671_s7 }
  0x38   : > { %844 = dma.done.wait (%p940_p8), %s235_s22, 64  }
  0x39   : > { %846 = vsyncadd (%p940_p8), %s235_s22, 4294967232  ;;  %v876_v0 = vmov 0   ;;  %v752_v1 = vld [vmem:[%s229_s21 + $0x4] ss:$16 sps:$4 sm:$0xff]   ;;  %v754_v2 = vld [vmem:[%s229_s21 + $0xc] ss:$16 sps:$4 sm:$0xff]   ;;  %v458_v6 = vlaneseq }
  0x3a   : > { %375 = vmatprep.mubr.bf16.mxu0 %v876_v0  ;;  %418 = vmatprep.mubr.bf16.mxu1 %v876_v0  ;;  %v756_v3 = vld [vmem:[%s229_s21] ss:$16 sps:$4 sm:$0xff]   ;;  %v757_v4 = vld [vmem:[%s229_s21 + $0x8] ss:$16 sps:$4 sm:$0xff]   ;;  %vm339_vm0 = vcmask 130048   ;;  %s672_s23 = sshll.u32 %s996_s26, 6 }
  0x3b   : > { %357 = vmatprep.subr.bf16.mxu0 %v752_v1  ;;  %400 = vmatprep.subr.bf16.mxu1 %v754_v2  ;;  %v758_v5 = vld [vmem:[%s1056_s0] sm:$0xff]   ;;  %v459_v7 = vshrl.u32 %v458_v6, 7  ;;  %s1014_s30 = scalar_lea.vmem [#allocation7], %s672_s23  ;;  %s687_s5 = sshll.u32 (%p947_p9), %s861_s15, 5 }
  0x3c   : > { %358 = vmatpush1.bf16.msra.mxu0 %v756_v3  ;;  %401 = vmatpush1.bf16.msra.mxu1 %v757_v4  ;;  %v456_v10 = vld [vmem:[%s238_s27] sm:$0xf]  ;;  %s506_s11 = scalar_lea.vmem (%p947_p9), %s1059_s3, %s687_s5 }
  0x3d   : > { %v460_v8 = vsub.s32 0, %v459_v7  ;;  %v468_v9 = vsub.s32 2, %v459_v7  ;;  %v464_v11 = vsub.s32 1, %v459_v7  ;;  %v472_v12 = vsub.s32 3, %v459_v7 }
  0x3f   : > { %678 = vmatmul.mubr.msk.bf16.vlgmr.msra.gmra.mxu0 %vm339_vm0, %v758_v5  ;;  %679 = vmatmul.mubr.msk.bf16.vlgmr.msra.gmra.mxu1 %vm339_vm0, %v758_v5  ;;  %v461_v13 = vrot.slane %v456_v10, %v460_v8  ;;  %v469_v14 = vrot.slane %v456_v10, %v468_v9  ;;  %v465_v15 = vrot.slane %v456_v10, %v464_v11 }
  0x40   : > { %v473_v16 = vrot.slane %v456_v10, %v472_v12 }
  0xff   : > { %v377_v17 = vpop.f32.mrf.mxu0  ;;  %v420_v18 = vpop.f32.mrf.mxu1 }
 0x100   : > { %v478_v19 = vadd.f32 %v461_v13, %v377_v17  ;;  %v480_v20 = vadd.f32 %v469_v14, %v420_v18 }
 0x101   : > { %v379_v21 = vpop.f32.mrf.mxu0  ;;  %v422_v22 = vpop.f32.mrf.mxu1 }
 0x102   : > { %486 = vst [vmem:[%s1014_s30] sm:$0xff] %v478_v19  ;;  %488 = vst [vmem:[%s1014_s30 + $0x10] sm:$0xff] %v480_v20  ;;  %v479_v23 = vadd.f32 %v465_v15, %v379_v21  ;;  %v481_v24 = vadd.f32 %v473_v16, %v422_v22 }
 0x103   : > { %v381_v25 = vpop.f32.mrf.mxu0  ;;  %v424_v26 = vpop.f32.mrf.mxu1 }
 0x104   : > { %487 = vst [vmem:[%s1014_s30 + $0x8] sm:$0xff] %v479_v23  ;;  %489 = vst [vmem:[%s1014_s30 + $0x18] sm:$0xff] %v481_v24  ;;  %v482_v27 = vadd.f32 %v461_v13, %v381_v25  ;;  %v484_v28 = vadd.f32 %v469_v14, %v424_v26  ;;  %500 = sbr.rel (!%p947_p9) target bundleno = 273 (0x111), region = 52 }
 0x105   : > { %v383_v29 = vpop.f32.mrf.mxu0  ;;  %v426_v30 = vpop.f32.mrf.mxu1 }
 0x106   : > { %490 = vst [vmem:[%s1014_s30 + $0x20] sm:$0xff] %v482_v27  ;;  %492 = vst [vmem:[%s1014_s30 + $0x30] sm:$0xff] %v484_v28  ;;  %v483_v31 = vadd.f32 %v465_v15, %v383_v29  ;;  %v485_v32 = vadd.f32 %v473_v16, %v426_v30 }
 0x108   : > { %491 = vst [vmem:[%s1014_s30 + $0x28] sm:$0xff] %v483_v31  ;;  %493 = vst [vmem:[%s1014_s30 + $0x38] sm:$0xff] %v485_v32 }
 0x109   : > { %v519_v33 = vld [vmem:[%s1014_s30] sm:$0xff]  ;;  %v523_v35 = vld [vmem:[%s1014_s30 + $0x10] sm:$0xff] }
 0x10a   : > { %520 = vst [vmem:[%s506_s11] sm:$0xff] %v519_v33  ;;  %524 = vst [vmem:[%s506_s11 + $0x10] sm:$0xff] %v523_v35 }
 0x10b   : > { %v521_v34 = vld [vmem:[%s1014_s30 + $0x8] sm:$0xff]  ;;  %v525_v36 = vld [vmem:[%s1014_s30 + $0x18] sm:$0xff] }
 0x10c   : > { %522 = vst [vmem:[%s506_s11 + $0x8] sm:$0xff] %v521_v34  ;;  %526 = vst [vmem:[%s506_s11 + $0x18] sm:$0xff] %v525_v36 }
 0x10d   : > { %v527_v37 = vld [vmem:[%s1014_s30 + $0x20] sm:$0xff]  ;;  %v531_v39 = vld [vmem:[%s1014_s30 + $0x30] sm:$0xff] }
 0x10e   : > { %528 = vst [vmem:[%s506_s11 + $0x40] sm:$0xff] %v527_v37  ;;  %532 = vst [vmem:[%s506_s11 + $0x50] sm:$0xff] %v531_v39 }
 0x10f   : > { %v529_v38 = vld [vmem:[%s1014_s30 + $0x28] sm:$0xff]  ;;  %v533_v40 = vld [vmem:[%s1014_s30 + $0x38] sm:$0xff] }
 0x110   : > { %530 = vst [vmem:[%s506_s11 + $0x48] sm:$0xff] %v529_v38  ;;  %534 = vst [vmem:[%s506_s11 + $0x58] sm:$0xff] %v533_v40 }
 0x111 PF: > { %s19_s17 = sadd.s32 1, %s869_s17   ;;  %s1065_s12 = smov %s853_s13 }
 0x112   : > { %p16_p8 = scmp.ge.s32.totalorder %s19_s17, 4   ;;  %s1066_s13 = smov %s857_s14 }
 0x113   : > { %s1067_s14 = smov %s945_s24  ;;  %s1068_s15 = smov %s865_s16 }
 0x114   : > { %s1069_s16 = smov %s1071_s19  ;;  %18 = sbr.rel (!%p16_p8) target bundleno = 6 (0x6), region = 119 }
 0x119   :  { %550 = vsyncpa [#allocation4], 1 }
 0x11a   :  { %552 = vsyncpa [#allocation4 + $0x1], 1 }
 0x11b   :  { %553 = vsyncpa [#allocation6], 1 }
 0x11c   :  { %555 = vsyncpa [#allocation6 + $0x1], 1 }

// kernel: netG_forward.15
= control target key start
LH: loop header
LB: loop body
LE: loop exit
PB: predicated region body
PF: predicated region fallthrough
CT: control target
= control target key end

     0   :  { %s564_s12 = smov 0   ;;  %s566_s13 = smov 0   ;;  %s609_s0 = inlined_call_operand.vmem [shape: f32[2,1024], index: 0, kind: input, shape index: {}]   ;;  %s610_s1 = inlined_call_operand.vmem [shape: f32[1,1024], index: 1, kind: input, shape index: {}]   ;;  %s611_s2 = inlined_call_operand.vmem [shape: f32[1,1024], index: 2, kind: input, shape index: {}]   ;;  %s612_s3 = inlined_call_operand.vmem [shape: bf16[2,1024], index: 3, kind: output, shape index: {}]  }
   0x1   :  { %s568_s14 = smov 0  }
   0x2 LB: > { %s22_s15 = sadd.s32 1, %s536_s13  ;;  %p481_p0 = scmp.ge.s32.totalorder %s540_s14, 1  ;;  %s540_s14 = sphi %s568_s14, %s13_s14   ;;  %s536_s13 = sphi %s566_s13, %s614_s13   ;;  %s532_s12 = sphi %s564_s12, %s613_s12  }
   0x3   : > { %p23_p1 = scmp.ge.s32.totalorder %s22_s15, 2  ;;  %p178_p2 = scmp.lt.s32.totalorder %s540_s14, 3 }
   0x5   : > { %s616_s15 = smov (%p23_p1, %s22_s15), 0  ;;  %p179_p3 = pnand %p481_p0, %p178_p2 }
   0x6   : > { %s482_s16 = sshll.u32 (!%p179_p3), %s532_s12, 2 }
   0x7   : > { %182 = sbr.rel (%p179_p3) target bundleno = 45 (0x2d), region = 32  ;;  %p220_p4 = scmp.lt.s32.totalorder (!%p179_p3), %s482_s16, 7 }
   0xc   : > { %v249_v0 = vlaneseq  ;;  %v542_v1 = vmov 1983009808   ;;  %s618_s16 = smov (!%p220_p4, %s482_s16), 7  ;;  %v543_v32 = vmov 1966171168  }
   0xd   : > { %v268_v2 = vunpack.c.l.s4 %v542_v1  ;;  %s230_s19 = scalar_lea.vmem %s610_s1, %s618_s16  ;;  %s483_s20 = sshll.u32 %s618_s16, 1  ;;  %v355_v33 = vunpack.c.l.s4 %v543_v32 }
   0xe   : > { %v250_v3 = vshrl.u32 %v249_v0, 7  ;;  %s235_s23 = scalar_lea.vmem %s611_s2, %s618_s16  ;;  %v247_v9 = vld [vmem:[%s230_s19] sm:$0xf]  ;;  %s225_s26 = scalar_lea.vmem %s609_s0, %s483_s20 }
   0xf   : > { %v269_v4 = vunpack.c.0.s8 %v268_v2  ;;  %v284_v15 = vld [vmem:[%s235_s23] sm:$0xf]  ;;  %v356_v36 = vunpack.c.0.s8 %v355_v33  ;;  %s244_s29 = scalar_lea.vmem %s612_s3, %s618_s16 }
  0x10   : > { %v251_v5 = vsub.s32 0, %v250_v3  ;;  %v255_v6 = vsub.s32 1, %v250_v3  ;;  %v259_v7 = vsub.s32 2, %v250_v3  ;;  %v263_v8 = vsub.s32 3, %v250_v3  ;;  %v246_v26 = vld [vmem:[%s225_s26] sm:$0xff] }
  0x11   : > { %v272_v10 = vsub.s32 %v269_v4, %v250_v3  ;;  %v359_v41 = vsub.s32 %v356_v36, %v250_v3 }
  0x12   : > { %v252_v11 = vrot.slane %v247_v9, %v251_v5  ;;  %v256_v12 = vrot.slane %v247_v9, %v255_v6  ;;  %v260_v13 = vrot.slane %v247_v9, %v259_v7  ;;  %v264_v14 = vrot.slane %v247_v9, %v263_v8 }
  0x13   : > { %v289_v16 = vrot.slane %v284_v15, %v251_v5  ;;  %v293_v17 = vrot.slane %v284_v15, %v255_v6  ;;  %v297_v18 = vrot.slane %v284_v15, %v259_v7  ;;  %v301_v19 = vrot.slane %v284_v15, %v263_v8 }
  0x14   : > { %v265_v20 = vcombine.low %v252_v11, %v256_v12  ;;  %v266_v21 = vcombine.low %v260_v13, %v264_v14 }
  0x15   : > { %v302_v22 = vcombine.low %v289_v16, %v293_v17  ;;  %v303_v23 = vcombine.low %v297_v18, %v301_v19 }
  0x16   : > { %v273_v24 = vrot.slane %v265_v20, %v272_v10  ;;  %v280_v25 = vrot.slane %v266_v21, %v272_v10 }
  0x17   : > { %v310_v27 = vrot.slane %v302_v22, %v272_v10  ;;  %v317_v28 = vrot.slane %v303_v23, %v272_v10 }
  0x18   : > { %v281_v29 = vcombine.low %v273_v24, %v280_v25 }
  0x19   : > { %v318_v30 = vcombine.low %v310_v27, %v317_v28 }
  0x1a   : > { %v283_v31 = vmul.f32 %v281_v29, %v246_v26 }
  0x1c   : > { %v320_v34 = vadd.f32 %v318_v30, %v283_v31 }
  0x1e   : > { %v321_v35 = vmax.f32 %v320_v34, 0.0 }
  0x20   : > { %v323_v37 = vcombine.high %v321_v35, %v321_v35  ;;  %v330_v38 = vrot.slane %v321_v35, %v272_v10 }
  0x22   : > { %v337_v39 = vrot.slane %v323_v37, %v272_v10  ;;  %v338_v40 = vcombine.high %v330_v38, %v330_v38 }
  0x24   : > { %v339_v42 = vcombine.high %v337_v39, %v337_v39  ;;  %v487_v43 = vpack.c.bf16 %v338_v40, %v330_v38 }
  0x26   : > { %v488_v44 = vpack.c.bf16 %v339_v42, %v337_v39  ;;  %v360_v45 = vrot.slane %v487_v43, %v359_v41 }
  0x28   : > { %v367_v46 = vrot.slane %v488_v44, %v359_v41 }
  0x2a   : > { %v368_v47 = vcombine.low %v360_v45, %v367_v46 }
  0x2c   : > { %489 = vst.sshfl [vmem:[%s244_s29] sm:$0x55 pattern:$0x73625140] %v368_v47 }
  0x2d PF: > { %s13_s14 = sadd.s32 1, %s540_s14   ;;  %s613_s12 = smov %s536_s13 }
  0x2e   : > { %p10_p5 = scmp.ge.s32.totalorder %s13_s14, 4   ;;  %s614_s13 = smov %s616_s15 }
  0x30   :  { %12 = sbr.rel (!%p10_p5) target bundleno = 2 (0x2), region = 68 }

// kernel: squeeze.10
= control target key start
LH: loop header
LB: loop body
LE: loop exit
PB: predicated region body
PF: predicated region fallthrough
CT: control target
= control target key end

     0   :  { %s40_s8 = smov 32   ;;  %vm8_vm0 = vcmask 261120   ;;  %s41_s9 = smov 64   ;;  %s58_s0 = inlined_call_operand.vmem [shape: f32[128], index: 0, kind: input, shape index: {}]   ;;  %s59_s1 = inlined_call_operand.vmem [shape: f32[4,32], index: 1, kind: output, shape index: {}]  }
   0x1   :  { %v5_v0 = vld [vmem:[%s58_s0] sm:$0x1]  ;;  %s39_s0 = smov 96  }
   0x2   :  { %6 = vst [vmem:[#allocation1] sm:$0x1] %v5_v0 }
   0x9   :  { %v10_v1 = vld [vmem:[#allocation1] sm:$0x1]  }
   0xa   :  { %v22_v2 = vld [vmem:[#allocation1] sm:$0x1]   ;;  %11 = vrot.lane.b32.xlu0 %v10_v1, %s39_s0 }
   0xb   :  { %23 = vrot.lane.b32.xlu1 %v22_v2, %s40_s8  ;;  %v7_v3 = vld [vmem:[#allocation1] sm:$0x1]  }
   0xc   :  { %v16_v4 = vld [vmem:[#allocation1] sm:$0x1]   ;;  %9 = vst.msk [vmem:[#allocation0] sm:$0x1] %vm8_vm0, %v7_v3  }
   0xe   :  { %17 = vrot.lane.b32.xlu0 %v16_v4, %s41_s9 }
  0x7c   :  { %v12_v5 = vpop.permute.xlu0 %11  }
  0x7d   :  { %v24_v6 = vpop.permute.xlu1 %23   ;;  %15 = vst.msk [vmem:[#allocation0 + $0x1] sm:$0x1] %vm8_vm0, %v12_v5  }
  0x7e   :  { %27 = vst.msk [vmem:[#allocation0 + $0x3] sm:$0x1] %vm8_vm0, %v24_v6  }
  0x80   :  { %v18_v7 = vpop.permute.xlu0 %17  }
  0x81   :  { %21 = vst.msk [vmem:[#allocation0 + $0x2] sm:$0x1] %vm8_vm0, %v18_v7  }
  0x88   :  { %v32_v8 = vld [vmem:[#allocation0] sm:$0xf] }
  0x89   :  { %35 = vst [vmem:[%s59_s1] sm:$0xf] %v32_v8 }

// kernel: tile.58
= control target key start
LH: loop header
LB: loop body
LE: loop exit
PB: predicated region body
PF: predicated region fallthrough
CT: control target
= control target key end

     0   :  { %s22_s0 = inlined_call_operand.vmem [shape: f32[32], index: 0, kind: input, shape index: {}]   ;;  %s23_s1 = inlined_call_operand.vmem [shape: f32[4,32], index: 1, kind: output, shape index: {}]  }
   0x1   :  { %v4_v0 = vld [vmem:[%s22_s0] ss:$0 sm:$0xff] }
   0x2   :  { %5 = vst [vmem:[%s23_s1] sm:$0xf] %v4_v0 }

// kernel: netG_forward.17
= control target key start
LH: loop header
LB: loop body
LE: loop exit
PB: predicated region body
PF: predicated region fallthrough
CT: control target
= control target key end

     0   :  { %v50_v0 = vmov 0.0   ;;  %s88_s1 = inlined_call_operand.vmem [shape: f32[2,128], index: 1, kind: output, shape index: {}]   ;;  %s89_s0 = inlined_call_operand.vmem [shape: f32[32,128], index: 0, kind: input, shape index: {}]  }
   0x1   :  { %12 = vst [vmem:[%s88_s1] sm:$0x3] %v50_v0  ;;  %v13_v1 = vld [vmem:[%s89_s0] sm:$0xff]  ;;  %v14_v2 = vld [vmem:[%s89_s0 + $0x8] sm:$0xff]  ;;  %v15_v3 = vld [vmem:[%s89_s0 + $0x10] sm:$0xff] }
   0x2   :  { %v16_v4 = vld [vmem:[%s89_s0 + $0x18] sm:$0xff]  ;;  %v18_v5 = vadd.f32 %v14_v2, %v13_v1  ;;  %v30_v6 = vmul.f32 %v13_v1, %v13_v1  ;;  %v31_v7 = vmul.f32 %v14_v2, %v14_v2  ;;  %v32_v8 = vmul.f32 %v15_v3, %v15_v3 }
   0x3   :  { %v33_v10 = vmul.f32 %v16_v4, %v16_v4 }
   0x4   :  { %v19_v9 = vadd.f32 %v18_v5, %v15_v3  ;;  %v34_v11 = vadd.f32 %v31_v7, %v30_v6 }
   0x6   :  { %v20_v12 = vadd.f32 %v19_v9, %v16_v4  ;;  %v35_v13 = vadd.f32 %v34_v11, %v32_v8 }
   0x8   :  { %v21_v14 = vrot.slane %v20_v12, 4  ;;  %v36_v15 = vadd.f32 %v35_v13, %v33_v10  ;;  %v17_v24 = vld [vmem:[%s88_s1] sm:$0x1]  ;;  %v29_v27 = vld [vmem:[%s88_s1 + $0x1] sm:$0x1] }
   0xa   :  { %v22_v16 = vadd.f32 %v21_v14, %v20_v12  ;;  %v37_v17 = vrot.slane %v36_v15, 4 }
   0xc   :  { %v23_v18 = vrot.slane %v22_v16, 2  ;;  %v38_v19 = vadd.f32 %v37_v17, %v36_v15 }
   0xe   :  { %v24_v20 = vadd.f32 %v23_v18, %v22_v16  ;;  %v39_v21 = vrot.slane %v38_v19, 2 }
  0x10   :  { %v25_v22 = vrot.slane %v24_v20, 1  ;;  %v40_v23 = vadd.f32 %v39_v21, %v38_v19 }
  0x12   :  { %v26_v25 = vadd.f32 %v25_v22, %v24_v20  ;;  %v41_v26 = vrot.slane %v40_v23, 1 }
  0x14   :  { %v27_v28 = vadd.f32 %v26_v25, %v17_v24  ;;  %v42_v29 = vadd.f32 %v41_v26, %v40_v23 }
  0x16   :  { %28 = vst [vmem:[%s88_s1] sm:$0x1] %v27_v28  ;;  %v43_v30 = vadd.f32 %v42_v29, %v29_v27 }
  0x18   :  { %44 = vst [vmem:[%s88_s1 + $0x1] sm:$0x1] %v43_v30 }

// kernel: tile.59
= control target key start
LH: loop header
LB: loop body
LE: loop exit
PB: predicated region body
PF: predicated region fallthrough
CT: control target
= control target key end

     0   :  { %vm8_vm0 = vcmask 261120   ;;  %s40_s8 = smov 32   ;;  %s41_s9 = smov 64   ;;  %vm14_vm1 = vcmask 1048320   ;;  %vm20_vm2 = vcmask 785920   ;;  %vm26_vm3 = vcmask 523520   ;;  %s58_s0 = inlined_call_operand.vmem [shape: f32[4,32], index: 0, kind: input, shape index: {}]   ;;  %s59_s1 = inlined_call_operand.vmem [shape: f32[1,128], index: 1, kind: output, shape index: {}]  }
   0x1   :  { %v5_v0 = vld [vmem:[%s58_s0] sm:$0xf]  ;;  %s39_s0 = smov 96  }
   0x2   :  { %6 = vst [vmem:[#allocation1] sm:$0xf] %v5_v0 }
   0x9   :  { %v11_v1 = vld [vmem:[#allocation1 + $0x3] sm:$0x1]   ;;  %v23_v2 = vld [vmem:[#allocation1 + $0x1] sm:$0x1]   ;;  %v7_v3 = vld [vmem:[#allocation1] sm:$0x1]  }
   0xa   :  { %12 = vrot.lane.b32.xlu0 %v11_v1, %s39_s0  ;;  %24 = vrot.lane.b32.xlu1 %v23_v2, %s40_s8  ;;  %v17_v4 = vld [vmem:[#allocation1 + $0x2] sm:$0x1]   ;;  %9 = vst.msk [vmem:[#allocation0] sm:$0x1] %vm8_vm0, %v7_v3  }
   0xe   :  { %18 = vrot.lane.b32.xlu0 %v17_v4, %s41_s9 }
  0x7c   :  { %v13_v5 = vpop.permute.xlu0 %12   ;;  %v25_v6 = vpop.permute.xlu1 %24  }
  0x7d   :  { %15 = vst.msk [vmem:[#allocation0] sm:$0x1] %vm14_vm1, %v13_v5  }
  0x80   :  { %v19_v7 = vpop.permute.xlu0 %18  }
  0x81   :  { %21 = vst.msk [vmem:[#allocation0] sm:$0x1] %vm20_vm2, %v19_v7  }
  0x82   :  { %27 = vst.msk [vmem:[#allocation0] sm:$0x1] %vm26_vm3, %v25_v6  }
  0x89   :  { %v32_v8 = vld [vmem:[#allocation0] sm:$0x1] }
  0x8a   :  { %35 = vst [vmem:[%s59_s1] sm:$0x1] %v32_v8 }

// kernel: netG_forward.16
= control target key start
LH: loop header
LB: loop body
LE: loop exit
PB: predicated region body
PF: predicated region fallthrough
CT: control target
= control target key end

     0   :  { %8 = vsyncpa [#allocation4], 0  ;;  %s886_s0 = inlined_call_operand.vmem [shape: bf16[32,576], index: 0, kind: input, shape index: {}]   ;;  %s887_s1 = inlined_call_operand.hbm [shape: bf16[576,128], index: 1, kind: input, shape index: {}]   ;;  %s888_s2 = inlined_call_operand.hbm [shape: f32[1,128], index: 2, kind: input, shape index: {}]   ;;  %s889_s3 = inlined_call_operand.vmem [shape: f32[32,128], index: 3, kind: output, shape index: {}]  }
   0x1   :  { %9 = vsyncpa [#allocation6], 0  ;;  %s814_s12 = smov [#allocation3]  }
   0x2   :  { %s17_s13 = sshll.u32 %s814_s12, 4  ;;  %s18_s13 = int_to_ptr.vmem [resolvable:$true] %s17_s13 }
   0x3   :  { %s778_s14 = scalar_lea.vmem %s18_s13, 4608  ;;  %p783_p1 = scmp.lt.s32.totalorder %s18_s13, %s18_s13 }
   0x4   :  { %p779_p0 = scmp.ne.s32.totalorder %s18_s13, %s778_s14  ;;  %p784_p2 = scmp.lt.s32.totalorder %s778_s14, %s778_s14 }
   0x6   :  { %p785_p3 = por %p784_p2, %p783_p1 }
   0x8   :  { %p786_p4 = pnand %p785_p3, %p779_p0 }
   0xa   :  { %789 = shalt.err (!%p786_p4)
}
   0xb   :  { %s815_s15 = smov 64   ;;  %s816_s16 = smov 4  }
   0xc   :  { %23 = dma.hbm_to_vmem [thread:$0]  %s887_s1, 4608, %s18_s13, [#allocation4], %s815_s15, %s815_s15, %s816_s16  }
   0xd   :  { %s817_s19 = smov [#allocation5]  }
   0xe   :  { %s30_s20 = sshll.u32 %s817_s19, 4  ;;  %s31_s20 = int_to_ptr.vmem [resolvable:$true] %s30_s20 }
   0xf   :  { %s798_s21 = scalar_lea.vmem %s31_s20, 16  ;;  %s802_s22 = scalar_lea.vmem %s31_s20, 32 }
  0x10   :  { %p799_p5 = scmp.ne.s32.totalorder %s31_s20, %s798_s21  ;;  %p803_p6 = scmp.lt.s32.totalorder %s31_s20, %s31_s20 }
  0x11   :  { %p804_p7 = scmp.lt.s32.totalorder %s802_s22, %s798_s21 }
  0x13   :  { %p805_p8 = por %p804_p7, %p803_p6 }
  0x15   :  { %p806_p9 = pnand %p805_p8, %p799_p5 }
  0x17   :  { %809 = shalt.err (!%p806_p9)
}
  0x18   :  { %33 = dma.hbm_to_vmem [thread:$0]  %s888_s2, 16, %s31_s20, [#allocation6]  }
  0x19   :  { %810 = dma.done.wait [#allocation4], 4608  }
  0x1a   :  { %811 = vsyncadd [#allocation4], 4294962688 }
  0x1b   :  { %812 = dma.done.wait [#allocation6], 16  }
  0x1c   :  { %813 = vsyncadd [#allocation6], 4294967280  ;;  %v720_v0 = vld [vmem:[#allocation3 + $0x78] sm:$0xff]   ;;  %v724_v4 = vld [vmem:[#allocation3 + $0x70] sm:$0xff]   ;;  %vm403_vm0 = vcmask 523264  }
  0x1d   :  { %v721_v1 = vld [vmem:[#allocation3 + $0xf8] sm:$0xff]   ;;  %642 = vmatprep.subr.bf16.mxu0 %v720_v0  ;;  %v725_v5 = vld [vmem:[#allocation3 + $0xf0] sm:$0xff]   ;;  %v728_v8 = vld [vmem:[#allocation3 + $0x68] sm:$0xff]  }
  0x1e   :  { %v722_v2 = vld [vmem:[#allocation3 + $0x38] sm:$0xff]   ;;  %670 = vmatprep.subr.bf16.mxu1 %v721_v1  ;;  %v726_v6 = vld [vmem:[#allocation3 + $0x30] sm:$0xff]   ;;  %v729_v9 = vld [vmem:[#allocation3 + $0xe8] sm:$0xff]  }
  0x1f   :  { %v723_v3 = vld [vmem:[#allocation3 + $0xb8] sm:$0xff]   ;;  %643 = vmatpush3.bf16.msra.mxu0 %v722_v2  ;;  %v727_v7 = vld [vmem:[#allocation3 + $0xb0] sm:$0xff]   ;;  %v730_v10 = vld [vmem:[#allocation3 + $0x28] sm:$0xff]  }
  0x20   :  { %671 = vmatpush3.bf16.msra.mxu1 %v723_v3  ;;  %644 = vmatprep.subr.bf16.mxu0 %v724_v4  ;;  %v731_v11 = vld [vmem:[#allocation3 + $0xa8] sm:$0xff]   ;;  %v732_v12 = vld [vmem:[#allocation3 + $0x60] sm:$0xff]   ;;  %v736_v16 = vld [vmem:[#allocation3 + $0x58] sm:$0xff]  }
  0x21   :  { %672 = vmatprep.subr.bf16.mxu1 %v725_v5  ;;  %v733_v13 = vld [vmem:[#allocation3 + $0xe0] sm:$0xff]   ;;  %v737_v17 = vld [vmem:[#allocation3 + $0xd8] sm:$0xff]   ;;  %v740_v20 = vld [vmem:[#allocation3 + $0x50] sm:$0xff]  }
  0x22   :  { %v734_v14 = vld [vmem:[#allocation3 + $0x20] sm:$0xff]   ;;  %v738_v18 = vld [vmem:[#allocation3 + $0x18] sm:$0xff]   ;;  %v741_v21 = vld [vmem:[#allocation3 + $0xd0] sm:$0xff]  }
  0x23   :  { %645 = vmatpush3.bf16.msra.mxu0 %v726_v6  ;;  %v735_v15 = vld [vmem:[#allocation3 + $0xa0] sm:$0xff]   ;;  %v739_v19 = vld [vmem:[#allocation3 + $0x98] sm:$0xff]   ;;  %v742_v22 = vld [vmem:[#allocation3 + $0x10] sm:$0xff]  }
  0x24   :  { %673 = vmatpush3.bf16.msra.mxu1 %v727_v7  ;;  %646 = vmatprep.subr.bf16.mxu0 %v728_v8  ;;  %v743_v23 = vld [vmem:[#allocation3 + $0x90] sm:$0xff]   ;;  %v744_v24 = vld [vmem:[#allocation3 + $0x48] sm:$0xff]   ;;  %v748_v28 = vld [vmem:[#allocation3 + $0x40] sm:$0xff]  }
  0x25   :  { %674 = vmatprep.subr.bf16.mxu1 %v729_v9  ;;  %v745_v25 = vld [vmem:[#allocation3 + $0xc8] sm:$0xff]   ;;  %v749_v29 = vld [vmem:[#allocation3 + $0xc0] sm:$0xff]   ;;  %v758_v36 = vld [vmem:[#allocation3 + $0x118] sm:$0xff]  }
  0x26   :  { %v746_v26 = vld [vmem:[#allocation3 + $0x8] sm:$0xff]   ;;  %v750_v30 = vld [vmem:[#allocation3] sm:$0xff]   ;;  %v759_v37 = vld [vmem:[#allocation3 + $0x110] sm:$0xff]  }
  0x27   :  { %647 = vmatpush3.bf16.msra.mxu0 %v730_v10  ;;  %v747_v27 = vld [vmem:[#allocation3 + $0x88] sm:$0xff]   ;;  %v751_v31 = vld [vmem:[#allocation3 + $0x80] sm:$0xff]  }
  0x28   :  { %675 = vmatpush3.bf16.msra.mxu1 %v731_v11  ;;  %648 = vmatprep.subr.bf16.mxu0 %v732_v12  ;;  %v752_v32 = vld [vmem:[%s886_s0] ss:$20 sps:$4 sm:$0xff]   ;;  %v754_v33 = vld [vmem:[%s886_s0 + $0x4] ss:$20 sps:$4 sm:$0xff]   ;;  %v755_v34 = vld [vmem:[%s886_s0 + $0x8] ss:$20 sps:$4 sm:$0xff]  }
  0x29   :  { %676 = vmatprep.subr.bf16.mxu1 %v733_v13  ;;  %v757_v35 = vld [vmem:[%s886_s0 + $0xc] ss:$20 sps:$4 sm:$0xff]   ;;  %442 = vmatprep.mubr.bf16.mxu0 %v754_v33  ;;  %v762_v39 = vld [vmem:[%s886_s0 + $0x34] ss:$20 sps:$4 sm:$0xff]   ;;  %v765_v42 = vld [vmem:[%s886_s0 + $0x30] ss:$20 sps:$4 sm:$0xff]  }
  0x2a   :  { %491 = vmatprep.mubr.bf16.mxu1 %v757_v35  ;;  %v760_v38 = vld [vmem:[%s886_s0 + $0x2c] ss:$20 sps:$4 sm:$0xff]   ;;  %v764_v40 = vld [vmem:[%s886_s0 + $0x28] ss:$20 sps:$4 sm:$0xff]   ;;  %v768_v43 = vld [vmem:[%s886_s0 + $0x10] ss:$20 sps:$4 sm:$0xff]  }
  0x2b   :  { %649 = vmatpush3.bf16.msra.mxu0 %v734_v14  ;;  %v766_v41 = vld [vmem:[#allocation3 + $0x108] sm:$0xff]   ;;  %v767_v44 = vld [vmem:[#allocation3 + $0x100] sm:$0xff]  }
  0x2c   :  { %677 = vmatpush3.bf16.msra.mxu1 %v735_v15  ;;  %650 = vmatprep.subr.bf16.mxu0 %v736_v16  ;;  %v769_v45 = vld [vmem:[%s886_s0 + $0x38] ss:$20 sps:$4 sm:$0xff]   ;;  %v641_v6 = vld [vmem:[#allocation5] ss:$0 sm:$0xff] }
  0x2d   :  { %678 = vmatprep.subr.bf16.mxu1 %v737_v17 }
  0x2f   :  { %651 = vmatpush3.bf16.msra.mxu0 %v738_v18 }
  0x30   :  { %679 = vmatpush3.bf16.msra.mxu1 %v739_v19  ;;  %652 = vmatprep.subr.bf16.mxu0 %v740_v20 }
  0x31   :  { %680 = vmatprep.subr.bf16.mxu1 %v741_v21 }
  0x33   :  { %653 = vmatpush3.bf16.msra.mxu0 %v742_v22 }
  0x34   :  { %681 = vmatpush3.bf16.msra.mxu1 %v743_v23  ;;  %654 = vmatprep.subr.bf16.mxu0 %v744_v24 }
  0x35   :  { %682 = vmatprep.subr.bf16.mxu1 %v745_v25 }
  0x37   :  { %655 = vmatpush3.bf16.msra.mxu0 %v746_v26 }
  0x38   :  { %683 = vmatpush3.bf16.msra.mxu1 %v747_v27  ;;  %656 = vmatprep.subr.bf16.mxu0 %v748_v28 }
  0x39   :  { %684 = vmatprep.subr.bf16.mxu1 %v749_v29 }
  0x3b   :  { %657 = vmatpush3.bf16.msra.mxu0 %v750_v30 }
  0x3c   :  { %685 = vmatpush3.bf16.msra.mxu1 %v751_v31  ;;  %704 = vmatprep.subr.bf16.mxu0 %v758_v36 }
  0x3e   :  { %443 = vmatmul.mubr.bf16.vlgmr.msra.gmra.mxu0 %v752_v32 }
  0x3f   :  { %492 = vmatmul.mubr.bf16.vlgmr.msra.gmra.mxu1 %v755_v34  ;;  %705 = vmatpush3.bf16.msra.mxu0 %v758_v36 }
  0x40   :  { %706 = vmatprep.subr.bf16.mxu0 %v759_v37  ;;  %450 = vmatprep.mubr.bf16.mxu0 %v760_v38 }
  0x41   :  { %499 = vmatprep.mubr.bf16.mxu1 %v762_v39 }
  0x43   :  { %707 = vmatpush3.bf16.msra.mxu0 %v759_v37 }
  0x44   :  { %708 = vmatprep.subr.bf16.mxu0 %v766_v41 }
  0x46   :  { %451 = vmatmul.mubr.bf16.gmra.mxu0 %v764_v40 }
  0x47   :  { %500 = vmatmul.mubr.bf16.gmra.mxu1 %v765_v42  ;;  %712 = vmatprep.mubr.msk.bf16.mxu0 %vm403_vm0, %v768_v43 }
  0x48   :  { %709 = vmatpush3.bf16.msra.mxu0 %v766_v41 }
  0x49   :  { %710 = vmatprep.subr.bf16.mxu0 %v767_v44 }
  0x4c   :  { %711 = vmatpush3.bf16.msra.mxu0 %v767_v44 }
  0x4f   :  { %713 = vmatmul.mubr.msk.bf16.vlgmr.msra.gmra.mxu0 %vm403_vm0, %v769_v45 }
  0xfe   :  { %v658_v46 = vpop.f32.mrf.mxu0 }
  0xff   :  { %v686_v47 = vpop.f32.mrf.mxu1 }
 0x100   :  { %v659_v48 = vpop.f32.mrf.mxu0 }
 0x101   :  { %v687_v49 = vpop.f32.mrf.mxu1  ;;  %v660_v62 = vadd.f32 %v659_v48, %v658_v46 }
 0x102   :  { %v661_v50 = vpop.f32.mrf.mxu0  ;;  %v688_v63 = vadd.f32 %v687_v49, %v686_v47 }
 0x103   :  { %v689_v51 = vpop.f32.mrf.mxu1 }
 0x104   :  { %v662_v52 = vpop.f32.mrf.mxu0  ;;  %v494_v10 = vadd.f32 %v688_v63, %v660_v62 }
 0x105   :  { %v690_v53 = vpop.f32.mrf.mxu1  ;;  %v663_v7 = vadd.f32 %v662_v52, %v661_v50 }
 0x106   :  { %v664_v54 = vpop.f32.mrf.mxu0  ;;  %v691_v8 = vadd.f32 %v690_v53, %v689_v51 }
 0x107   :  { %v692_v55 = vpop.f32.mrf.mxu1 }
 0x108   :  { %v665_v56 = vpop.f32.mrf.mxu0  ;;  %v497_v18 = vadd.f32 %v691_v8, %v663_v7 }
 0x109   :  { %v693_v57 = vpop.f32.mrf.mxu1  ;;  %v666_v58 = vadd.f32 %v665_v56, %v664_v54 }
 0x10a   :  { %v694_v59 = vadd.f32 %v693_v57, %v692_v55  ;;  %v667_v60 = vpop.f32.mrf.mxu0 }
 0x10b   :  { %v695_v61 = vpop.f32.mrf.mxu1 }
 0x10c   :  { %v668_v0 = vpop.f32.mrf.mxu0  ;;  %v502_v4 = vadd.f32 %v694_v59, %v666_v58 }
 0x10d   :  { %v696_v1 = vpop.f32.mrf.mxu1  ;;  %v669_v2 = vadd.f32 %v668_v0, %v667_v60 }
 0x10e   :  { %v697_v3 = vadd.f32 %v696_v1, %v695_v61 }
 0x10f   :  { %v714_v5 = vpop.f32.mrf.mxu0 }
 0x110   :  { %v551_v9 = vadd.f32 %v714_v5, %v502_v4  ;;  %v505_v14 = vadd.f32 %v697_v3, %v669_v2 }
 0x111   :  { %v542_v11 = vpop.f32.mrf.mxu0 }
 0x112   :  { %v581_v12 = vadd.f32 %v641_v6, %v551_v9  ;;  %v543_v13 = vadd.f32 %v542_v11, %v494_v10 }
 0x113   :  { %v715_v15 = vpop.f32.mrf.mxu0 }
 0x114   :  { %585 = vst [vmem:[%s889_s3 + $0x10] sm:$0xff] %v581_v12  ;;  %v579_v16 = vadd.f32 %v641_v6, %v543_v13  ;;  %v554_v17 = vadd.f32 %v715_v15, %v505_v14 }
 0x115   :  { %v545_v19 = vpop.f32.mrf.mxu0 }
 0x116   :  { %583 = vst [vmem:[%s889_s3] sm:$0xff] %v579_v16  ;;  %v582_v20 = vadd.f32 %v641_v6, %v554_v17  ;;  %v546_v21 = vadd.f32 %v545_v19, %v497_v18 }
 0x118   :  { %586 = vst [vmem:[%s889_s3 + $0x18] sm:$0xff] %v582_v20  ;;  %v580_v22 = vadd.f32 %v641_v6, %v546_v21 }
 0x11a   :  { %584 = vst [vmem:[%s889_s3 + $0x8] sm:$0xff] %v580_v22 }
 0x11b   :  { %591 = vsyncpa [#allocation4], 1 }
 0x11c   :  { %592 = vsyncpa [#allocation6], 1 }

// kernel: netG_forward.18
= control target key start
LH: loop header
LB: loop body
LE: loop exit
PB: predicated region body
PF: predicated region fallthrough
CT: control target
= control target key end

     0   :  { %s133_s0 = inlined_call_operand.vmem [shape: f32[32,128], index: 0, kind: input, shape index: {}]   ;;  %s134_s1 = inlined_call_operand.vmem [shape: f32[1,128], index: 1, kind: input, shape index: {}]   ;;  %s135_s2 = inlined_call_operand.vmem [shape: f32[1,128], index: 2, kind: input, shape index: {}]   ;;  %s136_s3 = inlined_call_operand.vmem [shape: bf16[32,128], index: 3, kind: output, shape index: {}]  }
   0x1   :  { %v14_v0 = vld [vmem:[%s133_s0] sm:$0xff]  ;;  %v15_v1 = vld [vmem:[%s133_s0 + $0x8] sm:$0xff]  ;;  %v16_v6 = vld [vmem:[%s133_s0 + $0x10] sm:$0xff] }
   0x2   :  { %v68_v2 = vld [vmem:[%s134_s1] ss:$0 sm:$0xff]  ;;  %v17_v7 = vld [vmem:[%s133_s0 + $0x18] sm:$0xff] }
   0x3   :  { %v25_v3 = vmul.f32 %v68_v2, %v14_v0  ;;  %v26_v4 = vmul.f32 %v68_v2, %v15_v1  ;;  %v69_v5 = vld [vmem:[%s135_s2] ss:$0 sm:$0xff]  ;;  %v27_v8 = vmul.f32 %v68_v2, %v16_v6  ;;  %v28_v9 = vmul.f32 %v68_v2, %v17_v7 }
   0x5   :  { %v36_v10 = vadd.f32 %v69_v5, %v25_v3  ;;  %v37_v11 = vadd.f32 %v69_v5, %v26_v4  ;;  %v38_v12 = vadd.f32 %v69_v5, %v27_v8  ;;  %v39_v13 = vadd.f32 %v69_v5, %v28_v9 }
   0x7   :  { %v40_v14 = vmax.f32 %v36_v10, 0.0  ;;  %v41_v15 = vmax.f32 %v37_v11, 0.0  ;;  %v42_v16 = vmax.f32 %v38_v12, 0.0  ;;  %v43_v17 = vmax.f32 %v39_v13, 0.0 }
   0x9   :  { %v81_v18 = vpack.c.bf16 %v41_v15, %v40_v14  ;;  %v86_v19 = vpack.c.bf16 %v43_v17, %v42_v16 }
   0xb   :  { %82 = vst [vmem:[%s136_s3] sm:$0xff] %v81_v18   ;;  %88 = vst [vmem:[%s136_s3 + $0x8] sm:$0xff] %v86_v19  }

// kernel: netG_forward.20
= control target key start
LH: loop header
LB: loop body
LE: loop exit
PB: predicated region body
PF: predicated region fallthrough
CT: control target
= control target key end

     0   :  { %vm12_vm0 = vcmask 517120   ;;  %vm31_vm1 = vcmask 523264   ;;  %v133_v0 = vmov 0.0   ;;  %vm70_vm2 = vcmask 516096   ;;  %s239_s1 = inlined_call_operand.vmem [shape: f32[2,64], index: 1, kind: output, shape index: {}]   ;;  %s240_s0 = inlined_call_operand.vmem [shape: f32[128,64], index: 0, kind: input, shape index: {}]  }
   0x1   :  { %13 = vst.msk [vmem:[%s239_s1] sm:$0x3] %vm12_vm0, %v133_v0  ;;  %v14_v1 = vld [vmem:[%s240_s0] sm:$0xff]  ;;  %v15_v2 = vld [vmem:[%s240_s0 + $0x8] sm:$0xff]  ;;  %v16_v3 = vld [vmem:[%s240_s0 + $0x10] sm:$0xff] }
   0x2   :  { %v32_v4 = vsel %vm31_vm1, %v14_v1, 0.0  ;;  %v33_v5 = vsel %vm31_vm1, %v15_v2, 0.0  ;;  %v35_v6 = vsel %vm31_vm1, %v16_v3, 0.0  ;;  %v17_v7 = vld [vmem:[%s240_s0 + $0x18] sm:$0xff]  ;;  %v18_v10 = vld [vmem:[%s240_s0 + $0x20] sm:$0xff]  ;;  %v19_v13 = vld [vmem:[%s240_s0 + $0x28] sm:$0xff]  ;;  %v73_v15 = vmul.f32 %v14_v1, %v14_v1 }
   0x3   :  { %v34_v8 = vadd.f32 %v33_v5, %v32_v4  ;;  %v37_v9 = vsel %vm31_vm1, %v17_v7, 0.0  ;;  %v39_v12 = vsel %vm31_vm1, %v18_v10, 0.0  ;;  %v74_v16 = vmul.f32 %v15_v2, %v15_v2  ;;  %v20_v19 = vld [vmem:[%s240_s0 + $0x30] sm:$0xff]  ;;  %v21_v24 = vld [vmem:[%s240_s0 + $0x38] sm:$0xff]  ;;  %v22_v31 = vld [vmem:[%s240_s0 + $0x40] sm:$0xff] }
   0x4   :  { %v75_v17 = vmul.f32 %v16_v3, %v16_v3  ;;  %v41_v18 = vsel %vm31_vm1, %v19_v13, 0.0  ;;  %v76_v21 = vmul.f32 %v17_v7, %v17_v7  ;;  %v43_v22 = vsel %vm31_vm1, %v20_v19, 0.0  ;;  %v23_v37 = vld [vmem:[%s240_s0 + $0x48] sm:$0xff]  ;;  %v24_v43 = vld [vmem:[%s240_s0 + $0x50] sm:$0xff]  ;;  %v25_v49 = vld [vmem:[%s240_s0 + $0x58] sm:$0xff] }
   0x5   :  { %v36_v11 = vadd.f32 %v35_v6, %v34_v8  ;;  %v77_v23 = vmul.f32 %v18_v10, %v18_v10  ;;  %v89_v26 = vsel %vm31_vm1, %v73_v15, 0.0  ;;  %v90_v27 = vsel %vm31_vm1, %v74_v16, 0.0  ;;  %v26_v55 = vld [vmem:[%s240_s0 + $0x60] sm:$0xff]  ;;  %v27_v61 = vld [vmem:[%s240_s0 + $0x68] sm:$0xff]  ;;  %v28_v3 = vld [vmem:[%s240_s0 + $0x70] sm:$0xff] }
   0x6   :  { %v92_v28 = vsel %vm31_vm1, %v75_v17, 0.0  ;;  %v45_v29 = vsel %vm31_vm1, %v21_v24, 0.0  ;;  %v91_v30 = vadd.f32 %v90_v27, %v89_v26  ;;  %v78_v33 = vmul.f32 %v19_v13, %v19_v13 }
   0x7   :  { %v38_v14 = vadd.f32 %v37_v9, %v36_v11  ;;  %v94_v34 = vsel %vm31_vm1, %v76_v21, 0.0  ;;  %v47_v35 = vsel %vm31_vm1, %v22_v31, 0.0  ;;  %v79_v39 = vmul.f32 %v20_v19, %v20_v19  ;;  %v29_v9 = vld [vmem:[%s240_s0 + $0x78] sm:$0xff] }
   0x8   :  { %v93_v36 = vadd.f32 %v92_v28, %v91_v30  ;;  %v96_v40 = vsel %vm31_vm1, %v77_v23, 0.0  ;;  %v49_v41 = vsel %vm31_vm1, %v23_v37, 0.0  ;;  %v80_v45 = vmul.f32 %v21_v24, %v21_v24 }
   0x9   :  { %v40_v20 = vadd.f32 %v39_v12, %v38_v14  ;;  %v98_v46 = vsel %vm31_vm1, %v78_v33, 0.0  ;;  %v51_v47 = vsel %vm31_vm1, %v24_v43, 0.0  ;;  %v81_v51 = vmul.f32 %v22_v31, %v22_v31 }
   0xa   :  { %v95_v42 = vadd.f32 %v94_v34, %v93_v36  ;;  %v100_v52 = vsel %vm31_vm1, %v79_v39, 0.0  ;;  %v53_v53 = vsel %vm31_vm1, %v25_v49, 0.0  ;;  %v82_v57 = vmul.f32 %v23_v37, %v23_v37  ;;  %v30_v36 = vld [vmem:[%s239_s1] sm:$0x1] }
   0xb   :  { %v42_v25 = vadd.f32 %v41_v18, %v40_v20  ;;  %v102_v58 = vsel %vm31_vm1, %v80_v45, 0.0  ;;  %v55_v59 = vsel %vm31_vm1, %v26_v55, 0.0  ;;  %v83_v63 = vmul.f32 %v24_v43, %v24_v43 }
   0xc   :  { %v97_v48 = vadd.f32 %v96_v40, %v95_v42  ;;  %v104_v0 = vsel %vm31_vm1, %v81_v51, 0.0  ;;  %v57_v1 = vsel %vm31_vm1, %v27_v61, 0.0  ;;  %v84_v5 = vmul.f32 %v25_v49, %v25_v49 }
   0xd   :  { %v44_v32 = vadd.f32 %v43_v22, %v42_v25  ;;  %v106_v6 = vsel %vm31_vm1, %v82_v57, 0.0  ;;  %v59_v7 = vsel %vm31_vm1, %v28_v3, 0.0  ;;  %v85_v11 = vmul.f32 %v26_v55, %v26_v55 }
   0xe   :  { %v99_v54 = vadd.f32 %v98_v46, %v97_v48  ;;  %v108_v12 = vsel %vm31_vm1, %v83_v63, 0.0  ;;  %v61_v13 = vsel %vm31_vm1, %v29_v9, 0.0  ;;  %v86_v16 = vmul.f32 %v27_v61, %v27_v61 }
   0xf   :  { %v46_v38 = vadd.f32 %v45_v29, %v44_v32  ;;  %v110_v17 = vsel %vm31_vm1, %v84_v5, 0.0  ;;  %v87_v20 = vmul.f32 %v28_v3, %v28_v3  ;;  %v112_v21 = vsel %vm31_vm1, %v85_v11, 0.0 }
  0x10   :  { %v101_v60 = vadd.f32 %v100_v52, %v99_v54  ;;  %v88_v24 = vmul.f32 %v29_v9, %v29_v9  ;;  %v114_v25 = vsel %vm31_vm1, %v86_v16, 0.0 }
  0x11   :  { %v48_v44 = vadd.f32 %v47_v35, %v46_v38  ;;  %v116_v28 = vsel %vm31_vm1, %v87_v20, 0.0 }
  0x12   :  { %v103_v2 = vadd.f32 %v102_v58, %v101_v60  ;;  %v118_v31 = vsel %vm31_vm1, %v88_v24, 0.0 }
  0x13   :  { %v50_v50 = vadd.f32 %v49_v41, %v48_v44  ;;  %v72_v44 = vld [vmem:[%s239_s1 + $0x1] sm:$0x1] }
  0x14   :  { %v105_v8 = vadd.f32 %v104_v0, %v103_v2 }
  0x15   :  { %v52_v56 = vadd.f32 %v51_v47, %v50_v50 }
  0x16   :  { %v107_v14 = vadd.f32 %v106_v6, %v105_v8 }
  0x17   :  { %v54_v62 = vadd.f32 %v53_v53, %v52_v56 }
  0x18   :  { %v109_v18 = vadd.f32 %v108_v12, %v107_v14 }
  0x19   :  { %v56_v4 = vadd.f32 %v55_v59, %v54_v62 }
  0x1a   :  { %v111_v22 = vadd.f32 %v110_v17, %v109_v18 }
  0x1b   :  { %v58_v10 = vadd.f32 %v57_v1, %v56_v4 }
  0x1c   :  { %v113_v26 = vadd.f32 %v112_v21, %v111_v22 }
  0x1d   :  { %v60_v15 = vadd.f32 %v59_v7, %v58_v10 }
  0x1e   :  { %v115_v29 = vadd.f32 %v114_v25, %v113_v26 }
  0x1f   :  { %v62_v19 = vadd.f32 %v61_v13, %v60_v15 }
  0x20   :  { %v117_v32 = vadd.f32 %v116_v28, %v115_v29 }
  0x21   :  { %v63_v23 = vrot.slane %v62_v19, 4 }
  0x22   :  { %v119_v34 = vadd.f32 %v118_v31, %v117_v32 }
  0x23   :  { %v64_v27 = vadd.f32 %v63_v23, %v62_v19 }
  0x24   :  { %v120_v37 = vrot.slane %v119_v34, 4 }
  0x25   :  { %v65_v30 = vrot.slane %v64_v27, 2 }
  0x26   :  { %v121_v39 = vadd.f32 %v120_v37, %v119_v34 }
  0x27   :  { %v66_v33 = vadd.f32 %v65_v30, %v64_v27 }
  0x28   :  { %v122_v41 = vrot.slane %v121_v39, 2 }
  0x29   :  { %v67_v35 = vrot.slane %v66_v33, 1 }
  0x2a   :  { %v123_v42 = vadd.f32 %v122_v41, %v121_v39 }
  0x2b   :  { %v68_v38 = vadd.f32 %v67_v35, %v66_v33 }
  0x2c   :  { %v124_v43 = vrot.slane %v123_v42, 1 }
  0x2d   :  { %v69_v40 = vadd.f32 %v68_v38, %v30_v36 }
  0x2e   :  { %v125_v45 = vadd.f32 %v124_v43, %v123_v42 }
  0x2f   :  { %71 = vst.msk [vmem:[%s239_s1] sm:$0x1] %vm70_vm2, %v69_v40 }
  0x30   :  { %v126_v46 = vadd.f32 %v125_v45, %v72_v44 }
  0x32   :  { %127 = vst.msk [vmem:[%s239_s1 + $0x1] sm:$0x1] %vm70_vm2, %v126_v46 }

// kernel: squeeze.12
= control target key start
LH: loop header
LB: loop body
LE: loop exit
PB: predicated region body
PF: predicated region fallthrough
CT: control target
= control target key end

     0   :  { %s40_s8 = smov 80   ;;  %vm8_vm0 = vcmask 130048   ;;  %s41_s9 = smov 96   ;;  %s58_s0 = inlined_call_operand.vmem [shape: f32[64], index: 0, kind: input, shape index: {}]   ;;  %s59_s1 = inlined_call_operand.vmem [shape: f32[4,16], index: 1, kind: output, shape index: {}]  }
   0x1   :  { %v5_v0 = vld [vmem:[%s58_s0] sm:$0x1]  ;;  %s39_s0 = smov 112  }
   0x2   :  { %6 = vst [vmem:[#allocation1] sm:$0x1] %v5_v0 }
   0x9   :  { %v10_v1 = vld [vmem:[#allocation1] sm:$0x1]  }
   0xa   :  { %v22_v2 = vld [vmem:[#allocation1] sm:$0x1]   ;;  %11 = vrot.lane.b32.xlu0 %v10_v1, %s39_s0 }
   0xb   :  { %23 = vrot.lane.b32.xlu1 %v22_v2, %s40_s8  ;;  %v7_v3 = vld [vmem:[#allocation1] sm:$0x1]  }
   0xc   :  { %v16_v4 = vld [vmem:[#allocation1] sm:$0x1]   ;;  %9 = vst.msk [vmem:[#allocation0] sm:$0x1] %vm8_vm0, %v7_v3  }
   0xe   :  { %17 = vrot.lane.b32.xlu0 %v16_v4, %s41_s9 }
  0x7c   :  { %v12_v5 = vpop.permute.xlu0 %11  }
  0x7d   :  { %v24_v6 = vpop.permute.xlu1 %23   ;;  %15 = vst.msk [vmem:[#allocation0 + $0x1] sm:$0x1] %vm8_vm0, %v12_v5  }
  0x7e   :  { %27 = vst.msk [vmem:[#allocation0 + $0x3] sm:$0x1] %vm8_vm0, %v24_v6  }
  0x80   :  { %v18_v7 = vpop.permute.xlu0 %17  }
  0x81   :  { %21 = vst.msk [vmem:[#allocation0 + $0x2] sm:$0x1] %vm8_vm0, %v18_v7  }
  0x88   :  { %v32_v8 = vld [vmem:[#allocation0] sm:$0xf] }
  0x89   :  { %35 = vst [vmem:[%s59_s1] sm:$0xf] %v32_v8 }

// kernel: netG_forward.19
= control target key start
LH: loop header
LB: loop body
LE: loop exit
PB: predicated region body
PF: predicated region fallthrough
CT: control target
= control target key end

     0   :  { %vm347_vm0 = vcmask 261120   ;;  %s1118_s1 = inlined_call_operand.vmem [shape: bf16[288,128], index: 1, kind: input, shape index: {}]   ;;  %s1119_s0 = inlined_call_operand.vmem [shape: bf16[128,288], index: 0, kind: input, shape index: {}]   ;;  %s1120_s2 = inlined_call_operand.vmem [shape: f32[1,128], index: 2, kind: input, shape index: {}]   ;;  %s1121_s3 = inlined_call_operand.vmem [shape: f32[128,128], index: 3, kind: output, shape index: {}]  }
   0x1   :  { %v821_v0 = vld [vmem:[%s1118_s1 + $0x78] sm:$0xff]   ;;  %v823_v2 = vld [vmem:[%s1118_s1 + $0x70] sm:$0xff]   ;;  %v825_v4 = vld [vmem:[%s1118_s1 + $0x68] sm:$0xff]  }
   0x2   :  { %v822_v1 = vld [vmem:[%s1118_s1 + $0x38] sm:$0xff]   ;;  %711 = vmatprep.subr.bf16.mxu0 %v821_v0  ;;  %805 = vmatprep.subr.bf16.mxu1 %v821_v0  ;;  %v824_v3 = vld [vmem:[%s1118_s1 + $0x30] sm:$0xff]   ;;  %v826_v5 = vld [vmem:[%s1118_s1 + $0x28] sm:$0xff]  }
   0x3   :  { %712 = vmatpush3.bf16.msra.mxu0 %v822_v1  ;;  %813 = vmatpush3.bf16.msra.mxu1 %v822_v1  ;;  %v827_v6 = vld [vmem:[%s1118_s1 + $0x60] sm:$0xff]   ;;  %v829_v8 = vld [vmem:[%s1118_s1 + $0x58] sm:$0xff]   ;;  %v831_v10 = vld [vmem:[%s1118_s1 + $0x50] sm:$0xff]  }
   0x4   :  { %713 = vmatprep.subr.bf16.mxu0 %v823_v2  ;;  %806 = vmatprep.subr.bf16.mxu1 %v823_v2  ;;  %v828_v7 = vld [vmem:[%s1118_s1 + $0x20] sm:$0xff]   ;;  %v830_v9 = vld [vmem:[%s1118_s1 + $0x18] sm:$0xff]   ;;  %v832_v13 = vld [vmem:[%s1118_s1 + $0x10] sm:$0xff]  }
   0x5   :  { %v839_v11 = vld [vmem:[%s1119_s0 + $0x4] ss:$12 sps:$4 sm:$0xff]   ;;  %v842_v12 = vld [vmem:[%s1119_s0 + $0x94] ss:$12 sps:$4 sm:$0xff]   ;;  %v833_v14 = vld [vmem:[%s1118_s1 + $0x48] sm:$0xff]  }
   0x6   :  { %404 = vmatprep.mubr.bf16.mxu0 %v839_v11  ;;  %452 = vmatprep.mubr.bf16.mxu1 %v842_v12  ;;  %v834_v15 = vld [vmem:[%s1118_s1 + $0x8] sm:$0xff]   ;;  %v835_v16 = vld [vmem:[%s1118_s1 + $0x40] sm:$0xff]   ;;  %v840_v20 = vld [vmem:[%s1119_s0 + $0x90] ss:$12 sps:$4 sm:$0xff]  }
   0x7   :  { %714 = vmatpush3.bf16.msra.mxu0 %v824_v3  ;;  %814 = vmatpush3.bf16.msra.mxu1 %v824_v3  ;;  %v836_v17 = vld [vmem:[%s1118_s1] sm:$0xff]   ;;  %v843_v19 = vld [vmem:[%s1118_s1 + $0x88] sm:$0xff]   ;;  %v854_v28 = vld [vmem:[%s1119_s0 + $0x30] ss:$12 sps:$4 sm:$0xff]  }
   0x8   :  { %715 = vmatprep.subr.bf16.mxu0 %v825_v4  ;;  %807 = vmatprep.subr.bf16.mxu1 %v825_v4  ;;  %v837_v18 = vld [vmem:[%s1119_s0] ss:$12 sps:$4 sm:$0xff]   ;;  %v844_v21 = vld [vmem:[%s1119_s0 + $0x1c] ss:$12 sps:$4 sm:$0xff]   ;;  %v848_v24 = vld [vmem:[%s1119_s0 + $0x18] ss:$12 sps:$4 sm:$0xff]  }
   0x9   :  { %v846_v22 = vld [vmem:[%s1119_s0 + $0xac] ss:$12 sps:$4 sm:$0xff]   ;;  %v850_v23 = vld [vmem:[%s1118_s1 + $0x80] sm:$0xff]   ;;  %v849_v25 = vld [vmem:[%s1119_s0 + $0xa8] ss:$12 sps:$4 sm:$0xff]  }
   0xa   :  { %v851_v26 = vld [vmem:[%s1119_s0 + $0x34] ss:$12 sps:$4 sm:$0xff]   ;;  %v856_v30 = vld [vmem:[%s1119_s0 + $0x4c] ss:$12 sps:$4 sm:$0xff]   ;;  %v860_v33 = vld [vmem:[%s1119_s0 + $0x50] ss:$12 sps:$4 sm:$0xff]  }
   0xb   :  { %716 = vmatpush3.bf16.msra.mxu0 %v826_v5  ;;  %815 = vmatpush3.bf16.msra.mxu1 %v826_v5  ;;  %v853_v27 = vld [vmem:[%s1119_s0 + $0x8] ss:$12 sps:$4 sm:$0xff]   ;;  %v855_v29 = vld [vmem:[%s1119_s0 + $0x20] ss:$12 sps:$4 sm:$0xff]   ;;  %v858_v31 = vld [vmem:[%s1119_s0 + $0x38] ss:$12 sps:$4 sm:$0xff]  }
   0xc   :  { %717 = vmatprep.subr.bf16.mxu0 %v827_v6  ;;  %808 = vmatprep.subr.bf16.mxu1 %v827_v6  ;;  %v859_v32 = vld [vmem:[%s1119_s0 + $0x48] ss:$12 sps:$4 sm:$0xff]   ;;  %v861_v34 = vld [vmem:[%s1119_s0 + $0x64] ss:$12 sps:$4 sm:$0xff]   ;;  %v864_v36 = vld [vmem:[%s1119_s0 + $0x60] ss:$12 sps:$4 sm:$0xff]  }
   0xd   :  { %v863_v35 = vld [vmem:[%s1119_s0 + $0x68] ss:$12 sps:$4 sm:$0xff]   ;;  %v865_v37 = vld [vmem:[%s1119_s0 + $0x80] ss:$12 sps:$4 sm:$0xff]   ;;  %v868_v39 = vld [vmem:[%s1119_s0 + $0x98] ss:$12 sps:$4 sm:$0xff]  }
   0xe   :  { %v866_v38 = vld [vmem:[%s1119_s0 + $0x7c] ss:$12 sps:$4 sm:$0xff]   ;;  %v869_v40 = vld [vmem:[%s1119_s0 + $0x78] ss:$12 sps:$4 sm:$0xff]   ;;  %v1044_v61 = vld [vmem:[%s1120_s2] ss:$0 sm:$0xff] }
   0xf   :  { %718 = vmatpush3.bf16.msra.mxu0 %v828_v7  ;;  %816 = vmatpush3.bf16.msra.mxu1 %v828_v7  ;;  %v870_v41 = vld [vmem:[%s1119_s0 + $0xb0] ss:$12 sps:$4 sm:$0xff]  }
  0x10   :  { %719 = vmatprep.subr.bf16.mxu0 %v829_v8  ;;  %809 = vmatprep.subr.bf16.mxu1 %v829_v8 }
  0x13   :  { %720 = vmatpush3.bf16.msra.mxu0 %v830_v9  ;;  %817 = vmatpush3.bf16.msra.mxu1 %v830_v9 }
  0x14   :  { %721 = vmatprep.subr.bf16.mxu0 %v831_v10  ;;  %810 = vmatprep.subr.bf16.mxu1 %v831_v10 }
  0x17   :  { %722 = vmatpush3.bf16.msra.mxu0 %v832_v13  ;;  %818 = vmatpush3.bf16.msra.mxu1 %v832_v13 }
  0x18   :  { %723 = vmatprep.subr.bf16.mxu0 %v833_v14  ;;  %811 = vmatprep.subr.bf16.mxu1 %v833_v14 }
  0x1b   :  { %724 = vmatpush3.bf16.msra.mxu0 %v834_v15  ;;  %819 = vmatpush3.bf16.msra.mxu1 %v834_v15 }
  0x1c   :  { %725 = vmatprep.subr.bf16.mxu0 %v835_v16  ;;  %812 = vmatprep.subr.bf16.mxu1 %v835_v16 }
  0x1f   :  { %726 = vmatpush3.bf16.msra.mxu0 %v836_v17  ;;  %820 = vmatpush3.bf16.msra.mxu1 %v836_v17 }
  0x20   :  { %785 = vmatprep.subr.bf16.mxu1 %v843_v19 }
  0x22   :  { %405 = vmatmul.mubr.bf16.vlgmr.msra.gmra.mxu0 %v837_v18  ;;  %453 = vmatmul.mubr.bf16.vlgmr.msra.gmra.mxu1 %v840_v20 }
  0x23   :  { %786 = vmatpush3.bf16.msra.mxu1 %v843_v19  ;;  %412 = vmatprep.mubr.bf16.mxu0 %v844_v21 }
  0x24   :  { %460 = vmatprep.mubr.bf16.mxu1 %v846_v22  ;;  %787 = vmatprep.subr.bf16.mxu1 %v850_v23 }
  0x27   :  { %788 = vmatpush3.bf16.msra.mxu1 %v850_v23 }
  0x2a   :  { %413 = vmatmul.mubr.bf16.gmra.mxu0 %v848_v24  ;;  %461 = vmatmul.mubr.bf16.gmra.mxu1 %v849_v25 }
  0x2b   :  { %420 = vmatprep.mubr.bf16.mxu0 %v851_v26  ;;  %789 = vmatprep.mubr.msk.bf16.mxu1 %vm347_vm0, %v853_v27 }
  0x32   :  { %421 = vmatmul.mubr.bf16.gmra.mxu0 %v854_v28  ;;  %790 = vmatmul.mubr.msk.bf16.vlgmr.msra.gmra.mxu1 %vm347_vm0, %v855_v29 }
  0x33   :  { %428 = vmatprep.mubr.bf16.mxu0 %v856_v30  ;;  %793 = vmatprep.mubr.msk.bf16.mxu1 %vm347_vm0, %v858_v31 }
  0x3a   :  { %429 = vmatmul.mubr.bf16.gmra.mxu0 %v859_v32  ;;  %794 = vmatmul.mubr.msk.bf16.gmra.mxu1 %vm347_vm0, %v860_v33 }
  0x3b   :  { %436 = vmatprep.mubr.bf16.mxu0 %v861_v34  ;;  %797 = vmatprep.mubr.msk.bf16.mxu1 %vm347_vm0, %v863_v35 }
  0x42   :  { %437 = vmatmul.mubr.bf16.gmra.mxu0 %v864_v36  ;;  %798 = vmatmul.mubr.msk.bf16.gmra.mxu1 %vm347_vm0, %v865_v37 }
  0x43   :  { %444 = vmatprep.mubr.bf16.mxu0 %v866_v38  ;;  %801 = vmatprep.mubr.msk.bf16.mxu1 %vm347_vm0, %v868_v39 }
  0x4a   :  { %445 = vmatmul.mubr.bf16.gmra.mxu0 %v869_v40  ;;  %802 = vmatmul.mubr.msk.bf16.gmra.mxu1 %vm347_vm0, %v870_v41 }
  0xe2   :  { %v727_v42 = vpop.f32.mrf.mxu0  ;;  %v1025_v43 = vpop.f32.mrf.mxu1 }
  0xe4   :  { %v728_v44 = vpop.f32.mrf.mxu0  ;;  %v1027_v45 = vpop.f32.mrf.mxu1 }
  0xe5   :  { %v729_v62 = vadd.f32 %v728_v44, %v727_v42 }
  0xe6   :  { %v730_v46 = vpop.f32.mrf.mxu0  ;;  %v1029_v47 = vpop.f32.mrf.mxu1 }
  0xe8   :  { %v731_v48 = vpop.f32.mrf.mxu0  ;;  %v1031_v49 = vpop.f32.mrf.mxu1 }
  0xe9   :  { %v732_v7 = vadd.f32 %v731_v48, %v730_v46 }
  0xea   :  { %v733_v50 = vpop.f32.mrf.mxu0  ;;  %v1033_v51 = vpop.f32.mrf.mxu1 }
  0xec   :  { %v734_v52 = vpop.f32.mrf.mxu0  ;;  %v1035_v53 = vpop.f32.mrf.mxu1 }
  0xed   :  { %v735_v58 = vadd.f32 %v734_v52, %v733_v50  ;;  %v771_v48 = vadd.f32 %v1035_v53, %v1033_v51 }
  0xee   :  { %v736_v54 = vpop.f32.mrf.mxu0  ;;  %v1037_v55 = vpop.f32.mrf.mxu1 }
  0xf0   :  { %v737_v56 = vpop.f32.mrf.mxu0  ;;  %v1039_v57 = vpop.f32.mrf.mxu1 }
  0xf1   :  { %v738_v2 = vadd.f32 %v737_v56, %v736_v54 }
  0xf2   :  { %v739_v59 = vpop.f32.mrf.mxu0  ;;  %v791_v60 = vpop.f32.mrf.mxu1 }
  0xf3   :  { %v512_v63 = vadd.f32 %v791_v60, %v735_v58  ;;  %v765_v58 = vadd.f32 %v1027_v45, %v1025_v43  ;;  %v768_v43 = vadd.f32 %v1031_v49, %v1029_v47 }
  0xf4   :  { %v740_v0 = vpop.f32.mrf.mxu0  ;;  %v503_v1 = vpop.f32.mrf.mxu1 }
  0xf5   :  { %v626_v3 = vadd.f32 %v1044_v61, %v512_v63  ;;  %v504_v4 = vadd.f32 %v729_v62, %v503_v1  ;;  %v741_v16 = vadd.f32 %v740_v0, %v739_v59  ;;  %v774_v62 = vadd.f32 %v1039_v57, %v1037_v55 }
  0xf6   :  { %v742_v5 = vpop.f32.mrf.mxu0  ;;  %v792_v6 = vpop.f32.mrf.mxu1 }
  0xf7   :  { %642 = vst [vmem:[%s1121_s3 + $0x10] sm:$0xff] %v626_v3  ;;  %v624_v8 = vadd.f32 %v1044_v61, %v504_v4  ;;  %v515_v9 = vadd.f32 %v792_v6, %v738_v2 }
  0xf8   :  { %v743_v10 = vpop.f32.mrf.mxu0  ;;  %v506_v11 = vpop.f32.mrf.mxu1 }
  0xf9   :  { %640 = vst [vmem:[%s1121_s3] sm:$0xff] %v624_v8  ;;  %v627_v12 = vadd.f32 %v1044_v61, %v515_v9  ;;  %v507_v13 = vadd.f32 %v732_v7, %v506_v11  ;;  %v744_v24 = vadd.f32 %v743_v10, %v742_v5 }
  0xfa   :  { %v745_v14 = vpop.f32.mrf.mxu0  ;;  %v795_v15 = vpop.f32.mrf.mxu1 }
  0xfb   :  { %643 = vst [vmem:[%s1121_s3 + $0x18] sm:$0xff] %v627_v12  ;;  %v625_v17 = vadd.f32 %v1044_v61, %v507_v13 }
  0xfc   :  { %v746_v18 = vpop.f32.mrf.mxu0  ;;  %v519_v19 = vpop.f32.mrf.mxu1 }
  0xfd   :  { %641 = vst [vmem:[%s1121_s3 + $0x8] sm:$0xff] %v625_v17  ;;  %v747_v20 = vadd.f32 %v746_v18, %v745_v14  ;;  %v520_v21 = vadd.f32 %v741_v16, %v519_v19 }
  0xfe   :  { %v748_v22 = vpop.f32.mrf.mxu0  ;;  %v796_v23 = vpop.f32.mrf.mxu1 }
  0xff   :  { %v528_v25 = vadd.f32 %v795_v15, %v747_v20  ;;  %v628_v26 = vadd.f32 %v1044_v61, %v520_v21 }
 0x100   :  { %v749_v27 = vpop.f32.mrf.mxu0  ;;  %v522_v28 = vpop.f32.mrf.mxu1 }
 0x101   :  { %v630_v29 = vadd.f32 %v1044_v61, %v528_v25  ;;  %644 = vst [vmem:[%s1121_s3 + $0x20] sm:$0xff] %v628_v26  ;;  %v750_v30 = vadd.f32 %v749_v27, %v748_v22  ;;  %v523_v31 = vadd.f32 %v744_v24, %v522_v28 }
 0x102   :  { %v751_v32 = vpop.f32.mrf.mxu0  ;;  %v799_v33 = vpop.f32.mrf.mxu1 }
 0x103   :  { %646 = vst [vmem:[%s1121_s3 + $0x30] sm:$0xff] %v630_v29  ;;  %v531_v34 = vadd.f32 %v796_v23, %v750_v30  ;;  %v629_v35 = vadd.f32 %v1044_v61, %v523_v31 }
 0x104   :  { %v752_v36 = vpop.f32.mrf.mxu0  ;;  %v535_v37 = vpop.f32.mrf.mxu1 }
 0x105   :  { %v631_v38 = vadd.f32 %v1044_v61, %v531_v34  ;;  %645 = vst [vmem:[%s1121_s3 + $0x28] sm:$0xff] %v629_v35  ;;  %v753_v39 = vadd.f32 %v752_v36, %v751_v32 }
 0x106   :  { %v754_v40 = vpop.f32.mrf.mxu0  ;;  %v800_v41 = vpop.f32.mrf.mxu1 }
 0x107   :  { %647 = vst [vmem:[%s1121_s3 + $0x38] sm:$0xff] %v631_v38  ;;  %v536_v42 = vadd.f32 %v753_v39, %v535_v37 }
 0x108   :  { %v755_v44 = vpop.f32.mrf.mxu0  ;;  %v538_v46 = vpop.f32.mrf.mxu1 }
 0x109   :  { %v632_v50 = vadd.f32 %v1044_v61, %v536_v42  ;;  %v756_v52 = vadd.f32 %v755_v44, %v754_v40 }
 0x10a   :  { %v757_v54 = vpop.f32.mrf.mxu0  ;;  %v803_v56 = vpop.f32.mrf.mxu1 }
 0x10b   :  { %648 = vst [vmem:[%s1121_s3 + $0x40] sm:$0xff] %v632_v50  ;;  %v539_v59 = vadd.f32 %v756_v52, %v538_v46  ;;  %v560_v60 = vadd.f32 %v803_v56, %v771_v48 }
 0x10c   :  { %v758_v63 = vpop.f32.mrf.mxu0  ;;  %v551_v0 = vpop.f32.mrf.mxu1 }
 0x10d   :  { %v633_v51 = vadd.f32 %v1044_v61, %v539_v59  ;;  %v638_v53 = vadd.f32 %v1044_v61, %v560_v60  ;;  %v759_v1 = vadd.f32 %v758_v63, %v757_v54  ;;  %v552_v2 = vadd.f32 %v765_v58, %v551_v0 }
 0x10e   :  { %v760_v3 = vpop.f32.mrf.mxu0  ;;  %v804_v4 = vpop.f32.mrf.mxu1 }
 0x10f   :  { %649 = vst [vmem:[%s1121_s3 + $0x48] sm:$0xff] %v633_v51  ;;  %654 = vst [vmem:[%s1121_s3 + $0x70] sm:$0xff] %v638_v53  ;;  %v544_v45 = vadd.f32 %v799_v33, %v759_v1  ;;  %v636_v55 = vadd.f32 %v1044_v61, %v552_v2  ;;  %v563_v57 = vadd.f32 %v804_v4, %v774_v62 }
 0x110   :  { %v761_v5 = vpop.f32.mrf.mxu0  ;;  %v554_v6 = vpop.f32.mrf.mxu1 }
 0x111   :  { %v634_v7 = vadd.f32 %v1044_v61, %v544_v45  ;;  %652 = vst [vmem:[%s1121_s3 + $0x60] sm:$0xff] %v636_v55  ;;  %v639_v47 = vadd.f32 %v1044_v61, %v563_v57  ;;  %v762_v49 = vadd.f32 %v761_v5, %v760_v3  ;;  %v555_v8 = vadd.f32 %v768_v43, %v554_v6 }
 0x113   :  { %650 = vst [vmem:[%s1121_s3 + $0x50] sm:$0xff] %v634_v7  ;;  %655 = vst [vmem:[%s1121_s3 + $0x78] sm:$0xff] %v639_v47  ;;  %v547_v9 = vadd.f32 %v800_v41, %v762_v49  ;;  %v637_v10 = vadd.f32 %v1044_v61, %v555_v8 }
 0x115   :  { %v635_v11 = vadd.f32 %v1044_v61, %v547_v9  ;;  %653 = vst [vmem:[%s1121_s3 + $0x68] sm:$0xff] %v637_v10 }
 0x117   :  { %651 = vst [vmem:[%s1121_s3 + $0x58] sm:$0xff] %v635_v11 }

// kernel: tile.68
= control target key start
LH: loop header
LB: loop body
LE: loop exit
PB: predicated region body
PF: predicated region fallthrough
CT: control target
= control target key end

     0   :  { %s22_s0 = inlined_call_operand.vmem [shape: f32[16], index: 0, kind: input, shape index: {}]   ;;  %s23_s1 = inlined_call_operand.vmem [shape: f32[4,16], index: 1, kind: output, shape index: {}]  }
   0x1   :  { %v4_v0 = vld [vmem:[%s22_s0] ss:$0 sm:$0xff] }
   0x2   :  { %5 = vst [vmem:[%s23_s1] sm:$0xf] %v4_v0 }

// kernel: tile.69
= control target key start
LH: loop header
LB: loop body
LE: loop exit
PB: predicated region body
PF: predicated region fallthrough
CT: control target
= control target key end

     0   :  { %vm8_vm0 = vcmask 130048   ;;  %s40_s8 = smov 16   ;;  %s41_s9 = smov 32   ;;  %vm14_vm1 = vcmask 523648   ;;  %vm20_vm2 = vcmask 392448   ;;  %vm26_vm3 = vcmask 261248   ;;  %s58_s0 = inlined_call_operand.vmem [shape: f32[4,16], index: 0, kind: input, shape index: {}]   ;;  %s59_s1 = inlined_call_operand.vmem [shape: f32[1,64], index: 1, kind: output, shape index: {}]  }
   0x1   :  { %v5_v0 = vld [vmem:[%s58_s0] sm:$0xf]  ;;  %s39_s0 = smov 48  }
   0x2   :  { %6 = vst [vmem:[#allocation1] sm:$0xf] %v5_v0 }
   0x9   :  { %v11_v1 = vld [vmem:[#allocation1 + $0x3] sm:$0x1]   ;;  %v23_v2 = vld [vmem:[#allocation1 + $0x1] sm:$0x1]   ;;  %v7_v3 = vld [vmem:[#allocation1] sm:$0x1]  }
   0xa   :  { %12 = vrot.lane.b32.xlu0 %v11_v1, %s39_s0  ;;  %24 = vrot.lane.b32.xlu1 %v23_v2, %s40_s8  ;;  %v17_v4 = vld [vmem:[#allocation1 + $0x2] sm:$0x1]   ;;  %9 = vst.msk [vmem:[#allocation0] sm:$0x1] %vm8_vm0, %v7_v3  }
   0xe   :  { %18 = vrot.lane.b32.xlu0 %v17_v4, %s41_s9 }
  0x7c   :  { %v13_v5 = vpop.permute.xlu0 %12   ;;  %v25_v6 = vpop.permute.xlu1 %24  }
  0x7d   :  { %15 = vst.msk [vmem:[#allocation0] sm:$0x1] %vm14_vm1, %v13_v5  }
  0x80   :  { %v19_v7 = vpop.permute.xlu0 %18  }
  0x81   :  { %21 = vst.msk [vmem:[#allocation0] sm:$0x1] %vm20_vm2, %v19_v7  }
  0x82   :  { %27 = vst.msk [vmem:[#allocation0] sm:$0x1] %vm26_vm3, %v25_v6  }
  0x89   :  { %v32_v8 = vld [vmem:[#allocation0] sm:$0x1] }
  0x8a   :  { %35 = vst [vmem:[%s59_s1] sm:$0x1] %v32_v8 }

// kernel: netG_forward.21
= control target key start
LH: loop header
LB: loop body
LE: loop exit
PB: predicated region body
PF: predicated region fallthrough
CT: control target
= control target key end

     0   :  { %vm156_vm0 = vcmask 519168   ;;  %s385_s0 = inlined_call_operand.vmem [shape: f32[128,64], index: 0, kind: input, shape index: {}]   ;;  %s386_s1 = inlined_call_operand.vmem [shape: f32[1,64], index: 1, kind: input, shape index: {}]   ;;  %s387_s2 = inlined_call_operand.vmem [shape: f32[1,64], index: 2, kind: input, shape index: {}]   ;;  %s388_s3 = inlined_call_operand.vmem [shape: bf16[128,64], index: 3, kind: output, shape index: {}]  }
   0x1   :  { %v14_v0 = vld [vmem:[%s385_s0] sm:$0xff]  ;;  %v15_v4 = vld [vmem:[%s385_s0 + $0x8] sm:$0xff]  ;;  %v16_v5 = vld [vmem:[%s385_s0 + $0x10] sm:$0xff] }
   0x2   :  { %v237_v1 = vld [vmem:[%s386_s1] ss:$0 sm:$0xff]  ;;  %v17_v6 = vld [vmem:[%s385_s0 + $0x18] sm:$0xff]  ;;  %v19_v11 = vld [vmem:[%s385_s0 + $0x28] sm:$0xff] }
   0x3   :  { %v242_v2 = vld [vmem:[%s387_s2] ss:$0 sm:$0xff]  ;;  %v37_v3 = vmul.f32 %v237_v1, %v14_v0  ;;  %v38_v7 = vmul.f32 %v237_v1, %v15_v4  ;;  %v39_v8 = vmul.f32 %v237_v1, %v16_v5  ;;  %v40_v9 = vmul.f32 %v237_v1, %v17_v6  ;;  %v20_v12 = vld [vmem:[%s385_s0 + $0x30] sm:$0xff]  ;;  %v21_v17 = vld [vmem:[%s385_s0 + $0x38] sm:$0xff] }
   0x4   :  { %v18_v10 = vld [vmem:[%s385_s0 + $0x20] sm:$0xff]  ;;  %v42_v15 = vmul.f32 %v237_v1, %v19_v11  ;;  %v43_v16 = vmul.f32 %v237_v1, %v20_v12  ;;  %v44_v21 = vmul.f32 %v237_v1, %v21_v17  ;;  %v23_v35 = vld [vmem:[%s385_s0 + $0x48] sm:$0xff]  ;;  %v24_v36 = vld [vmem:[%s385_s0 + $0x50] sm:$0xff] }
   0x5   :  { %v60_v13 = vadd.f32 %v242_v2, %v37_v3  ;;  %v41_v14 = vmul.f32 %v237_v1, %v18_v10  ;;  %v61_v18 = vadd.f32 %v242_v2, %v38_v7  ;;  %v62_v19 = vadd.f32 %v242_v2, %v39_v8  ;;  %v22_v30 = vld [vmem:[%s385_s0 + $0x40] sm:$0xff]  ;;  %v25_v37 = vld [vmem:[%s385_s0 + $0x58] sm:$0xff]  ;;  %v27_v43 = vld [vmem:[%s385_s0 + $0x68] sm:$0xff] }
   0x6   :  { %v63_v20 = vadd.f32 %v242_v2, %v40_v9  ;;  %v65_v24 = vadd.f32 %v242_v2, %v42_v15  ;;  %v66_v25 = vadd.f32 %v242_v2, %v43_v16  ;;  %v67_v29 = vadd.f32 %v242_v2, %v44_v21  ;;  %v26_v42 = vld [vmem:[%s385_s0 + $0x60] sm:$0xff]  ;;  %v28_v44 = vld [vmem:[%s385_s0 + $0x70] sm:$0xff]  ;;  %v29_v49 = vld [vmem:[%s385_s0 + $0x78] sm:$0xff] }
   0x7   :  { %v76_v22 = vmax.f32 %v60_v13, 0.0  ;;  %v64_v23 = vadd.f32 %v242_v2, %v41_v14  ;;  %v77_v26 = vmax.f32 %v61_v18, 0.0  ;;  %v78_v27 = vmax.f32 %v62_v19, 0.0 }
   0x8   :  { %v79_v28 = vmax.f32 %v63_v20, 0.0  ;;  %v81_v33 = vmax.f32 %v65_v24, 0.0  ;;  %v82_v34 = vmax.f32 %v66_v25, 0.0  ;;  %v83_v41 = vmax.f32 %v67_v29, 0.0 }
   0x9   :  { %v195_v31 = vpack.c.bf16 %v76_v22, %v76_v22  ;;  %v80_v32 = vmax.f32 %v64_v23, 0.0  ;;  %v196_v38 = vpack.c.bf16 %v77_v26, %v77_v26  ;;  %v197_v39 = vpack.c.bf16 %v78_v27, %v78_v27 }
   0xa   :  { %v198_v40 = vpack.c.bf16 %v79_v28, %v79_v28  ;;  %v200_v46 = vpack.c.bf16 %v81_v33, %v81_v33  ;;  %v201_v47 = vpack.c.bf16 %v82_v34, %v82_v34  ;;  %v45_v48 = vmul.f32 %v237_v1, %v22_v30 }
   0xb   :  { %157 = vst.msk [vmem:[%s388_s3] sm:$0xf] %vm156_vm0, %v195_v31  ;;  %v199_v45 = vpack.c.bf16 %v80_v32, %v80_v32  ;;  %158 = vst.msk [vmem:[%s388_s3 + $0x4] sm:$0xf] %vm156_vm0, %v196_v38  ;;  %v202_v50 = vpack.c.bf16 %v83_v41, %v83_v41  ;;  %v46_v51 = vmul.f32 %v237_v1, %v23_v35 }
   0xc   :  { %159 = vst.msk [vmem:[%s388_s3 + $0x8] sm:$0xf] %vm156_vm0, %v197_v39  ;;  %160 = vst.msk [vmem:[%s388_s3 + $0xc] sm:$0xf] %vm156_vm0, %v198_v40  ;;  %v47_v52 = vmul.f32 %v237_v1, %v24_v36  ;;  %v48_v53 = vmul.f32 %v237_v1, %v25_v37  ;;  %v68_v54 = vadd.f32 %v242_v2, %v45_v48 }
   0xd   :  { %161 = vst.msk [vmem:[%s388_s3 + $0x10] sm:$0xf] %vm156_vm0, %v199_v45  ;;  %162 = vst.msk [vmem:[%s388_s3 + $0x14] sm:$0xf] %vm156_vm0, %v200_v46  ;;  %v49_v55 = vmul.f32 %v237_v1, %v26_v42  ;;  %v50_v56 = vmul.f32 %v237_v1, %v27_v43  ;;  %v51_v57 = vmul.f32 %v237_v1, %v28_v44 }
   0xe   :  { %163 = vst.msk [vmem:[%s388_s3 + $0x18] sm:$0xf] %vm156_vm0, %v201_v47  ;;  %164 = vst.msk [vmem:[%s388_s3 + $0x1c] sm:$0xf] %vm156_vm0, %v202_v50  ;;  %v69_v58 = vadd.f32 %v242_v2, %v46_v51  ;;  %v70_v59 = vadd.f32 %v242_v2, %v47_v52  ;;  %v71_v60 = vadd.f32 %v242_v2, %v48_v53  ;;  %v84_v62 = vmax.f32 %v68_v54, 0.0 }
   0xf   :  { %v52_v61 = vmul.f32 %v237_v1, %v29_v49  ;;  %v72_v63 = vadd.f32 %v242_v2, %v49_v55  ;;  %v73_v0 = vadd.f32 %v242_v2, %v50_v56  ;;  %v74_v3 = vadd.f32 %v242_v2, %v51_v57 }
  0x10   :  { %v85_v4 = vmax.f32 %v69_v58, 0.0  ;;  %v86_v5 = vmax.f32 %v70_v59, 0.0  ;;  %v87_v6 = vmax.f32 %v71_v60, 0.0  ;;  %v203_v8 = vpack.c.bf16 %v84_v62, %v84_v62 }
  0x11   :  { %v75_v7 = vadd.f32 %v242_v2, %v52_v61  ;;  %v88_v9 = vmax.f32 %v72_v63, 0.0  ;;  %v89_v10 = vmax.f32 %v73_v0, 0.0  ;;  %v90_v11 = vmax.f32 %v74_v3, 0.0 }
  0x12   :  { %v204_v12 = vpack.c.bf16 %v85_v4, %v85_v4  ;;  %v205_v13 = vpack.c.bf16 %v86_v5, %v86_v5  ;;  %v206_v14 = vpack.c.bf16 %v87_v6, %v87_v6  ;;  %165 = vst.msk [vmem:[%s388_s3 + $0x20] sm:$0xf] %vm156_vm0, %v203_v8 }
  0x13   :  { %v91_v1 = vmax.f32 %v75_v7, 0.0  ;;  %v207_v15 = vpack.c.bf16 %v88_v9, %v88_v9  ;;  %v208_v16 = vpack.c.bf16 %v89_v10, %v89_v10  ;;  %v209_v17 = vpack.c.bf16 %v90_v11, %v90_v11 }
  0x14   :  { %166 = vst.msk [vmem:[%s388_s3 + $0x24] sm:$0xf] %vm156_vm0, %v204_v12  ;;  %167 = vst.msk [vmem:[%s388_s3 + $0x28] sm:$0xf] %vm156_vm0, %v205_v13 }
  0x15   :  { %168 = vst.msk [vmem:[%s388_s3 + $0x2c] sm:$0xf] %vm156_vm0, %v206_v14  ;;  %v210_v2 = vpack.c.bf16 %v91_v1, %v91_v1  ;;  %169 = vst.msk [vmem:[%s388_s3 + $0x30] sm:$0xf] %vm156_vm0, %v207_v15 }
  0x16   :  { %170 = vst.msk [vmem:[%s388_s3 + $0x34] sm:$0xf] %vm156_vm0, %v208_v16  ;;  %171 = vst.msk [vmem:[%s388_s3 + $0x38] sm:$0xf] %vm156_vm0, %v209_v17 }
  0x17   :  { %172 = vst.msk [vmem:[%s388_s3 + $0x3c] sm:$0xf] %vm156_vm0, %v210_v2 }

// kernel: netG_forward.22
= control target key start
LH: loop header
LB: loop body
LE: loop exit
PB: predicated region body
PF: predicated region fallthrough
CT: control target
= control target key end

     0   :  { %s1296_s12 = smov 0   ;;  %s1298_s13 = smov 0   ;;  %s1484_s0 = inlined_call_operand.vmem [shape: bf16[512,144], index: 0, kind: input, shape index: {}]   ;;  %s1485_s1 = inlined_call_operand.vmem [shape: bf16[144,128], index: 1, kind: input, shape index: {}]   ;;  %s1486_s2 = inlined_call_operand.vmem [shape: f32[1,128], index: 2, kind: input, shape index: {}]   ;;  %s1487_s3 = inlined_call_operand.vmem [shape: f32[512,128], index: 3, kind: output, shape index: {}]  }
   0x1   :  { %s1300_s14 = smov 0  }
   0x2 LB: > { %s32_s15 = sadd.s32 1, %s1269_s13  ;;  %p1084_p0 = scmp.ge.s32.totalorder %s1273_s14, 1  ;;  %s1273_s14 = sphi %s1300_s14, %s13_s14   ;;  %s1269_s13 = sphi %s1298_s13, %s1489_s13   ;;  %s1265_s12 = sphi %s1296_s12, %s1488_s12  }
   0x3   : > { %p34_p1 = scmp.ge.s32.totalorder %s32_s15, 2  ;;  %p191_p2 = scmp.lt.s32.totalorder %s1273_s14, 3 }
   0x5   : > { %s1491_s15 = smov (%p34_p1, %s32_s15), 0  ;;  %p192_p3 = pnand %p1084_p0, %p191_p2 }
   0x6   : > { %s1085_s18 = sshll.u32 (!%p192_p3), %s1265_s12, 5 }
   0x7   : > { %195 = sbr.rel (%p192_p3) target bundleno = 305 (0x131), region = 32  ;;  %p236_p4 = scmp.lt.s32.totalorder (!%p192_p3), %s1085_s18, 63 }
   0xc   : > { %v1194_v0 = vld [vmem:[%s1485_s1 + $0x38] sm:$0xff]   ;;  %v1275_v1 = vmov 0   ;;  %v1195_v2 = vld [vmem:[%s1485_s1 + $0x30] sm:$0xff]   ;;  %s1493_s18 = smov (!%p236_p4, %s1085_s18), 63  ;;  %v1196_v3 = vld [vmem:[%s1485_s1 + $0x28] sm:$0xff]   ;;  %vm584_vm0 = vcmask 130048  }
   0xd   : > { %633 = vmatprep.subr.bf16.mxu0 %v1275_v1  ;;  %1151 = vmatprep.subr.bf16.mxu1 %v1275_v1  ;;  %s1150_s23 = sshll.u32 %s1493_s18, 3  ;;  %v1197_v4 = vld [vmem:[%s1485_s1 + $0x20] sm:$0xff]   ;;  %v1198_v7 = vld [vmem:[%s1485_s1 + $0x18] sm:$0xff]   ;;  %v1199_v8 = vld [vmem:[%s1485_s1 + $0x10] sm:$0xff]  }
   0xe   : > { %634 = vmatpush1.bf16.msra.mxu0 %v1194_v0  ;;  %1160 = vmatpush1.bf16.msra.mxu1 %v1194_v0  ;;  %s1331_s26 = scalar_lea.vmem %s1484_s0, %s1150_s23  ;;  %v1200_v9 = vld [vmem:[%s1485_s1 + $0x8] sm:$0xff]   ;;  %v1201_v10 = vld [vmem:[%s1485_s1] sm:$0xff]   ;;  %s1409_s20 = scalar_lea.vmem %s1487_s3, %s1150_s23 }
   0xf   : > { %635 = vmatprep.subr.bf16.mxu0 %v1275_v1  ;;  %1152 = vmatprep.subr.bf16.mxu1 %v1275_v1  ;;  %v1205_v5 = vld [vmem:[%s1331_s26 + $0x4] ss:$8 sps:$4 sm:$0xff]   ;;  %v1203_v12 = vld [vmem:[%s1331_s26] ss:$8 sps:$4 sm:$0xff]   ;;  %v1209_v14 = vld [vmem:[%s1331_s26 + $0x14] ss:$8 sps:$4 sm:$0xff]  }
  0x10   : > { %v1208_v6 = vld [vmem:[%s1331_s26 + $0x84] ss:$8 sps:$4 sm:$0xff]   ;;  %1131 = vmatprep.mubr.msk.bf16.mxu0 %vm584_vm0, %v1205_v5  ;;  %v1206_v13 = vld [vmem:[%s1331_s26 + $0x80] ss:$8 sps:$4 sm:$0xff]   ;;  %v1211_v15 = vld [vmem:[%s1331_s26 + $0x94] ss:$8 sps:$4 sm:$0xff]  }
  0x11   : > { %1139 = vmatprep.mubr.msk.bf16.mxu1 %vm584_vm0, %v1208_v6  ;;  %v1202_v11 = vld [vmem:[%s1485_s1 + $0x40] sm:$0xff]   ;;  %v1213_v16 = vld [vmem:[%s1331_s26 + $0x10] ss:$8 sps:$4 sm:$0xff]   ;;  %v1221_v22 = vld [vmem:[%s1331_s26 + $0x34] ss:$8 sps:$4 sm:$0xff]  }
  0x12   : > { %636 = vmatpush1.bf16.msra.mxu0 %v1195_v2  ;;  %1161 = vmatpush1.bf16.msra.mxu1 %v1195_v2  ;;  %v1214_v17 = vld [vmem:[%s1331_s26 + $0x90] ss:$8 sps:$4 sm:$0xff]   ;;  %v1215_v18 = vld [vmem:[%s1331_s26 + $0x24] ss:$8 sps:$4 sm:$0xff]   ;;  %v1219_v20 = vld [vmem:[%s1331_s26 + $0x20] ss:$8 sps:$4 sm:$0xff]  }
  0x13   : > { %637 = vmatprep.subr.bf16.mxu0 %v1275_v1  ;;  %1153 = vmatprep.subr.bf16.mxu1 %v1275_v1  ;;  %v1217_v19 = vld [vmem:[%s1331_s26 + $0xa4] ss:$8 sps:$4 sm:$0xff]   ;;  %v1220_v21 = vld [vmem:[%s1331_s26 + $0xa0] ss:$8 sps:$4 sm:$0xff]   ;;  %v1223_v23 = vld [vmem:[%s1331_s26 + $0xb4] ss:$8 sps:$4 sm:$0xff]  }
  0x14   : > { %v1225_v24 = vld [vmem:[%s1331_s26 + $0x30] ss:$8 sps:$4 sm:$0xff]   ;;  %v1227_v26 = vld [vmem:[%s1331_s26 + $0x44] ss:$8 sps:$4 sm:$0xff]   ;;  %v1231_v28 = vld [vmem:[%s1331_s26 + $0x40] ss:$8 sps:$4 sm:$0xff]  }
  0x15   : > { %v1226_v25 = vld [vmem:[%s1331_s26 + $0xb0] ss:$8 sps:$4 sm:$0xff]   ;;  %v1229_v27 = vld [vmem:[%s1331_s26 + $0xc4] ss:$8 sps:$4 sm:$0xff]   ;;  %v1232_v29 = vld [vmem:[%s1331_s26 + $0xc0] ss:$8 sps:$4 sm:$0xff]  }
  0x16   : > { %638 = vmatpush1.bf16.msra.mxu0 %v1196_v3  ;;  %1162 = vmatpush1.bf16.msra.mxu1 %v1196_v3  ;;  %v1233_v30 = vld [vmem:[%s1331_s26 + $0x54] ss:$8 sps:$4 sm:$0xff]   ;;  %v1237_v32 = vld [vmem:[%s1331_s26 + $0x50] ss:$8 sps:$4 sm:$0xff]   ;;  %v1239_v34 = vld [vmem:[%s1331_s26 + $0x64] ss:$8 sps:$4 sm:$0xff]  }
  0x17   : > { %639 = vmatprep.subr.bf16.mxu0 %v1275_v1  ;;  %1154 = vmatprep.subr.bf16.mxu1 %v1275_v1  ;;  %v1235_v31 = vld [vmem:[%s1331_s26 + $0xd4] ss:$8 sps:$4 sm:$0xff]   ;;  %v1238_v33 = vld [vmem:[%s1331_s26 + $0xd0] ss:$8 sps:$4 sm:$0xff]   ;;  %v1241_v35 = vld [vmem:[%s1331_s26 + $0xe4] ss:$8 sps:$4 sm:$0xff]  }
  0x18   : > { %v1243_v36 = vld [vmem:[%s1331_s26 + $0x60] ss:$8 sps:$4 sm:$0xff]   ;;  %v1245_v38 = vld [vmem:[%s1331_s26 + $0x74] ss:$8 sps:$4 sm:$0xff]   ;;  %v1249_v40 = vld [vmem:[%s1331_s26 + $0x70] ss:$8 sps:$4 sm:$0xff]  }
  0x19   : > { %v1244_v37 = vld [vmem:[%s1331_s26 + $0xe0] ss:$8 sps:$4 sm:$0xff]   ;;  %v1247_v39 = vld [vmem:[%s1331_s26 + $0xf4] ss:$8 sps:$4 sm:$0xff]   ;;  %v1250_v41 = vld [vmem:[%s1331_s26 + $0xf0] ss:$8 sps:$4 sm:$0xff]  }
  0x1a   : > { %640 = vmatpush1.bf16.msra.mxu0 %v1197_v4  ;;  %1163 = vmatpush1.bf16.msra.mxu1 %v1197_v4  ;;  %v1402_v42 = vld [vmem:[%s1486_s2] ss:$0 sm:$0xff] }
  0x1b   : > { %641 = vmatprep.subr.bf16.mxu0 %v1275_v1  ;;  %1155 = vmatprep.subr.bf16.mxu1 %v1275_v1 }
  0x1e   : > { %642 = vmatpush1.bf16.msra.mxu0 %v1198_v7  ;;  %1164 = vmatpush1.bf16.msra.mxu1 %v1198_v7 }
  0x1f   : > { %643 = vmatprep.subr.bf16.mxu0 %v1275_v1  ;;  %1156 = vmatprep.subr.bf16.mxu1 %v1275_v1 }
  0x22   : > { %644 = vmatpush1.bf16.msra.mxu0 %v1199_v8  ;;  %1165 = vmatpush1.bf16.msra.mxu1 %v1199_v8 }
  0x23   : > { %645 = vmatprep.subr.bf16.mxu0 %v1275_v1  ;;  %1157 = vmatprep.subr.bf16.mxu1 %v1275_v1 }
  0x26   : > { %646 = vmatpush1.bf16.msra.mxu0 %v1200_v9  ;;  %1166 = vmatpush1.bf16.msra.mxu1 %v1200_v9 }
  0x27   : > { %647 = vmatprep.subr.bf16.mxu0 %v1275_v1  ;;  %1158 = vmatprep.subr.bf16.mxu1 %v1275_v1 }
  0x2a   : > { %648 = vmatpush1.bf16.msra.mxu0 %v1201_v10  ;;  %1167 = vmatpush1.bf16.msra.mxu1 %v1201_v10 }
  0x2b   : > { %663 = vmatprep.subr.bf16.mxu0 %v1275_v1  ;;  %1159 = vmatprep.subr.bf16.mxu1 %v1275_v1 }
  0x2e   : > { %664 = vmatpush2.bf16.msra.mxu0 %v1202_v11  ;;  %1168 = vmatpush2.bf16.msra.mxu1 %v1202_v11 }
  0x31   : > { %666 = vmatmul.mubr.bf16.vlgmr.msra.gmra.mxu0 %v1203_v12  ;;  %730 = vmatmul.mubr.bf16.vlgmr.msra.gmra.mxu1 %v1206_v13 }
  0x32   : > { %1132 = vmatprep.mubr.msk.bf16.mxu0 %vm584_vm0, %v1209_v14  ;;  %1140 = vmatprep.mubr.msk.bf16.mxu1 %vm584_vm0, %v1211_v15 }
  0x39   : > { %674 = vmatmul.mubr.bf16.gmra.mxu0 %v1213_v16  ;;  %738 = vmatmul.mubr.bf16.gmra.mxu1 %v1214_v17 }
  0x3a   : > { %1133 = vmatprep.mubr.msk.bf16.mxu0 %vm584_vm0, %v1215_v18  ;;  %1141 = vmatprep.mubr.msk.bf16.mxu1 %vm584_vm0, %v1217_v19 }
  0x41   : > { %682 = vmatmul.mubr.bf16.gmra.mxu0 %v1219_v20  ;;  %746 = vmatmul.mubr.bf16.gmra.mxu1 %v1220_v21 }
  0x42   : > { %1134 = vmatprep.mubr.msk.bf16.mxu0 %vm584_vm0, %v1221_v22  ;;  %1142 = vmatprep.mubr.msk.bf16.mxu1 %vm584_vm0, %v1223_v23 }
  0x49   : > { %690 = vmatmul.mubr.bf16.gmra.mxu0 %v1225_v24  ;;  %754 = vmatmul.mubr.bf16.gmra.mxu1 %v1226_v25 }
  0x4a   : > { %1135 = vmatprep.mubr.msk.bf16.mxu0 %vm584_vm0, %v1227_v26  ;;  %1143 = vmatprep.mubr.msk.bf16.mxu1 %vm584_vm0, %v1229_v27 }
  0x51   : > { %698 = vmatmul.mubr.bf16.gmra.mxu0 %v1231_v28  ;;  %762 = vmatmul.mubr.bf16.gmra.mxu1 %v1232_v29 }
  0x52   : > { %1136 = vmatprep.mubr.msk.bf16.mxu0 %vm584_vm0, %v1233_v30  ;;  %1144 = vmatprep.mubr.msk.bf16.mxu1 %vm584_vm0, %v1235_v31 }
  0x59   : > { %706 = vmatmul.mubr.bf16.gmra.mxu0 %v1237_v32  ;;  %770 = vmatmul.mubr.bf16.gmra.mxu1 %v1238_v33 }
  0x5a   : > { %1137 = vmatprep.mubr.msk.bf16.mxu0 %vm584_vm0, %v1239_v34  ;;  %1145 = vmatprep.mubr.msk.bf16.mxu1 %vm584_vm0, %v1241_v35 }
  0x61   : > { %714 = vmatmul.mubr.bf16.gmra.mxu0 %v1243_v36  ;;  %778 = vmatmul.mubr.bf16.gmra.mxu1 %v1244_v37 }
  0x62   : > { %1138 = vmatprep.mubr.msk.bf16.mxu0 %vm584_vm0, %v1245_v38  ;;  %1146 = vmatprep.mubr.msk.bf16.mxu1 %vm584_vm0, %v1247_v39 }
  0x69   : > { %722 = vmatmul.mubr.bf16.gmra.mxu0 %v1249_v40  ;;  %786 = vmatmul.mubr.bf16.gmra.mxu1 %v1250_v41 }
  0xf1   : > { %v667_v43 = vpop.f32.mrf.mxu0  ;;  %v731_v44 = vpop.f32.mrf.mxu1 }
  0xf2   : > { %v900_v45 = vadd.f32 %v1402_v42, %v667_v43  ;;  %v916_v46 = vadd.f32 %v1402_v42, %v731_v44 }
  0xf3   : > { %v669_v47 = vpop.f32.mrf.mxu0  ;;  %v733_v48 = vpop.f32.mrf.mxu1 }
  0xf4   : > { %932 = vst [vmem:[%s1409_s20] sm:$0xff] %v900_v45  ;;  %948 = vst [vmem:[%s1409_s20 + $0x80] sm:$0xff] %v916_v46 }
  0xf5   : > { %v670_v49 = vpop.f32.mrf.mxu0  ;;  %v734_v50 = vpop.f32.mrf.mxu1 }
  0xf6   : > { %v901_v51 = vadd.f32 %v1402_v42, %v670_v49  ;;  %v917_v52 = vadd.f32 %v1402_v42, %v734_v50 }
  0xf7   : > { %v672_v53 = vpop.f32.mrf.mxu0  ;;  %v736_v54 = vpop.f32.mrf.mxu1 }
  0xf8   : > { %933 = vst [vmem:[%s1409_s20 + $0x8] sm:$0xff] %v901_v51  ;;  %949 = vst [vmem:[%s1409_s20 + $0x88] sm:$0xff] %v917_v52 }
  0xf9   : > { %v675_v55 = vpop.f32.mrf.mxu0  ;;  %v739_v56 = vpop.f32.mrf.mxu1 }
  0xfa   : > { %v902_v57 = vadd.f32 %v1402_v42, %v675_v55  ;;  %v918_v58 = vadd.f32 %v1402_v42, %v739_v56 }
  0xfb   : > { %v677_v59 = vpop.f32.mrf.mxu0  ;;  %v741_v60 = vpop.f32.mrf.mxu1 }
  0xfc   : > { %934 = vst [vmem:[%s1409_s20 + $0x10] sm:$0xff] %v902_v57  ;;  %950 = vst [vmem:[%s1409_s20 + $0x90] sm:$0xff] %v918_v58 }
  0xfd   : > { %v678_v61 = vpop.f32.mrf.mxu0  ;;  %v742_v62 = vpop.f32.mrf.mxu1 }
  0xfe   : > { %v903_v63 = vadd.f32 %v1402_v42, %v678_v61  ;;  %v919_v0 = vadd.f32 %v1402_v42, %v742_v62 }
  0xff   : > { %v680_v1 = vpop.f32.mrf.mxu0  ;;  %v744_v2 = vpop.f32.mrf.mxu1 }
 0x100   : > { %935 = vst [vmem:[%s1409_s20 + $0x18] sm:$0xff] %v903_v63  ;;  %951 = vst [vmem:[%s1409_s20 + $0x98] sm:$0xff] %v919_v0 }
 0x101   : > { %v683_v3 = vpop.f32.mrf.mxu0  ;;  %v747_v4 = vpop.f32.mrf.mxu1 }
 0x102   : > { %v904_v5 = vadd.f32 %v1402_v42, %v683_v3  ;;  %v920_v6 = vadd.f32 %v1402_v42, %v747_v4 }
 0x103   : > { %v685_v7 = vpop.f32.mrf.mxu0  ;;  %v749_v8 = vpop.f32.mrf.mxu1 }
 0x104   : > { %936 = vst [vmem:[%s1409_s20 + $0x20] sm:$0xff] %v904_v5  ;;  %952 = vst [vmem:[%s1409_s20 + $0xa0] sm:$0xff] %v920_v6 }
 0x105   : > { %v686_v9 = vpop.f32.mrf.mxu0  ;;  %v750_v10 = vpop.f32.mrf.mxu1 }
 0x106   : > { %v905_v11 = vadd.f32 %v1402_v42, %v686_v9  ;;  %v921_v12 = vadd.f32 %v1402_v42, %v750_v10 }
 0x107   : > { %v688_v13 = vpop.f32.mrf.mxu0  ;;  %v752_v14 = vpop.f32.mrf.mxu1 }
 0x108   : > { %937 = vst [vmem:[%s1409_s20 + $0x28] sm:$0xff] %v905_v11  ;;  %953 = vst [vmem:[%s1409_s20 + $0xa8] sm:$0xff] %v921_v12 }
 0x109   : > { %v691_v15 = vpop.f32.mrf.mxu0  ;;  %v755_v16 = vpop.f32.mrf.mxu1 }
 0x10a   : > { %v906_v17 = vadd.f32 %v1402_v42, %v691_v15  ;;  %v922_v18 = vadd.f32 %v1402_v42, %v755_v16 }
 0x10b   : > { %v693_v19 = vpop.f32.mrf.mxu0  ;;  %v757_v20 = vpop.f32.mrf.mxu1 }
 0x10c   : > { %938 = vst [vmem:[%s1409_s20 + $0x30] sm:$0xff] %v906_v17  ;;  %954 = vst [vmem:[%s1409_s20 + $0xb0] sm:$0xff] %v922_v18 }
 0x10d   : > { %v694_v21 = vpop.f32.mrf.mxu0  ;;  %v758_v22 = vpop.f32.mrf.mxu1 }
 0x10e   : > { %v907_v23 = vadd.f32 %v1402_v42, %v694_v21  ;;  %v923_v24 = vadd.f32 %v1402_v42, %v758_v22 }
 0x10f   : > { %v696_v25 = vpop.f32.mrf.mxu0  ;;  %v760_v26 = vpop.f32.mrf.mxu1 }
 0x110   : > { %939 = vst [vmem:[%s1409_s20 + $0x38] sm:$0xff] %v907_v23  ;;  %955 = vst [vmem:[%s1409_s20 + $0xb8] sm:$0xff] %v923_v24 }
 0x111   : > { %v699_v27 = vpop.f32.mrf.mxu0  ;;  %v763_v28 = vpop.f32.mrf.mxu1 }
 0x112   : > { %v908_v29 = vadd.f32 %v1402_v42, %v699_v27  ;;  %v924_v30 = vadd.f32 %v1402_v42, %v763_v28 }
 0x113   : > { %v701_v31 = vpop.f32.mrf.mxu0  ;;  %v765_v32 = vpop.f32.mrf.mxu1 }
 0x114   : > { %940 = vst [vmem:[%s1409_s20 + $0x40] sm:$0xff] %v908_v29  ;;  %956 = vst [vmem:[%s1409_s20 + $0xc0] sm:$0xff] %v924_v30 }
 0x115   : > { %v702_v33 = vpop.f32.mrf.mxu0  ;;  %v766_v34 = vpop.f32.mrf.mxu1 }
 0x116   : > { %v909_v35 = vadd.f32 %v1402_v42, %v702_v33  ;;  %v925_v36 = vadd.f32 %v1402_v42, %v766_v34 }
 0x117   : > { %v704_v37 = vpop.f32.mrf.mxu0  ;;  %v768_v38 = vpop.f32.mrf.mxu1 }
 0x118   : > { %941 = vst [vmem:[%s1409_s20 + $0x48] sm:$0xff] %v909_v35  ;;  %957 = vst [vmem:[%s1409_s20 + $0xc8] sm:$0xff] %v925_v36 }
 0x119   : > { %v707_v39 = vpop.f32.mrf.mxu0  ;;  %v771_v40 = vpop.f32.mrf.mxu1 }
 0x11a   : > { %v910_v41 = vadd.f32 %v1402_v42, %v707_v39  ;;  %v926_v43 = vadd.f32 %v1402_v42, %v771_v40 }
 0x11b   : > { %v709_v44 = vpop.f32.mrf.mxu0  ;;  %v773_v45 = vpop.f32.mrf.mxu1 }
 0x11c   : > { %942 = vst [vmem:[%s1409_s20 + $0x50] sm:$0xff] %v910_v41  ;;  %958 = vst [vmem:[%s1409_s20 + $0xd0] sm:$0xff] %v926_v43 }
 0x11d   : > { %v710_v46 = vpop.f32.mrf.mxu0  ;;  %v774_v47 = vpop.f32.mrf.mxu1 }
 0x11e   : > { %v911_v48 = vadd.f32 %v1402_v42, %v710_v46  ;;  %v927_v49 = vadd.f32 %v1402_v42, %v774_v47 }
 0x11f   : > { %v712_v50 = vpop.f32.mrf.mxu0  ;;  %v776_v51 = vpop.f32.mrf.mxu1 }
 0x120   : > { %943 = vst [vmem:[%s1409_s20 + $0x58] sm:$0xff] %v911_v48  ;;  %959 = vst [vmem:[%s1409_s20 + $0xd8] sm:$0xff] %v927_v49 }
 0x121   : > { %v715_v52 = vpop.f32.mrf.mxu0  ;;  %v779_v53 = vpop.f32.mrf.mxu1 }
 0x122   : > { %v912_v54 = vadd.f32 %v1402_v42, %v715_v52  ;;  %v928_v55 = vadd.f32 %v1402_v42, %v779_v53 }
 0x123   : > { %v717_v56 = vpop.f32.mrf.mxu0  ;;  %v781_v57 = vpop.f32.mrf.mxu1 }
 0x124   : > { %944 = vst [vmem:[%s1409_s20 + $0x60] sm:$0xff] %v912_v54  ;;  %960 = vst [vmem:[%s1409_s20 + $0xe0] sm:$0xff] %v928_v55 }
 0x125   : > { %v718_v58 = vpop.f32.mrf.mxu0  ;;  %v782_v59 = vpop.f32.mrf.mxu1 }
 0x126   : > { %v913_v60 = vadd.f32 %v1402_v42, %v718_v58  ;;  %v929_v61 = vadd.f32 %v1402_v42, %v782_v59 }
 0x127   : > { %v720_v62 = vpop.f32.mrf.mxu0  ;;  %v784_v63 = vpop.f32.mrf.mxu1 }
 0x128   : > { %945 = vst [vmem:[%s1409_s20 + $0x68] sm:$0xff] %v913_v60  ;;  %961 = vst [vmem:[%s1409_s20 + $0xe8] sm:$0xff] %v929_v61 }
 0x129   : > { %v723_v0 = vpop.f32.mrf.mxu0  ;;  %v787_v1 = vpop.f32.mrf.mxu1 }
 0x12a   : > { %v914_v2 = vadd.f32 %v1402_v42, %v723_v0  ;;  %v930_v3 = vadd.f32 %v1402_v42, %v787_v1 }
 0x12b   : > { %v725_v4 = vpop.f32.mrf.mxu0  ;;  %v789_v5 = vpop.f32.mrf.mxu1 }
 0x12c   : > { %946 = vst [vmem:[%s1409_s20 + $0x70] sm:$0xff] %v914_v2  ;;  %962 = vst [vmem:[%s1409_s20 + $0xf0] sm:$0xff] %v930_v3 }
 0x12d   : > { %v726_v6 = vpop.f32.mrf.mxu0  ;;  %v790_v7 = vpop.f32.mrf.mxu1 }
 0x12e   : > { %v915_v8 = vadd.f32 %v1402_v42, %v726_v6  ;;  %v931_v9 = vadd.f32 %v1402_v42, %v790_v7 }
 0x12f   : > { %v728_v10 = vpop.f32.mrf.mxu0  ;;  %v792_v11 = vpop.f32.mrf.mxu1 }
 0x130   : > { %947 = vst [vmem:[%s1409_s20 + $0x78] sm:$0xff] %v915_v8  ;;  %963 = vst [vmem:[%s1409_s20 + $0xf8] sm:$0xff] %v931_v9 }
 0x131 PF: > { %s13_s14 = sadd.s32 1, %s1273_s14   ;;  %s1488_s12 = smov %s1269_s13 }
 0x132   : > { %p10_p5 = scmp.ge.s32.totalorder %s13_s14, 4   ;;  %s1489_s13 = smov %s1491_s15 }
 0x134   :  { %12 = sbr.rel (!%p10_p5) target bundleno = 2 (0x2), region = 76 }

// kernel: squeeze.14
= control target key start
LH: loop header
LB: loop body
LE: loop exit
PB: predicated region body
PF: predicated region fallthrough
CT: control target
= control target key end

     0   :  { %s40_s8 = smov 104   ;;  %vm8_vm0 = vcmask 64512   ;;  %s41_s9 = smov 112   ;;  %s58_s0 = inlined_call_operand.vmem [shape: f32[32], index: 0, kind: input, shape index: {}]   ;;  %s59_s1 = inlined_call_operand.vmem [shape: f32[4,8], index: 1, kind: output, shape index: {}]  }
   0x1   :  { %v5_v0 = vld [vmem:[%s58_s0] sm:$0x1]  ;;  %s39_s0 = smov 120  }
   0x2   :  { %6 = vst [vmem:[#allocation1] sm:$0x1] %v5_v0 }
   0x9   :  { %v10_v1 = vld [vmem:[#allocation1] sm:$0x1]  }
   0xa   :  { %v22_v2 = vld [vmem:[#allocation1] sm:$0x1]   ;;  %11 = vrot.lane.b32.xlu0 %v10_v1, %s39_s0 }
   0xb   :  { %23 = vrot.lane.b32.xlu1 %v22_v2, %s40_s8  ;;  %v7_v3 = vld [vmem:[#allocation1] sm:$0x1]  }
   0xc   :  { %v16_v4 = vld [vmem:[#allocation1] sm:$0x1]   ;;  %9 = vst.msk [vmem:[#allocation0] sm:$0x1] %vm8_vm0, %v7_v3  }
   0xe   :  { %17 = vrot.lane.b32.xlu0 %v16_v4, %s41_s9 }
  0x7c   :  { %v12_v5 = vpop.permute.xlu0 %11  }
  0x7d   :  { %v24_v6 = vpop.permute.xlu1 %23   ;;  %15 = vst.msk [vmem:[#allocation0 + $0x1] sm:$0x1] %vm8_vm0, %v12_v5  }
  0x7e   :  { %27 = vst.msk [vmem:[#allocation0 + $0x3] sm:$0x1] %vm8_vm0, %v24_v6  }
  0x80   :  { %v18_v7 = vpop.permute.xlu0 %17  }
  0x81   :  { %21 = vst.msk [vmem:[#allocation0 + $0x2] sm:$0x1] %vm8_vm0, %v18_v7  }
  0x88   :  { %v32_v8 = vld [vmem:[#allocation0] sm:$0xf] }
  0x89   :  { %35 = vst [vmem:[%s59_s1] sm:$0xf] %v32_v8 }

// kernel: netG_forward.23
= control target key start
LH: loop header
LB: loop body
LE: loop exit
PB: predicated region body
PF: predicated region fallthrough
CT: control target
= control target key end

     0   :  { %vm12_vm0 = vcmask 254976   ;;  %vm79_vm1 = vcmask 261120   ;;  %v421_v0 = vmov 0.0   ;;  %vm214_vm2 = vcmask 253952   ;;  %s1301_s0 = inlined_call_operand.vmem [shape: f32[512,32], index: 0, kind: input, shape index: {}]   ;;  %s1302_s1 = inlined_call_operand.vmem [shape: f32[2,32], index: 1, kind: output, shape index: {}]  }
   0x1   :  { %13 = vst.msk [vmem:[%s1302_s1] sm:$0x3] %vm12_vm0, %v421_v0  ;;  %v438_v1 = vld [vmem:[%s1301_s0] sm:$0xff]  ;;  %v443_v2 = vld [vmem:[%s1301_s0 + $0x8] sm:$0xff]  ;;  %v448_v3 = vld [vmem:[%s1301_s0 + $0x10] sm:$0xff] }
   0x2   :  { %v80_v4 = vsel %vm79_vm1, %v438_v1, 0.0  ;;  %v81_v5 = vsel %vm79_vm1, %v443_v2, 0.0  ;;  %v83_v6 = vsel %vm79_vm1, %v448_v3, 0.0  ;;  %v459_v7 = vld [vmem:[%s1301_s0 + $0x18] sm:$0xff]  ;;  %v466_v10 = vld [vmem:[%s1301_s0 + $0x20] sm:$0xff]  ;;  %v473_v13 = vld [vmem:[%s1301_s0 + $0x28] sm:$0xff] }
   0x3   :  { %v82_v8 = vadd.f32 %v81_v5, %v80_v4  ;;  %v85_v9 = vsel %vm79_vm1, %v459_v7, 0.0  ;;  %v87_v12 = vsel %vm79_vm1, %v466_v10, 0.0  ;;  %v89_v15 = vsel %vm79_vm1, %v473_v13, 0.0  ;;  %v480_v16 = vld [vmem:[%s1301_s0 + $0x30] sm:$0xff]  ;;  %v485_v18 = vld [vmem:[%s1301_s0 + $0x38] sm:$0xff]  ;;  %v490_v19 = vld [vmem:[%s1301_s0 + $0x40] sm:$0xff] }
   0x4   :  { %v91_v20 = vsel %vm79_vm1, %v480_v16, 0.0  ;;  %v497_v21 = vld [vmem:[%s1301_s0 + $0x48] sm:$0xff]  ;;  %v502_v22 = vld [vmem:[%s1301_s0 + $0x50] sm:$0xff]  ;;  %v507_v23 = vld [vmem:[%s1301_s0 + $0x58] sm:$0xff]  ;;  %v93_v25 = vsel %vm79_vm1, %v485_v18, 0.0  ;;  %v95_v26 = vsel %vm79_vm1, %v490_v19, 0.0 }
   0x5   :  { %v84_v11 = vadd.f32 %v83_v6, %v82_v8  ;;  %v516_v27 = vld [vmem:[%s1301_s0 + $0x108] sm:$0xff]  ;;  %v521_v28 = vld [vmem:[%s1301_s0 + $0x110] sm:$0xff]  ;;  %v526_v29 = vld [vmem:[%s1301_s0 + $0x118] sm:$0xff]  ;;  %v97_v30 = vsel %vm79_vm1, %v497_v21, 0.0  ;;  %v99_v31 = vsel %vm79_vm1, %v502_v22, 0.0  ;;  %v534_v32 = vsel %vm79_vm1, %v507_v23, 0.0 }
   0x6   :  { %v539_v33 = vld [vmem:[%s1301_s0 + $0x120] sm:$0xff]  ;;  %v544_v34 = vld [vmem:[%s1301_s0 + $0x128] sm:$0xff]  ;;  %v549_v35 = vld [vmem:[%s1301_s0 + $0x130] sm:$0xff]  ;;  %v553_v37 = vsel %vm79_vm1, %v516_v27, 0.0  ;;  %v557_v38 = vsel %vm79_vm1, %v521_v28, 0.0  ;;  %v561_v39 = vsel %vm79_vm1, %v526_v29, 0.0 }
   0x7   :  { %v86_v14 = vadd.f32 %v85_v9, %v84_v11  ;;  %1321 = vst [vmem:[#allocation2_spill] sm:$0xff] %v553_v37  ;;  %1322 = vst [vmem:[#allocation3_spill] sm:$0xff] %v557_v38  ;;  %v566_v40 = vld [vmem:[%s1301_s0 + $0x138] sm:$0xff]  ;;  %v571_v41 = vld [vmem:[%s1301_s0 + $0x140] sm:$0xff]  ;;  %v580_v43 = vsel %vm79_vm1, %v539_v33, 0.0  ;;  %v584_v44 = vsel %vm79_vm1, %v544_v34, 0.0 }
   0x8   :  { %1323 = vst [vmem:[#allocation4_spill] sm:$0xff] %v561_v39  ;;  %v576_v42 = vld [vmem:[%s1301_s0 + $0x148] sm:$0xff]  ;;  %1324 = vst [vmem:[#allocation5_spill] sm:$0xff] %v580_v43  ;;  %v588_v45 = vsel %vm79_vm1, %v549_v35, 0.0  ;;  %v593_v46 = vld [vmem:[%s1301_s0 + $0x150] sm:$0xff]  ;;  %v607_v50 = vsel %vm79_vm1, %v566_v40, 0.0 }
   0x9   :  { %v88_v17 = vadd.f32 %v87_v12, %v86_v14  ;;  %1325 = vst [vmem:[#allocation6_spill] sm:$0xff] %v584_v44  ;;  %1326 = vst [vmem:[#allocation7_spill] sm:$0xff] %v588_v45  ;;  %v598_v47 = vld [vmem:[%s1301_s0 + $0x158] sm:$0xff]  ;;  %v603_v48 = vld [vmem:[%s1301_s0 + $0x160] sm:$0xff]  ;;  %v611_v51 = vsel %vm79_vm1, %v571_v41, 0.0  ;;  %v615_v52 = vsel %vm79_vm1, %v576_v42, 0.0  ;;  %v219_v45 = vmul.f32 %v448_v3, %v448_v3 }
   0xa   :  { %1327 = vst [vmem:[#allocation8_spill] sm:$0xff] %v607_v50  ;;  %1328 = vst [vmem:[#allocation9_spill] sm:$0xff] %v611_v51  ;;  %v620_v53 = vld [vmem:[%s1301_s0 + $0x168] sm:$0xff]  ;;  %v625_v54 = vld [vmem:[%s1301_s0 + $0x170] sm:$0xff]  ;;  %v634_v56 = vsel %vm79_vm1, %v593_v46, 0.0  ;;  %v638_v57 = vsel %vm79_vm1, %v598_v47, 0.0 }
   0xb   :  { %v90_v24 = vadd.f32 %v89_v15, %v88_v17  ;;  %1329 = vst [vmem:[#allocation10_spill] sm:$0xff] %v615_v52  ;;  %v630_v55 = vld [vmem:[%s1301_s0 + $0x178] sm:$0xff]  ;;  %1330 = vst [vmem:[#allocation11_spill] sm:$0xff] %v634_v56  ;;  %v642_v58 = vsel %vm79_vm1, %v603_v48, 0.0  ;;  %v647_v59 = vld [vmem:[%s1301_s0 + $0x180] sm:$0xff]  ;;  %v661_v63 = vsel %vm79_vm1, %v620_v53, 0.0 }
   0xc   :  { %1331 = vst [vmem:[#allocation12_spill] sm:$0xff] %v638_v57  ;;  %1332 = vst [vmem:[#allocation13_spill] sm:$0xff] %v642_v58  ;;  %v652_v60 = vld [vmem:[%s1301_s0 + $0x188] sm:$0xff]  ;;  %v657_v61 = vld [vmem:[%s1301_s0 + $0x190] sm:$0xff]  ;;  %v665_v0 = vsel %vm79_vm1, %v625_v54, 0.0  ;;  %v669_v4 = vsel %vm79_vm1, %v630_v55, 0.0 }
   0xd   :  { %v92_v36 = vadd.f32 %v91_v20, %v90_v24  ;;  %1333 = vst [vmem:[#allocation14_spill] sm:$0xff] %v661_v63  ;;  %1334 = vst [vmem:[#allocation15_spill] sm:$0xff] %v665_v0  ;;  %v674_v5 = vld [vmem:[%s1301_s0 + $0x198] sm:$0xff]  ;;  %v679_v6 = vld [vmem:[%s1301_s0 + $0x1a0] sm:$0xff]  ;;  %v688_v9 = vsel %vm79_vm1, %v647_v59, 0.0  ;;  %v692_v11 = vsel %vm79_vm1, %v652_v60, 0.0 }
   0xe   :  { %1335 = vst [vmem:[#allocation16_spill] sm:$0xff] %v669_v4  ;;  %v684_v8 = vld [vmem:[%s1301_s0 + $0x1a8] sm:$0xff]  ;;  %1336 = vst [vmem:[#allocation17_spill] sm:$0xff] %v688_v9  ;;  %v696_v12 = vsel %vm79_vm1, %v657_v61, 0.0  ;;  %v701_v14 = vld [vmem:[%s1301_s0 + $0x60] sm:$0xff] }
   0xf   :  { %v94_v49 = vadd.f32 %v93_v25, %v92_v36  ;;  %1337 = vst [vmem:[#allocation18_spill] sm:$0xff] %v692_v11  ;;  %1338 = vst [vmem:[#allocation19_spill] sm:$0xff] %v696_v12  ;;  %v706_v15 = vld [vmem:[%s1301_s0 + $0x1b0] sm:$0xff]  ;;  %v711_v17 = vld [vmem:[%s1301_s0 + $0x1b8] sm:$0xff]  ;;  %v720_v25 = vsel %vm79_vm1, %v674_v5, 0.0  ;;  %v728_v36 = vsel %vm79_vm1, %v684_v8, 0.0 }
  0x10   :  { %v716_v20 = vld [vmem:[%s1301_s0 + $0x1c0] sm:$0xff]  ;;  %1339 = vst [vmem:[#allocation20_spill] sm:$0xff] %v720_v25  ;;  %1341 = vst [vmem:[#allocation22_spill] sm:$0xff] %v728_v36  ;;  %v751_v36 = vsel %vm79_vm1, %v711_v17, 0.0  ;;  %v765_v11 = vld [vmem:[%s1301_s0 + $0x1e8] sm:$0xff] }
  0x11   :  { %v96_v62 = vadd.f32 %v95_v26, %v94_v49  ;;  %v724_v26 = vsel %vm79_vm1, %v679_v6, 0.0  ;;  %v733_v49 = vld [vmem:[%s1301_s0 + $0x1c8] sm:$0xff]  ;;  %1343 = vst [vmem:[#allocation24_spill] sm:$0xff] %v751_v36  ;;  %v755_v25 = vsel %vm79_vm1, %v716_v20, 0.0  ;;  %v760_v12 = vld [vmem:[%s1301_s0 + $0x1e0] sm:$0xff]  ;;  %v787_v0 = vld [vmem:[%s1301_s0 + $0x1f8] sm:$0xff] }
  0x12   :  { %1340 = vst [vmem:[#allocation21_spill] sm:$0xff] %v724_v26  ;;  %v747_v26 = vsel %vm79_vm1, %v706_v15, 0.0  ;;  %1344 = vst [vmem:[#allocation25_spill] sm:$0xff] %v755_v25  ;;  %v774_v9 = vsel %vm79_vm1, %v733_v49, 0.0  ;;  %v809_v58 = vsel %vm79_vm1, %v787_v0, 0.0  ;;  %v841_v56 = vld [vmem:[%s1301_s0 + $0x98] sm:$0xff] }
  0x13   :  { %v98_v24 = vadd.f32 %v97_v30, %v96_v62  ;;  %v738_v30 = vld [vmem:[%s1301_s0 + $0x1d0] sm:$0xff]  ;;  %v743_v62 = vld [vmem:[%s1301_s0 + $0x1d8] sm:$0xff]  ;;  %1342 = vst [vmem:[#allocation23_spill] sm:$0xff] %v747_v26  ;;  %1346 = vst [vmem:[#allocation27_spill] sm:$0xff] %v774_v9  ;;  %v797_v9 = vsel %vm79_vm1, %v765_v11, 0.0  ;;  %v117_v3 = vsel %vm79_vm1, %v841_v56, 0.0 }
  0x14   :  { %v770_v26 = vld [vmem:[%s1301_s0 + $0x1f0] sm:$0xff]  ;;  %v778_v25 = vsel %vm79_vm1, %v738_v30, 0.0  ;;  %v782_v4 = vsel %vm79_vm1, %v743_v62, 0.0  ;;  %1349 = vst [vmem:[#allocation30_spill] sm:$0xff] %v787_v0  ;;  %1351 = vst [vmem:[#allocation32_spill] sm:$0xff] %v797_v9  ;;  %v846_v52 = vld [vmem:[%s1301_s0 + $0xa0] sm:$0xff] }
  0x15   :  { %1345 = vst [vmem:[#allocation26_spill] sm:$0xff] %v770_v26  ;;  %v100_v36 = vadd.f32 %v99_v31, %v98_v24  ;;  %1347 = vst [vmem:[#allocation28_spill] sm:$0xff] %v778_v25  ;;  %v103_v31 = vsel %vm79_vm1, %v701_v14, 0.0  ;;  %v793_v24 = vsel %vm79_vm1, %v760_v12, 0.0  ;;  %v801_v25 = vsel %vm79_vm1, %v770_v26, 0.0  ;;  %v28_v9 = vld [vmem:[%s1301_s0 + $0x70] sm:$0xff] }
  0x16   :  { %1348 = vst [vmem:[#allocation29_spill] sm:$0xff] %v782_v4  ;;  %1350 = vst [vmem:[#allocation31_spill] sm:$0xff] %v793_v24  ;;  %v27_v4 = vld [vmem:[%s1301_s0 + $0x68] sm:$0xff]  ;;  %v862_v43 = vld [vmem:[%s1301_s0 + $0xb0] sm:$0xff] }
  0x17   :  { %1352 = vst [vmem:[#allocation33_spill] sm:$0xff] %v801_v25  ;;  %v102_v63 = vadd.f32 %v534_v32, %v100_v36  ;;  %1353 = vst [vmem:[#allocation34_spill] sm:$0xff] %v809_v58  ;;  %v105_v24 = vsel %vm79_vm1, %v27_v4, 0.0  ;;  %v818_v25 = vld [vmem:[%s1301_s0 + $0x78] sm:$0xff]  ;;  %v823_v32 = vld [vmem:[%s1301_s0 + $0x80] sm:$0xff]  ;;  %v107_v58 = vsel %vm79_vm1, %v28_v9, 0.0 }
  0x18   :  { %1354 = vst [vmem:[#allocation35_spill] sm:$0xff] %v818_v25  ;;  %1355 = vst [vmem:[#allocation36_spill] sm:$0xff] %v823_v32  ;;  %v828_v36 = vld [vmem:[%s1301_s0 + $0x88] sm:$0xff]  ;;  %v109_v50 = vsel %vm79_vm1, %v818_v25, 0.0  ;;  %v875_v39 = vld [vmem:[%s1301_s0 + $0xb8] sm:$0xff] }
  0x19   :  { %v104_v57 = vadd.f32 %v103_v31, %v102_v63  ;;  %1356 = vst [vmem:[#allocation37_spill] sm:$0xff] %v828_v36  ;;  %v217_v63 = vmul.f32 %v438_v1, %v438_v1  ;;  %v836_v31 = vld [vmem:[%s1301_s0 + $0x90] sm:$0xff]  ;;  %1358 = vst [vmem:[#allocation39_spill] sm:$0xff] %v841_v56  ;;  %v218_v1 = vmul.f32 %v443_v2, %v443_v2  ;;  %v857_v44 = vld [vmem:[%s1301_s0 + $0xa8] sm:$0xff] }
  0x1a   :  { %1357 = vst [vmem:[#allocation38_spill] sm:$0xff] %v836_v31  ;;  %1359 = vst [vmem:[#allocation40_spill] sm:$0xff] %v846_v52  ;;  %v115_v2 = vsel %vm79_vm1, %v836_v31, 0.0  ;;  %v880_v38 = vld [vmem:[%s1301_s0 + $0xc0] sm:$0xff]  ;;  %v885_v37 = vld [vmem:[%s1301_s0 + $0xc8] sm:$0xff]  ;;  %v119_v31 = vsel %vm79_vm1, %v846_v52, 0.0 }
  0x1b   :  { %v106_v51 = vadd.f32 %v105_v24, %v104_v57  ;;  %1360 = vst [vmem:[#allocation41_spill] sm:$0xff] %v857_v44  ;;  %1361 = vst [vmem:[#allocation42_spill] sm:$0xff] %v862_v43  ;;  %v111_v57 = vsel %vm79_vm1, %v823_v32, 0.0  ;;  %v113_v24 = vsel %vm79_vm1, %v828_v36, 0.0  ;;  %v121_v56 = vsel %vm79_vm1, %v857_v44, 0.0  ;;  %v896_v25 = vld [vmem:[%s1301_s0 + $0xd0] sm:$0xff] }
  0x1c   :  { %1362 = vst [vmem:[#allocation43_spill] sm:$0xff] %v875_v39  ;;  %1363 = vst [vmem:[#allocation44_spill] sm:$0xff] %v880_v38  ;;  %v220_v32 = vmul.f32 %v459_v7, %v459_v7  ;;  %v901_v0 = vld [vmem:[%s1301_s0 + $0xd8] sm:$0xff]  ;;  %v913_v7 = vsel %vm79_vm1, %v880_v38, 0.0  ;;  %v917_v44 = vsel %vm79_vm1, %v885_v37, 0.0  ;;  %v922_v52 = vld [vmem:[%s1301_s0 + $0xe0] sm:$0xff] }
  0x1d   :  { %1364 = vst [vmem:[#allocation45_spill] sm:$0xff] %v885_v37  ;;  %v108_v36 = vadd.f32 %v107_v58, %v106_v51  ;;  %1365 = vst [vmem:[#allocation46_spill] sm:$0xff] %v896_v25  ;;  %v905_v51 = vsel %vm79_vm1, %v862_v43, 0.0  ;;  %v909_v58 = vsel %vm79_vm1, %v875_v39, 0.0  ;;  %v927_v43 = vld [vmem:[%s1301_s0 + $0xe8] sm:$0xff]  ;;  %v932_v39 = vld [vmem:[%s1301_s0 + $0xf0] sm:$0xff] }
  0x1e   :  { %1366 = vst [vmem:[#allocation47_spill] sm:$0xff] %v901_v0  ;;  %1367 = vst [vmem:[#allocation48_spill] sm:$0xff] %v909_v58  ;;  %v936_v37 = vsel %vm79_vm1, %v896_v25, 0.0  ;;  %v946_v58 = vsel %vm79_vm1, %v922_v52, 0.0  ;;  %v950_v26 = vsel %vm79_vm1, %v927_v43, 0.0  ;;  %v223_v25 = vmul.f32 %v480_v16, %v480_v16 }
  0x1f   :  { %1368 = vst [vmem:[#allocation49_spill] sm:$0xff] %v913_v7  ;;  %1369 = vst [vmem:[#allocation50_spill] sm:$0xff] %v917_v44  ;;  %v110_v38 = vadd.f32 %v109_v50, %v108_v36  ;;  %v940_v44 = vsel %vm79_vm1, %v901_v0, 0.0  ;;  %v221_v7 = vmul.f32 %v466_v10, %v466_v10  ;;  %v954_v50 = vsel %vm79_vm1, %v932_v39, 0.0 }
  0x20   :  { %1370 = vst [vmem:[#allocation51_spill] sm:$0xff] %v922_v52  ;;  %1371 = vst [vmem:[#allocation52_spill] sm:$0xff] %v927_v43  ;;  %v222_v36 = vmul.f32 %v473_v13, %v473_v13  ;;  %v224_v10 = vmul.f32 %v485_v18, %v485_v18  ;;  %v225_v52 = vmul.f32 %v490_v19, %v490_v19 }
  0x21   :  { %1372 = vst [vmem:[#allocation53_spill] sm:$0xff] %v932_v39  ;;  %1373 = vst [vmem:[#allocation54_spill] sm:$0xff] %v954_v50  ;;  %v112_v0 = vadd.f32 %v111_v57, %v110_v38  ;;  %v226_v43 = vmul.f32 %v497_v21, %v497_v21  ;;  %v227_v39 = vmul.f32 %v502_v22, %v502_v22 }
  0x22   :  { %v228_v50 = vmul.f32 %v507_v23, %v507_v23  ;;  %v229_v13 = vmul.f32 %v701_v14, %v701_v14  ;;  %v972_v16 = vmul.f32 %v27_v4, %v27_v4  ;;  %v974_v57 = vmul.f32 %v28_v9, %v28_v9 }
  0x23   :  { %v114_v38 = vadd.f32 %v113_v24, %v112_v0  ;;  %v250_v18 = vmul.f32 %v516_v27, %v516_v27  ;;  %v251_v19 = vmul.f32 %v521_v28, %v521_v28  ;;  %v252_v21 = vmul.f32 %v526_v29, %v526_v29 }
  0x24   :  { %v253_v22 = vmul.f32 %v539_v33, %v539_v33  ;;  %v254_v23 = vmul.f32 %v544_v34, %v544_v34  ;;  %v255_v4 = vmul.f32 %v549_v35, %v549_v35  ;;  %v256_v9 = vmul.f32 %v566_v40, %v566_v40 }
  0x25   :  { %v116_v0 = vadd.f32 %v115_v2, %v114_v38  ;;  %v257_v27 = vmul.f32 %v571_v41, %v571_v41  ;;  %v258_v28 = vmul.f32 %v576_v42, %v576_v42  ;;  %v259_v29 = vmul.f32 %v593_v46, %v593_v46  ;;  %v1374_v38 = vld [vmem:[#allocation26_spill] sm:$0xff] }
  0x26   :  { %v260_v33 = vmul.f32 %v598_v47, %v598_v47  ;;  %v281_v34 = vsel %vm79_vm1, %v217_v63, 0.0  ;;  %v261_v35 = vmul.f32 %v603_v48, %v603_v48  ;;  %v282_v40 = vsel %vm79_vm1, %v218_v1, 0.0 }
  0x27   :  { %v118_v14 = vadd.f32 %v117_v3, %v116_v0  ;;  %v284_v24 = vsel %vm79_vm1, %v219_v45, 0.0  ;;  %v262_v41 = vmul.f32 %v620_v53, %v620_v53  ;;  %v263_v42 = vmul.f32 %v625_v54, %v625_v54 }
  0x28   :  { %v264_v46 = vmul.f32 %v630_v55, %v630_v55  ;;  %v283_v47 = vadd.f32 %v282_v40, %v281_v34  ;;  %v265_v63 = vmul.f32 %v647_v59, %v647_v59  ;;  %v266_v48 = vmul.f32 %v652_v60, %v652_v60  ;;  %v1375_v34 = vld [vmem:[#allocation48_spill] sm:$0xff] }
  0x29   :  { %v120_v2 = vadd.f32 %v119_v31, %v118_v14  ;;  %v286_v1 = vsel %vm79_vm1, %v220_v32, 0.0  ;;  %v267_v45 = vmul.f32 %v657_v61, %v657_v61  ;;  %v268_v53 = vmul.f32 %v674_v5, %v674_v5  ;;  %v1376_v14 = vld [vmem:[#allocation30_spill] sm:$0xff] }
  0x2a   :  { %v269_v54 = vmul.f32 %v679_v6, %v679_v6  ;;  %v285_v55 = vadd.f32 %v284_v24, %v283_v47  ;;  %v270_v31 = vmul.f32 %v684_v8, %v684_v8  ;;  %v271_v59 = vmul.f32 %v706_v15, %v706_v15  ;;  %v1377_v47 = vld [vmem:[#allocation49_spill] sm:$0xff] }
  0x2b   :  { %v122_v3 = vadd.f32 %v121_v56, %v120_v2  ;;  %v288_v60 = vsel %vm79_vm1, %v221_v7, 0.0  ;;  %v272_v32 = vmul.f32 %v711_v17, %v711_v17  ;;  %v273_v61 = vmul.f32 %v716_v20, %v716_v20 }
  0x2c   :  { %v274_v5 = vmul.f32 %v733_v49, %v733_v49  ;;  %v287_v6 = vadd.f32 %v286_v1, %v285_v55  ;;  %v275_v8 = vmul.f32 %v738_v30, %v738_v30  ;;  %v276_v15 = vmul.f32 %v743_v62, %v743_v62 }
  0x2d   :  { %v124_v56 = vadd.f32 %v905_v51, %v122_v3  ;;  %v290_v7 = vsel %vm79_vm1, %v222_v36, 0.0  ;;  %v277_v17 = vmul.f32 %v760_v12, %v760_v12  ;;  %v278_v20 = vmul.f32 %v765_v11, %v765_v11 }
  0x2e   :  { %v279_v49 = vmul.f32 %v1374_v38, %v1374_v38  ;;  %v289_v0 = vadd.f32 %v288_v60, %v287_v6  ;;  %v280_v30 = vmul.f32 %v1376_v14, %v1376_v14  ;;  %v292_v40 = vsel %vm79_vm1, %v223_v25, 0.0  ;;  %v1380_v14 = vld [vmem:[#allocation35_spill] sm:$0xff] }
  0x2f   :  { %v126_v51 = vadd.f32 %v1375_v34, %v124_v56  ;;  %v294_v62 = vsel %vm79_vm1, %v224_v10, 0.0  ;;  %v296_v24 = vsel %vm79_vm1, %v225_v52, 0.0  ;;  %v298_v12 = vsel %vm79_vm1, %v226_v43, 0.0  ;;  %v1162_v34 = vld [vmem:[%s1301_s0 + $0x100] sm:$0xff] }
  0x30   :  { %v291_v36 = vadd.f32 %v290_v7, %v289_v0  ;;  %v300_v11 = vsel %vm79_vm1, %v227_v39, 0.0  ;;  %v302_v1 = vsel %vm79_vm1, %v228_v50, 0.0  ;;  %v304_v55 = vsel %vm79_vm1, %v229_v13, 0.0  ;;  %v1378_v39 = vld [vmem:[#allocation50_spill] sm:$0xff] }
  0x31   :  { %v128_v2 = vadd.f32 %v1377_v47, %v126_v51  ;;  %v1055_v3 = vsel %vm79_vm1, %v250_v18, 0.0  ;;  %v1058_v25 = vsel %vm79_vm1, %v251_v19, 0.0  ;;  %v1061_v10 = vsel %vm79_vm1, %v252_v21, 0.0  ;;  %v1379_v51 = vld [vmem:[#allocation54_spill] sm:$0xff] }
  0x32   :  { %v293_v60 = vadd.f32 %v292_v40, %v291_v36  ;;  %v1064_v43 = vsel %vm79_vm1, %v253_v22, 0.0  ;;  %v1068_v6 = vsel %vm79_vm1, %v254_v23, 0.0  ;;  %v1071_v50 = vsel %vm79_vm1, %v255_v4, 0.0  ;;  %v1381_v36 = vld [vmem:[#allocation36_spill] sm:$0xff] }
  0x33   :  { %v130_v52 = vadd.f32 %v1378_v39, %v128_v2  ;;  %v1074_v13 = vsel %vm79_vm1, %v256_v9, 0.0  ;;  %v1077_v19 = vsel %vm79_vm1, %v257_v27, 0.0  ;;  %v1080_v21 = vsel %vm79_vm1, %v258_v28, 0.0  ;;  %v1382_v2 = vld [vmem:[#allocation37_spill] sm:$0xff] }
  0x34   :  { %v295_v18 = vadd.f32 %v294_v62, %v293_v60  ;;  %v1083_v22 = vsel %vm79_vm1, %v259_v29, 0.0  ;;  %v1087_v23 = vsel %vm79_vm1, %v260_v33, 0.0  ;;  %v1090_v4 = vsel %vm79_vm1, %v261_v35, 0.0 }
  0x35   :  { %v132_v56 = vadd.f32 %v936_v37, %v130_v52  ;;  %v1093_v9 = vsel %vm79_vm1, %v262_v41, 0.0  ;;  %v1096_v27 = vsel %vm79_vm1, %v263_v42, 0.0  ;;  %v1099_v28 = vsel %vm79_vm1, %v264_v46, 0.0 }
  0x36   :  { %v297_v7 = vadd.f32 %v296_v24, %v295_v18  ;;  %v1102_v29 = vsel %vm79_vm1, %v265_v63, 0.0  ;;  %v1106_v33 = vsel %vm79_vm1, %v266_v48, 0.0  ;;  %v1109_v35 = vsel %vm79_vm1, %v267_v45, 0.0  ;;  %v1384_v18 = vld [vmem:[#allocation38_spill] sm:$0xff] }
  0x37   :  { %v134_v37 = vadd.f32 %v940_v44, %v132_v56  ;;  %v1112_v41 = vsel %vm79_vm1, %v268_v53, 0.0  ;;  %v1115_v42 = vsel %vm79_vm1, %v269_v54, 0.0  ;;  %v1118_v46 = vsel %vm79_vm1, %v270_v31, 0.0 }
  0x38   :  { %v299_v38 = vadd.f32 %v298_v12, %v297_v7  ;;  %v1121_v63 = vsel %vm79_vm1, %v271_v59, 0.0  ;;  %v1125_v48 = vsel %vm79_vm1, %v272_v32, 0.0  ;;  %v1128_v45 = vsel %vm79_vm1, %v273_v61, 0.0 }
  0x39   :  { %v136_v44 = vadd.f32 %v946_v58, %v134_v37  ;;  %v1131_v53 = vsel %vm79_vm1, %v274_v5, 0.0  ;;  %v1134_v54 = vsel %vm79_vm1, %v275_v8, 0.0  ;;  %v1137_v31 = vsel %vm79_vm1, %v276_v15, 0.0  ;;  %v1145_v58 = vld [vmem:[%s1301_s0 + $0xf8] sm:$0xff]  ;;  %v1385_v37 = vld [vmem:[#allocation3_spill] sm:$0xff] }
  0x3a   :  { %v301_v0 = vadd.f32 %v300_v11, %v299_v38  ;;  %v1140_v59 = vsel %vm79_vm1, %v277_v17, 0.0  ;;  %v1149_v61 = vsel %vm79_vm1, %v278_v20, 0.0  ;;  %v1152_v5 = vsel %vm79_vm1, %v279_v49, 0.0 }
  0x3b   :  { %v138_v32 = vadd.f32 %v950_v26, %v136_v44  ;;  %v1155_v8 = vsel %vm79_vm1, %v280_v30, 0.0  ;;  %v141_v15 = vsel %vm79_vm1, %v1145_v58, 0.0  ;;  %v232_v20 = vmul.f32 %v1380_v14, %v1380_v14  ;;  %v1386_v44 = vld [vmem:[#allocation39_spill] sm:$0xff] }
  0x3c   :  { %v303_v17 = vadd.f32 %v302_v1, %v301_v0  ;;  %v306_v49 = vsel %vm79_vm1, %v972_v16, 0.0  ;;  %v143_v30 = vsel %vm79_vm1, %v1162_v34, 0.0  ;;  %v233_v24 = vmul.f32 %v1381_v36, %v1381_v36  ;;  %v1383_v16 = vld [vmem:[#allocation2_spill] sm:$0xff] }
  0x3d   :  { %v140_v26 = vadd.f32 %v1379_v51, %v138_v32  ;;  %v308_v12 = vsel %vm79_vm1, %v974_v57, 0.0  ;;  %v234_v1 = vmul.f32 %v1382_v2, %v1382_v2  ;;  %v310_v60 = vsel %vm79_vm1, %v232_v20, 0.0  ;;  %v1388_v51 = vld [vmem:[#allocation40_spill] sm:$0xff] }
  0x3e   :  { %v305_v40 = vadd.f32 %v304_v55, %v303_v17  ;;  %v235_v55 = vmul.f32 %v1384_v18, %v1384_v18  ;;  %v312_v56 = vsel %vm79_vm1, %v233_v24, 0.0  ;;  %v236_v57 = vmul.f32 %v1386_v44, %v1386_v44 }
  0x3f   :  { %v142_v62 = vadd.f32 %v141_v15, %v140_v26  ;;  %v314_v0 = vsel %vm79_vm1, %v234_v1, 0.0  ;;  %v1387_v15 = vld [vmem:[#allocation4_spill] sm:$0xff]  ;;  %v237_v26 = vmul.f32 %v1388_v51, %v1388_v51 }
  0x40   :  { %v307_v11 = vadd.f32 %v306_v49, %v305_v40  ;;  %v316_v14 = vsel %vm79_vm1, %v235_v55, 0.0  ;;  %v1389_v49 = vld [vmem:[#allocation5_spill] sm:$0xff]  ;;  %v318_v36 = vsel %vm79_vm1, %v236_v57, 0.0 }
  0x41   :  { %v144_v47 = vadd.f32 %v143_v30, %v142_v62  ;;  %v1390_v40 = vld [vmem:[#allocation41_spill] sm:$0xff]  ;;  %v320_v1 = vsel %vm79_vm1, %v237_v26, 0.0 }
  0x42   :  { %v309_v39 = vadd.f32 %v308_v12, %v307_v11  ;;  %v238_v62 = vmul.f32 %v1390_v40, %v1390_v40  ;;  %v1391_v12 = vld [vmem:[#allocation6_spill] sm:$0xff] }
  0x43   :  { %v146_v52 = vadd.f32 %v1383_v16, %v144_v47  ;;  %v1392_v47 = vld [vmem:[#allocation42_spill] sm:$0xff] }
  0x44   :  { %v311_v7 = vadd.f32 %v310_v60, %v309_v39  ;;  %v239_v2 = vmul.f32 %v1392_v47, %v1392_v47  ;;  %v1393_v39 = vld [vmem:[#allocation7_spill] sm:$0xff]  ;;  %v322_v55 = vsel %vm79_vm1, %v238_v62, 0.0 }
  0x45   :  { %v148_v38 = vadd.f32 %v1385_v37, %v146_v52  ;;  %v1394_v52 = vld [vmem:[#allocation43_spill] sm:$0xff] }
  0x46   :  { %v313_v32 = vadd.f32 %v312_v56, %v311_v7  ;;  %v240_v18 = vmul.f32 %v1394_v52, %v1394_v52  ;;  %v1395_v7 = vld [vmem:[#allocation8_spill] sm:$0xff]  ;;  %v324_v57 = vsel %vm79_vm1, %v239_v2, 0.0 }
  0x47   :  { %v150_v17 = vadd.f32 %v1387_v15, %v148_v38  ;;  %v1396_v38 = vld [vmem:[#allocation44_spill] sm:$0xff] }
  0x48   :  { %v315_v20 = vadd.f32 %v314_v0, %v313_v32  ;;  %v241_v44 = vmul.f32 %v1396_v38, %v1396_v38  ;;  %v1397_v32 = vld [vmem:[#allocation9_spill] sm:$0xff]  ;;  %v326_v26 = vsel %vm79_vm1, %v240_v18, 0.0 }
  0x49   :  { %v152_v30 = vadd.f32 %v1389_v49, %v150_v17  ;;  %v1398_v17 = vld [vmem:[#allocation45_spill] sm:$0xff] }
  0x4a   :  { %v317_v24 = vadd.f32 %v316_v14, %v315_v20  ;;  %v242_v51 = vmul.f32 %v1398_v17, %v1398_v17  ;;  %v1399_v20 = vld [vmem:[#allocation10_spill] sm:$0xff]  ;;  %v328_v62 = vsel %vm79_vm1, %v241_v44, 0.0 }
  0x4b   :  { %v154_v11 = vadd.f32 %v1391_v12, %v152_v30  ;;  %v1400_v30 = vld [vmem:[#allocation46_spill] sm:$0xff] }
  0x4c   :  { %v319_v60 = vadd.f32 %v318_v36, %v317_v24  ;;  %v243_v40 = vmul.f32 %v1400_v30, %v1400_v30  ;;  %v1401_v24 = vld [vmem:[#allocation11_spill] sm:$0xff]  ;;  %v330_v2 = vsel %vm79_vm1, %v242_v51, 0.0 }
  0x4d   :  { %v156_v16 = vadd.f32 %v1393_v39, %v154_v11  ;;  %v1402_v11 = vld [vmem:[#allocation47_spill] sm:$0xff] }
  0x4e   :  { %v321_v56 = vadd.f32 %v320_v1, %v319_v60  ;;  %v244_v47 = vmul.f32 %v1402_v11, %v1402_v11  ;;  %v1403_v60 = vld [vmem:[#allocation12_spill] sm:$0xff]  ;;  %v332_v18 = vsel %vm79_vm1, %v243_v40, 0.0 }
  0x4f   :  { %v158_v37 = vadd.f32 %v1395_v7, %v156_v16  ;;  %v1404_v16 = vld [vmem:[#allocation51_spill] sm:$0xff] }
  0x50   :  { %v323_v0 = vadd.f32 %v322_v55, %v321_v56  ;;  %v245_v52 = vmul.f32 %v1404_v16, %v1404_v16  ;;  %v1405_v56 = vld [vmem:[#allocation13_spill] sm:$0xff]  ;;  %v334_v44 = vsel %vm79_vm1, %v244_v47, 0.0 }
  0x51   :  { %v160_v15 = vadd.f32 %v1397_v32, %v158_v37  ;;  %v1406_v37 = vld [vmem:[#allocation52_spill] sm:$0xff]  ;;  %v1411_v47 = vld [vmem:[#allocation17_spill] sm:$0xff] }
  0x52   :  { %v325_v14 = vadd.f32 %v324_v57, %v323_v0  ;;  %v246_v38 = vmul.f32 %v1406_v37, %v1406_v37  ;;  %v1407_v0 = vld [vmem:[#allocation14_spill] sm:$0xff]  ;;  %v336_v51 = vsel %vm79_vm1, %v245_v52, 0.0 }
  0x53   :  { %v162_v49 = vadd.f32 %v1399_v20, %v160_v15  ;;  %v1408_v15 = vld [vmem:[#allocation53_spill] sm:$0xff] }
  0x54   :  { %v327_v36 = vadd.f32 %v326_v26, %v325_v14  ;;  %v247_v17 = vmul.f32 %v1408_v15, %v1408_v15  ;;  %v1409_v14 = vld [vmem:[#allocation15_spill] sm:$0xff]  ;;  %v338_v30 = vsel %vm79_vm1, %v246_v38, 0.0  ;;  %v1415_v38 = vld [vmem:[#allocation21_spill] sm:$0xff] }
  0x55   :  { %v164_v12 = vadd.f32 %v1401_v24, %v162_v49  ;;  %v248_v49 = vmul.f32 %v1145_v58, %v1145_v58  ;;  %v249_v24 = vmul.f32 %v1162_v34, %v1162_v34 }
  0x56   :  { %v329_v1 = vadd.f32 %v328_v62, %v327_v36  ;;  %v1410_v62 = vld [vmem:[#allocation16_spill] sm:$0xff] }
  0x57   :  { %v166_v39 = vadd.f32 %v1403_v60, %v164_v12  ;;  %v340_v12 = vsel %vm79_vm1, %v247_v17, 0.0  ;;  %v344_v58 = vsel %vm79_vm1, %v249_v24, 0.0  ;;  %v1417_v17 = vld [vmem:[#allocation23_spill] sm:$0xff]  ;;  %v1421_v24 = vld [vmem:[#allocation28_spill] sm:$0xff] }
  0x58   :  { %v331_v55 = vadd.f32 %v330_v2, %v329_v1  ;;  %v342_v1 = vsel %vm79_vm1, %v248_v49, 0.0 }
  0x59   :  { %v168_v7 = vadd.f32 %v1405_v56, %v166_v39  ;;  %v1412_v39 = vld [vmem:[#allocation18_spill] sm:$0xff] }
  0x5a   :  { %v333_v57 = vadd.f32 %v332_v18, %v331_v55  ;;  %v1413_v18 = vld [vmem:[#allocation19_spill] sm:$0xff] }
  0x5b   :  { %v170_v32 = vadd.f32 %v1407_v0, %v168_v7  ;;  %v1414_v7 = vld [vmem:[#allocation20_spill] sm:$0xff]  ;;  %v1416_v0 = vld [vmem:[#allocation22_spill] sm:$0xff] }
  0x5c   :  { %v335_v26 = vadd.f32 %v334_v44, %v333_v57 }
  0x5d   :  { %v172_v20 = vadd.f32 %v1409_v14, %v170_v32  ;;  %v1418_v14 = vld [vmem:[#allocation24_spill] sm:$0xff] }
  0x5e   :  { %v337_v40 = vadd.f32 %v336_v51, %v335_v26 }
  0x5f   :  { %v174_v36 = vadd.f32 %v1410_v62, %v172_v20  ;;  %v1420_v62 = vld [vmem:[#allocation27_spill] sm:$0xff] }
  0x60   :  { %v339_v11 = vadd.f32 %v338_v30, %v337_v40  ;;  %v1419_v30 = vld [vmem:[#allocation25_spill] sm:$0xff] }
  0x61   :  { %v176_v2 = vadd.f32 %v1411_v47, %v174_v36 }
  0x62   :  { %v341_v60 = vadd.f32 %v340_v12, %v339_v11  ;;  %v1422_v11 = vld [vmem:[#allocation29_spill] sm:$0xff] }
  0x63   :  { %v178_v16 = vadd.f32 %v1412_v39, %v176_v2  ;;  %v1423_v2 = vld [vmem:[#allocation31_spill] sm:$0xff] }
  0x64   :  { %v343_v52 = vadd.f32 %v342_v1, %v341_v60  ;;  %v1424_v60 = vld [vmem:[#allocation32_spill] sm:$0xff] }
  0x65   :  { %v180_v55 = vadd.f32 %v1413_v18, %v178_v16  ;;  %v1425_v16 = vld [vmem:[#allocation33_spill] sm:$0xff] }
  0x66   :  { %v345_v56 = vadd.f32 %v344_v58, %v343_v52  ;;  %v1426_v52 = vld [vmem:[#allocation34_spill] sm:$0xff] }
  0x67   :  { %v182_v37 = vadd.f32 %v1414_v7, %v180_v55 }
  0x68   :  { %v347_v34 = vadd.f32 %v1055_v3, %v345_v56 }
  0x69   :  { %v184_v44 = vadd.f32 %v1415_v38, %v182_v37 }
  0x6a   :  { %v349_v57 = vadd.f32 %v1058_v25, %v347_v34 }
  0x6b   :  { %v186_v32 = vadd.f32 %v1416_v0, %v184_v44 }
  0x6c   :  { %v351_v15 = vadd.f32 %v1061_v10, %v349_v57 }
  0x6d   :  { %v188_v51 = vadd.f32 %v1417_v17, %v186_v32 }
  0x6e   :  { %v353_v26 = vadd.f32 %v1064_v43, %v351_v15 }
  0x6f   :  { %v190_v20 = vadd.f32 %v1418_v14, %v188_v51 }
  0x70   :  { %v355_v49 = vadd.f32 %v1068_v6, %v353_v26 }
  0x71   :  { %v192_v40 = vadd.f32 %v1419_v30, %v190_v20 }
  0x72   :  { %v357_v3 = vadd.f32 %v1071_v50, %v355_v49 }
  0x73   :  { %v194_v36 = vadd.f32 %v1420_v62, %v192_v40 }
  0x74   :  { %v359_v25 = vadd.f32 %v1074_v13, %v357_v3 }
  0x75   :  { %v196_v12 = vadd.f32 %v1421_v24, %v194_v36 }
  0x76   :  { %v361_v10 = vadd.f32 %v1077_v19, %v359_v25 }
  0x77   :  { %v198_v47 = vadd.f32 %v1422_v11, %v196_v12 }
  0x78   :  { %v363_v43 = vadd.f32 %v1080_v21, %v361_v10 }
  0x79   :  { %v200_v1 = vadd.f32 %v1423_v2, %v198_v47 }
  0x7a   :  { %v365_v6 = vadd.f32 %v1083_v22, %v363_v43 }
  0x7b   :  { %v202_v39 = vadd.f32 %v1424_v60, %v200_v1 }
  0x7c   :  { %v367_v50 = vadd.f32 %v1087_v23, %v365_v6 }
  0x7d   :  { %v204_v58 = vadd.f32 %v1425_v16, %v202_v39 }
  0x7e   :  { %v369_v13 = vadd.f32 %v1090_v4, %v367_v50  ;;  %v78_v4 = vld [vmem:[%s1302_s1] sm:$0x1] }
  0x7f   :  { %v206_v18 = vadd.f32 %v1426_v52, %v204_v58 }
  0x80   :  { %v371_v19 = vadd.f32 %v1093_v9, %v369_v13 }
  0x81   :  { %v207_v55 = vrot.slane %v206_v18, 4 }
  0x82   :  { %v373_v56 = vadd.f32 %v1096_v27, %v371_v19 }
  0x83   :  { %v208_v21 = vadd.f32 %v207_v55, %v206_v18 }
  0x84   :  { %v375_v7 = vadd.f32 %v1099_v28, %v373_v56 }
  0x85   :  { %v209_v37 = vrot.slane %v208_v21, 2 }
  0x86   :  { %v377_v22 = vadd.f32 %v1102_v29, %v375_v7 }
  0x87   :  { %v210_v34 = vadd.f32 %v209_v37, %v208_v21 }
  0x88   :  { %v379_v23 = vadd.f32 %v1106_v33, %v377_v22 }
  0x89   :  { %v211_v38 = vrot.slane %v210_v34, 1 }
  0x8a   :  { %v381_v44 = vadd.f32 %v1109_v35, %v379_v23 }
  0x8b   :  { %v212_v9 = vadd.f32 %v211_v38, %v210_v34 }
  0x8c   :  { %v383_v27 = vadd.f32 %v1112_v41, %v381_v44 }
  0x8d   :  { %v213_v57 = vadd.f32 %v212_v9, %v78_v4 }
  0x8e   :  { %v385_v28 = vadd.f32 %v1115_v42, %v383_v27 }
  0x8f   :  { %215 = vst.msk [vmem:[%s1302_s1] sm:$0x1] %vm214_vm2, %v213_v57 }
  0x90   :  { %v387_v29 = vadd.f32 %v1118_v46, %v385_v28 }
  0x92   :  { %v389_v33 = vadd.f32 %v1121_v63, %v387_v29 }
  0x94   :  { %v391_v0 = vadd.f32 %v1125_v48, %v389_v33 }
  0x96   :  { %v393_v35 = vadd.f32 %v1128_v45, %v391_v0  ;;  %v216_v45 = vld [vmem:[%s1302_s1 + $0x1] sm:$0x1] }
  0x98   :  { %v395_v32 = vadd.f32 %v1131_v53, %v393_v35 }
  0x9a   :  { %v397_v41 = vadd.f32 %v1134_v54, %v395_v32 }
  0x9c   :  { %v399_v15 = vadd.f32 %v1137_v31, %v397_v41 }
  0x9e   :  { %v401_v42 = vadd.f32 %v1140_v59, %v399_v15 }
  0xa0   :  { %v403_v17 = vadd.f32 %v1149_v61, %v401_v42 }
  0xa2   :  { %v405_v51 = vadd.f32 %v1152_v5, %v403_v17 }
  0xa4   :  { %v407_v46 = vadd.f32 %v1155_v8, %v405_v51 }
  0xa6   :  { %v408_v26 = vrot.slane %v407_v46, 4 }
  0xa8   :  { %v409_v63 = vadd.f32 %v408_v26, %v407_v46 }
  0xaa   :  { %v410_v14 = vrot.slane %v409_v63, 2 }
  0xac   :  { %v411_v48 = vadd.f32 %v410_v14, %v409_v63 }
  0xae   :  { %v412_v20 = vrot.slane %v411_v48, 1 }
  0xb0   :  { %v413_v53 = vadd.f32 %v412_v20, %v411_v48 }
  0xb2   :  { %v414_v54 = vadd.f32 %v413_v53, %v216_v45 }
  0xb4   :  { %415 = vst.msk [vmem:[%s1302_s1 + $0x1] sm:$0x1] %vm214_vm2, %v414_v54 }

// kernel: tile.78
= control target key start
LH: loop header
LB: loop body
LE: loop exit
PB: predicated region body
PF: predicated region fallthrough
CT: control target
= control target key end

     0   :  { %s22_s0 = inlined_call_operand.vmem [shape: f32[8], index: 0, kind: input, shape index: {}]   ;;  %s23_s1 = inlined_call_operand.vmem [shape: f32[4,8], index: 1, kind: output, shape index: {}]  }
   0x1   :  { %v4_v0 = vld [vmem:[%s22_s0] ss:$0 sm:$0xff] }
   0x2   :  { %5 = vst [vmem:[%s23_s1] sm:$0xf] %v4_v0 }

// kernel: tile.79
= control target key start
LH: loop header
LB: loop body
LE: loop exit
PB: predicated region body
PF: predicated region fallthrough
CT: control target
= control target key end

     0   :  { %vm8_vm0 = vcmask 64512   ;;  %s40_s8 = smov 8   ;;  %s41_s9 = smov 16   ;;  %vm14_vm1 = vcmask 261312   ;;  %vm20_vm2 = vcmask 195712   ;;  %vm26_vm3 = vcmask 130112   ;;  %s58_s0 = inlined_call_operand.vmem [shape: f32[4,8], index: 0, kind: input, shape index: {}]   ;;  %s59_s1 = inlined_call_operand.vmem [shape: f32[1,32], index: 1, kind: output, shape index: {}]  }
   0x1   :  { %v5_v0 = vld [vmem:[%s58_s0] sm:$0xf]  ;;  %s39_s0 = smov 24  }
   0x2   :  { %6 = vst [vmem:[#allocation1] sm:$0xf] %v5_v0 }
   0x9   :  { %v11_v1 = vld [vmem:[#allocation1 + $0x3] sm:$0x1]   ;;  %v23_v2 = vld [vmem:[#allocation1 + $0x1] sm:$0x1]   ;;  %v7_v3 = vld [vmem:[#allocation1] sm:$0x1]  }
   0xa   :  { %12 = vrot.lane.b32.xlu0 %v11_v1, %s39_s0  ;;  %24 = vrot.lane.b32.xlu1 %v23_v2, %s40_s8  ;;  %v17_v4 = vld [vmem:[#allocation1 + $0x2] sm:$0x1]   ;;  %9 = vst.msk [vmem:[#allocation0] sm:$0x1] %vm8_vm0, %v7_v3  }
   0xe   :  { %18 = vrot.lane.b32.xlu0 %v17_v4, %s41_s9 }
  0x7c   :  { %v13_v5 = vpop.permute.xlu0 %12   ;;  %v25_v6 = vpop.permute.xlu1 %24  }
  0x7d   :  { %15 = vst.msk [vmem:[#allocation0] sm:$0x1] %vm14_vm1, %v13_v5  }
  0x80   :  { %v19_v7 = vpop.permute.xlu0 %18  }
  0x81   :  { %21 = vst.msk [vmem:[#allocation0] sm:$0x1] %vm20_vm2, %v19_v7  }
  0x82   :  { %27 = vst.msk [vmem:[#allocation0] sm:$0x1] %vm26_vm3, %v25_v6  }
  0x89   :  { %v32_v8 = vld [vmem:[#allocation0] sm:$0x1] }
  0x8a   :  { %35 = vst [vmem:[%s59_s1] sm:$0x1] %v32_v8 }

// kernel: netG_forward.24
= control target key start
LH: loop header
LB: loop body
LE: loop exit
PB: predicated region body
PF: predicated region fallthrough
CT: control target
= control target key end

     0   :  { %vm540_vm0 = vcmask 257024   ;;  %s1345_s0 = inlined_call_operand.vmem [shape: f32[512,32], index: 0, kind: input, shape index: {}]   ;;  %s1346_s1 = inlined_call_operand.vmem [shape: f32[1,32], index: 1, kind: input, shape index: {}]   ;;  %s1347_s2 = inlined_call_operand.vmem [shape: f32[1,32], index: 2, kind: input, shape index: {}]   ;;  %s1348_s3 = inlined_call_operand.vmem [shape: bf16[512,32], index: 3, kind: output, shape index: {}]  }
   0x1   :  { %v14_v0 = vld [vmem:[%s1345_s0] sm:$0xff]  ;;  %v15_v4 = vld [vmem:[%s1345_s0 + $0x8] sm:$0xff]  ;;  %v16_v5 = vld [vmem:[%s1345_s0 + $0x10] sm:$0xff] }
   0x2   :  { %v765_v1 = vld [vmem:[%s1346_s1] ss:$0 sm:$0xff]  ;;  %v17_v6 = vld [vmem:[%s1345_s0 + $0x18] sm:$0xff]  ;;  %v19_v11 = vld [vmem:[%s1345_s0 + $0x28] sm:$0xff] }
   0x3   :  { %v770_v2 = vld [vmem:[%s1347_s2] ss:$0 sm:$0xff]  ;;  %v85_v3 = vmul.f32 %v765_v1, %v14_v0  ;;  %v86_v7 = vmul.f32 %v765_v1, %v15_v4  ;;  %v87_v8 = vmul.f32 %v765_v1, %v16_v5  ;;  %v88_v9 = vmul.f32 %v765_v1, %v17_v6  ;;  %v20_v12 = vld [vmem:[%s1345_s0 + $0x30] sm:$0xff]  ;;  %v21_v17 = vld [vmem:[%s1345_s0 + $0x38] sm:$0xff] }
   0x4   :  { %v18_v10 = vld [vmem:[%s1345_s0 + $0x20] sm:$0xff]  ;;  %v90_v15 = vmul.f32 %v765_v1, %v19_v11  ;;  %v91_v16 = vmul.f32 %v765_v1, %v20_v12  ;;  %v92_v21 = vmul.f32 %v765_v1, %v21_v17  ;;  %v23_v35 = vld [vmem:[%s1345_s0 + $0x48] sm:$0xff]  ;;  %v24_v36 = vld [vmem:[%s1345_s0 + $0x50] sm:$0xff] }
   0x5   :  { %v156_v13 = vadd.f32 %v770_v2, %v85_v3  ;;  %v89_v14 = vmul.f32 %v765_v1, %v18_v10  ;;  %v157_v18 = vadd.f32 %v770_v2, %v86_v7  ;;  %v158_v19 = vadd.f32 %v770_v2, %v87_v8  ;;  %v22_v30 = vld [vmem:[%s1345_s0 + $0x40] sm:$0xff]  ;;  %v25_v37 = vld [vmem:[%s1345_s0 + $0x58] sm:$0xff]  ;;  %v27_v43 = vld [vmem:[%s1345_s0 + $0x68] sm:$0xff] }
   0x6   :  { %v159_v20 = vadd.f32 %v770_v2, %v88_v9  ;;  %v161_v24 = vadd.f32 %v770_v2, %v90_v15  ;;  %v162_v25 = vadd.f32 %v770_v2, %v91_v16  ;;  %v163_v29 = vadd.f32 %v770_v2, %v92_v21  ;;  %v26_v42 = vld [vmem:[%s1345_s0 + $0x60] sm:$0xff]  ;;  %v28_v44 = vld [vmem:[%s1345_s0 + $0x70] sm:$0xff]  ;;  %v29_v49 = vld [vmem:[%s1345_s0 + $0x78] sm:$0xff] }
   0x7   :  { %v220_v22 = vmax.f32 %v156_v13, 0.0  ;;  %v160_v23 = vadd.f32 %v770_v2, %v89_v14  ;;  %v221_v26 = vmax.f32 %v157_v18, 0.0  ;;  %v222_v27 = vmax.f32 %v158_v19, 0.0  ;;  %v30_v8 = vld [vmem:[%s1345_s0 + $0x80] sm:$0xff]  ;;  %v31_v13 = vld [vmem:[%s1345_s0 + $0x88] sm:$0xff]  ;;  %v32_v14 = vld [vmem:[%s1345_s0 + $0x90] sm:$0xff] }
   0x8   :  { %v223_v28 = vmax.f32 %v159_v20, 0.0  ;;  %v225_v33 = vmax.f32 %v161_v24, 0.0  ;;  %v226_v34 = vmax.f32 %v162_v25, 0.0  ;;  %v227_v41 = vmax.f32 %v163_v29, 0.0  ;;  %v33_v15 = vld [vmem:[%s1345_s0 + $0x98] sm:$0xff]  ;;  %v34_v20 = vld [vmem:[%s1345_s0 + $0xa0] sm:$0xff] }
   0x9   :  { %v675_v31 = vpack.c.bf16 %v220_v22, %v220_v22  ;;  %v224_v32 = vmax.f32 %v160_v23, 0.0  ;;  %v676_v38 = vpack.c.bf16 %v221_v26, %v221_v26  ;;  %v677_v39 = vpack.c.bf16 %v222_v27, %v222_v27  ;;  %v35_v21 = vld [vmem:[%s1345_s0 + $0xa8] sm:$0xff]  ;;  %v36_v22 = vld [vmem:[%s1345_s0 + $0xb0] sm:$0xff]  ;;  %v37_v27 = vld [vmem:[%s1345_s0 + $0xb8] sm:$0xff] }
   0xa   :  { %v678_v40 = vpack.c.bf16 %v223_v28, %v223_v28  ;;  %v680_v46 = vpack.c.bf16 %v225_v33, %v225_v33  ;;  %v681_v47 = vpack.c.bf16 %v226_v34, %v226_v34  ;;  %v93_v48 = vmul.f32 %v765_v1, %v22_v30 }
   0xb   :  { %541 = vst.msk [vmem:[%s1348_s3] sm:$0xf] %vm540_vm0, %v675_v31  ;;  %v679_v45 = vpack.c.bf16 %v224_v32, %v224_v32  ;;  %542 = vst.msk [vmem:[%s1348_s3 + $0x4] sm:$0xf] %vm540_vm0, %v676_v38  ;;  %v682_v50 = vpack.c.bf16 %v227_v41, %v227_v41  ;;  %v94_v51 = vmul.f32 %v765_v1, %v23_v35 }
   0xc   :  { %543 = vst.msk [vmem:[%s1348_s3 + $0x8] sm:$0xf] %vm540_vm0, %v677_v39  ;;  %544 = vst.msk [vmem:[%s1348_s3 + $0xc] sm:$0xf] %vm540_vm0, %v678_v40  ;;  %v95_v52 = vmul.f32 %v765_v1, %v24_v36  ;;  %v96_v53 = vmul.f32 %v765_v1, %v25_v37  ;;  %v164_v54 = vadd.f32 %v770_v2, %v93_v48  ;;  %v38_v48 = vld [vmem:[%s1345_s0 + $0xc0] sm:$0xff] }
   0xd   :  { %545 = vst.msk [vmem:[%s1348_s3 + $0x10] sm:$0xf] %vm540_vm0, %v679_v45  ;;  %546 = vst.msk [vmem:[%s1348_s3 + $0x14] sm:$0xf] %vm540_vm0, %v680_v46  ;;  %v97_v55 = vmul.f32 %v765_v1, %v26_v42  ;;  %v98_v56 = vmul.f32 %v765_v1, %v27_v43  ;;  %v99_v57 = vmul.f32 %v765_v1, %v28_v44 }
   0xe   :  { %547 = vst.msk [vmem:[%s1348_s3 + $0x18] sm:$0xf] %vm540_vm0, %v681_v47  ;;  %548 = vst.msk [vmem:[%s1348_s3 + $0x1c] sm:$0xf] %vm540_vm0, %v682_v50  ;;  %v165_v58 = vadd.f32 %v770_v2, %v94_v51  ;;  %v166_v59 = vadd.f32 %v770_v2, %v95_v52  ;;  %v167_v60 = vadd.f32 %v770_v2, %v96_v53  ;;  %v228_v62 = vmax.f32 %v164_v54, 0.0  ;;  %v39_v53 = vld [vmem:[%s1345_s0 + $0xc8] sm:$0xff] }
   0xf   :  { %v100_v61 = vmul.f32 %v765_v1, %v29_v49  ;;  %v168_v63 = vadd.f32 %v770_v2, %v97_v55  ;;  %v169_v0 = vadd.f32 %v770_v2, %v98_v56  ;;  %v170_v3 = vadd.f32 %v770_v2, %v99_v57  ;;  %v40_v54 = vld [vmem:[%s1345_s0 + $0xd0] sm:$0xff]  ;;  %v41_v55 = vld [vmem:[%s1345_s0 + $0xd8] sm:$0xff] }
  0x10   :  { %v229_v4 = vmax.f32 %v165_v58, 0.0  ;;  %v230_v5 = vmax.f32 %v166_v59, 0.0  ;;  %v231_v6 = vmax.f32 %v167_v60, 0.0  ;;  %v683_v9 = vpack.c.bf16 %v228_v62, %v228_v62  ;;  %v42_v60 = vld [vmem:[%s1345_s0 + $0xe0] sm:$0xff]  ;;  %v44_v62 = vld [vmem:[%s1345_s0 + $0xf0] sm:$0xff] }
  0x11   :  { %v171_v7 = vadd.f32 %v770_v2, %v100_v61  ;;  %v232_v10 = vmax.f32 %v168_v63, 0.0  ;;  %v233_v11 = vmax.f32 %v169_v0, 0.0  ;;  %v234_v12 = vmax.f32 %v170_v3, 0.0  ;;  %v43_v61 = vld [vmem:[%s1345_s0 + $0xe8] sm:$0xff] }
  0x12   :  { %v684_v16 = vpack.c.bf16 %v229_v4, %v229_v4  ;;  %v685_v17 = vpack.c.bf16 %v230_v5, %v230_v5  ;;  %v686_v18 = vpack.c.bf16 %v231_v6, %v231_v6  ;;  %549 = vst.msk [vmem:[%s1348_s3 + $0x20] sm:$0xf] %vm540_vm0, %v683_v9  ;;  %v101_v26 = vmul.f32 %v765_v1, %v30_v8  ;;  %v45_v5 = vld [vmem:[%s1345_s0 + $0xf8] sm:$0xff] }
  0x13   :  { %v235_v19 = vmax.f32 %v171_v7, 0.0  ;;  %v687_v23 = vpack.c.bf16 %v232_v10, %v232_v10  ;;  %v688_v24 = vpack.c.bf16 %v233_v11, %v233_v11  ;;  %v689_v25 = vpack.c.bf16 %v234_v12, %v234_v12 }
  0x14   :  { %550 = vst.msk [vmem:[%s1348_s3 + $0x24] sm:$0xf] %vm540_vm0, %v684_v16  ;;  %551 = vst.msk [vmem:[%s1348_s3 + $0x28] sm:$0xf] %vm540_vm0, %v685_v17  ;;  %v102_v29 = vmul.f32 %v765_v1, %v31_v13  ;;  %v103_v30 = vmul.f32 %v765_v1, %v32_v14  ;;  %v104_v31 = vmul.f32 %v765_v1, %v33_v15 }
  0x15   :  { %552 = vst.msk [vmem:[%s1348_s3 + $0x2c] sm:$0xf] %vm540_vm0, %v686_v18  ;;  %v690_v28 = vpack.c.bf16 %v235_v19, %v235_v19  ;;  %553 = vst.msk [vmem:[%s1348_s3 + $0x30] sm:$0xf] %vm540_vm0, %v687_v23  ;;  %v172_v32 = vadd.f32 %v770_v2, %v101_v26  ;;  %v105_v33 = vmul.f32 %v765_v1, %v34_v20  ;;  %v46_v26 = vld [vmem:[%s1345_s0 + $0x100] sm:$0xff] }
  0x16   :  { %554 = vst.msk [vmem:[%s1348_s3 + $0x34] sm:$0xf] %vm540_vm0, %v688_v24  ;;  %555 = vst.msk [vmem:[%s1348_s3 + $0x38] sm:$0xf] %vm540_vm0, %v689_v25  ;;  %v106_v34 = vmul.f32 %v765_v1, %v35_v21  ;;  %v107_v35 = vmul.f32 %v765_v1, %v36_v22  ;;  %v173_v36 = vadd.f32 %v770_v2, %v102_v29 }
  0x17   :  { %556 = vst.msk [vmem:[%s1348_s3 + $0x3c] sm:$0xf] %vm540_vm0, %v690_v28  ;;  %v174_v37 = vadd.f32 %v770_v2, %v103_v30  ;;  %v175_v38 = vadd.f32 %v770_v2, %v104_v31  ;;  %v108_v39 = vmul.f32 %v765_v1, %v37_v27  ;;  %v236_v40 = vmax.f32 %v172_v32, 0.0  ;;  %v47_v31 = vld [vmem:[%s1345_s0 + $0x108] sm:$0xff]  ;;  %v48_v32 = vld [vmem:[%s1345_s0 + $0x110] sm:$0xff] }
  0x18   :  { %v176_v41 = vadd.f32 %v770_v2, %v105_v33  ;;  %v177_v42 = vadd.f32 %v770_v2, %v106_v34  ;;  %v178_v43 = vadd.f32 %v770_v2, %v107_v35  ;;  %v237_v44 = vmax.f32 %v173_v36, 0.0  ;;  %v49_v33 = vld [vmem:[%s1345_s0 + $0x118] sm:$0xff] }
  0x19   :  { %v238_v45 = vmax.f32 %v174_v37, 0.0  ;;  %v239_v46 = vmax.f32 %v175_v38, 0.0  ;;  %v179_v47 = vadd.f32 %v770_v2, %v108_v39  ;;  %v691_v49 = vpack.c.bf16 %v236_v40, %v236_v40  ;;  %v50_v38 = vld [vmem:[%s1345_s0 + $0x120] sm:$0xff]  ;;  %v51_v39 = vld [vmem:[%s1345_s0 + $0x128] sm:$0xff]  ;;  %v52_v40 = vld [vmem:[%s1345_s0 + $0x130] sm:$0xff] }
  0x1a   :  { %v240_v50 = vmax.f32 %v176_v41, 0.0  ;;  %v241_v51 = vmax.f32 %v177_v42, 0.0  ;;  %v242_v52 = vmax.f32 %v178_v43, 0.0  ;;  %v692_v56 = vpack.c.bf16 %v237_v44, %v237_v44 }
  0x1b   :  { %v693_v57 = vpack.c.bf16 %v238_v45, %v238_v45  ;;  %v694_v58 = vpack.c.bf16 %v239_v46, %v239_v46  ;;  %v243_v59 = vmax.f32 %v179_v47, 0.0  ;;  %557 = vst.msk [vmem:[%s1348_s3 + $0x40] sm:$0xf] %vm540_vm0, %v691_v49  ;;  %v109_v4 = vmul.f32 %v765_v1, %v38_v48  ;;  %v53_v45 = vld [vmem:[%s1345_s0 + $0x138] sm:$0xff] }
  0x1c   :  { %v695_v63 = vpack.c.bf16 %v240_v50, %v240_v50  ;;  %v696_v0 = vpack.c.bf16 %v241_v51, %v241_v51  ;;  %v697_v3 = vpack.c.bf16 %v242_v52, %v242_v52  ;;  %558 = vst.msk [vmem:[%s1348_s3 + $0x44] sm:$0xf] %vm540_vm0, %v692_v56  ;;  %v110_v7 = vmul.f32 %v765_v1, %v39_v53 }
  0x1d   :  { %559 = vst.msk [vmem:[%s1348_s3 + $0x48] sm:$0xf] %vm540_vm0, %v693_v57  ;;  %560 = vst.msk [vmem:[%s1348_s3 + $0x4c] sm:$0xf] %vm540_vm0, %v694_v58  ;;  %v698_v6 = vpack.c.bf16 %v243_v59, %v243_v59  ;;  %v111_v8 = vmul.f32 %v765_v1, %v40_v54  ;;  %v112_v9 = vmul.f32 %v765_v1, %v41_v55 }
  0x1e   :  { %561 = vst.msk [vmem:[%s1348_s3 + $0x50] sm:$0xf] %vm540_vm0, %v695_v63  ;;  %562 = vst.msk [vmem:[%s1348_s3 + $0x54] sm:$0xf] %vm540_vm0, %v696_v0  ;;  %v180_v10 = vadd.f32 %v770_v2, %v109_v4  ;;  %v113_v11 = vmul.f32 %v765_v1, %v42_v60  ;;  %v114_v12 = vmul.f32 %v765_v1, %v43_v61  ;;  %v54_v4 = vld [vmem:[%s1345_s0 + $0x140] sm:$0xff] }
  0x1f   :  { %563 = vst.msk [vmem:[%s1348_s3 + $0x58] sm:$0xf] %vm540_vm0, %v697_v3  ;;  %v115_v13 = vmul.f32 %v765_v1, %v44_v62  ;;  %564 = vst.msk [vmem:[%s1348_s3 + $0x5c] sm:$0xf] %vm540_vm0, %v698_v6  ;;  %v181_v14 = vadd.f32 %v770_v2, %v110_v7  ;;  %v182_v15 = vadd.f32 %v770_v2, %v111_v8 }
  0x20   :  { %v183_v16 = vadd.f32 %v770_v2, %v112_v9  ;;  %v116_v17 = vmul.f32 %v765_v1, %v45_v5  ;;  %v244_v18 = vmax.f32 %v180_v10, 0.0  ;;  %v184_v19 = vadd.f32 %v770_v2, %v113_v11  ;;  %v55_v9 = vld [vmem:[%s1345_s0 + $0x148] sm:$0xff]  ;;  %v56_v10 = vld [vmem:[%s1345_s0 + $0x150] sm:$0xff]  ;;  %v57_v11 = vld [vmem:[%s1345_s0 + $0x158] sm:$0xff] }
  0x21   :  { %v185_v20 = vadd.f32 %v770_v2, %v114_v12  ;;  %v186_v21 = vadd.f32 %v770_v2, %v115_v13  ;;  %v245_v22 = vmax.f32 %v181_v14, 0.0  ;;  %v246_v23 = vmax.f32 %v182_v15, 0.0 }
  0x22   :  { %v247_v24 = vmax.f32 %v183_v16, 0.0  ;;  %v187_v25 = vadd.f32 %v770_v2, %v116_v17  ;;  %v699_v27 = vpack.c.bf16 %v244_v18, %v244_v18  ;;  %v248_v28 = vmax.f32 %v184_v19, 0.0  ;;  %v58_v16 = vld [vmem:[%s1345_s0 + $0x160] sm:$0xff]  ;;  %v59_v17 = vld [vmem:[%s1345_s0 + $0x168] sm:$0xff]  ;;  %v60_v18 = vld [vmem:[%s1345_s0 + $0x170] sm:$0xff] }
  0x23   :  { %v249_v29 = vmax.f32 %v185_v20, 0.0  ;;  %v250_v30 = vmax.f32 %v186_v21, 0.0  ;;  %v700_v34 = vpack.c.bf16 %v245_v22, %v245_v22  ;;  %v701_v35 = vpack.c.bf16 %v246_v23, %v246_v23  ;;  %v61_v23 = vld [vmem:[%s1345_s0 + $0x178] sm:$0xff] }
  0x24   :  { %v702_v36 = vpack.c.bf16 %v247_v24, %v247_v24  ;;  %v251_v37 = vmax.f32 %v187_v25, 0.0  ;;  %565 = vst.msk [vmem:[%s1348_s3 + $0x60] sm:$0xf] %vm540_vm0, %v699_v27  ;;  %v703_v41 = vpack.c.bf16 %v248_v28, %v248_v28  ;;  %v117_v44 = vmul.f32 %v765_v1, %v46_v26 }
  0x25   :  { %v704_v42 = vpack.c.bf16 %v249_v29, %v249_v29  ;;  %v705_v43 = vpack.c.bf16 %v250_v30, %v250_v30  ;;  %566 = vst.msk [vmem:[%s1348_s3 + $0x64] sm:$0xf] %vm540_vm0, %v700_v34  ;;  %567 = vst.msk [vmem:[%s1348_s3 + $0x68] sm:$0xf] %vm540_vm0, %v701_v35  ;;  %v118_v47 = vmul.f32 %v765_v1, %v47_v31 }
  0x26   :  { %568 = vst.msk [vmem:[%s1348_s3 + $0x6c] sm:$0xf] %vm540_vm0, %v702_v36  ;;  %v706_v46 = vpack.c.bf16 %v251_v37, %v251_v37  ;;  %v119_v48 = vmul.f32 %v765_v1, %v48_v32  ;;  %v120_v49 = vmul.f32 %v765_v1, %v49_v33  ;;  %569 = vst.msk [vmem:[%s1348_s3 + $0x70] sm:$0xf] %vm540_vm0, %v703_v41 }
  0x27   :  { %570 = vst.msk [vmem:[%s1348_s3 + $0x74] sm:$0xf] %vm540_vm0, %v704_v42  ;;  %571 = vst.msk [vmem:[%s1348_s3 + $0x78] sm:$0xf] %vm540_vm0, %v705_v43  ;;  %v188_v50 = vadd.f32 %v770_v2, %v117_v44  ;;  %v121_v51 = vmul.f32 %v765_v1, %v50_v38  ;;  %v122_v52 = vmul.f32 %v765_v1, %v51_v39  ;;  %v62_v44 = vld [vmem:[%s1345_s0 + $0x180] sm:$0xff] }
  0x28   :  { %v123_v53 = vmul.f32 %v765_v1, %v52_v40  ;;  %572 = vst.msk [vmem:[%s1348_s3 + $0x7c] sm:$0xf] %vm540_vm0, %v706_v46  ;;  %v189_v54 = vadd.f32 %v770_v2, %v118_v47  ;;  %v190_v55 = vadd.f32 %v770_v2, %v119_v48  ;;  %v191_v56 = vadd.f32 %v770_v2, %v120_v49  ;;  %v63_v49 = vld [vmem:[%s1345_s0 + $0x188] sm:$0xff] }
  0x29   :  { %v124_v57 = vmul.f32 %v765_v1, %v53_v45  ;;  %v252_v58 = vmax.f32 %v188_v50, 0.0  ;;  %v192_v59 = vadd.f32 %v770_v2, %v121_v51  ;;  %v193_v60 = vadd.f32 %v770_v2, %v122_v52  ;;  %v64_v50 = vld [vmem:[%s1345_s0 + $0x190] sm:$0xff]  ;;  %v65_v51 = vld [vmem:[%s1345_s0 + $0x198] sm:$0xff] }
  0x2a   :  { %v194_v61 = vadd.f32 %v770_v2, %v123_v53  ;;  %v253_v62 = vmax.f32 %v189_v54, 0.0  ;;  %v254_v63 = vmax.f32 %v190_v55, 0.0  ;;  %v255_v0 = vmax.f32 %v191_v56, 0.0  ;;  %v66_v56 = vld [vmem:[%s1345_s0 + $0x1a0] sm:$0xff] }
  0x2b   :  { %v195_v3 = vadd.f32 %v770_v2, %v124_v57  ;;  %v707_v5 = vpack.c.bf16 %v252_v58, %v252_v58  ;;  %v256_v6 = vmax.f32 %v192_v59, 0.0  ;;  %v257_v7 = vmax.f32 %v193_v60, 0.0  ;;  %v67_v57 = vld [vmem:[%s1345_s0 + $0x1a8] sm:$0xff]  ;;  %v68_v58 = vld [vmem:[%s1345_s0 + $0x1b0] sm:$0xff] }
  0x2c   :  { %v258_v8 = vmax.f32 %v194_v61, 0.0  ;;  %v708_v12 = vpack.c.bf16 %v253_v62, %v253_v62  ;;  %v709_v13 = vpack.c.bf16 %v254_v63, %v254_v63  ;;  %v710_v14 = vpack.c.bf16 %v255_v0, %v255_v0  ;;  %v69_v63 = vld [vmem:[%s1345_s0 + $0x1b8] sm:$0xff] }
  0x2d   :  { %v259_v15 = vmax.f32 %v195_v3, 0.0  ;;  %573 = vst.msk [vmem:[%s1348_s3 + $0x80] sm:$0xf] %vm540_vm0, %v707_v5  ;;  %v711_v19 = vpack.c.bf16 %v256_v6, %v256_v6  ;;  %v712_v20 = vpack.c.bf16 %v257_v7, %v257_v7  ;;  %v125_v22 = vmul.f32 %v765_v1, %v54_v4 }
  0x2e   :  { %v713_v21 = vpack.c.bf16 %v258_v8, %v258_v8  ;;  %574 = vst.msk [vmem:[%s1348_s3 + $0x84] sm:$0xf] %vm540_vm0, %v708_v12  ;;  %575 = vst.msk [vmem:[%s1348_s3 + $0x88] sm:$0xf] %vm540_vm0, %v709_v13  ;;  %v126_v25 = vmul.f32 %v765_v1, %v55_v9  ;;  %v127_v26 = vmul.f32 %v765_v1, %v56_v10 }
  0x2f   :  { %576 = vst.msk [vmem:[%s1348_s3 + $0x8c] sm:$0xf] %vm540_vm0, %v710_v14  ;;  %v714_v24 = vpack.c.bf16 %v259_v15, %v259_v15  ;;  %v128_v27 = vmul.f32 %v765_v1, %v57_v11  ;;  %577 = vst.msk [vmem:[%s1348_s3 + $0x90] sm:$0xf] %vm540_vm0, %v711_v19  ;;  %v196_v28 = vadd.f32 %v770_v2, %v125_v22  ;;  %v70_v22 = vld [vmem:[%s1345_s0 + $0x1c0] sm:$0xff] }
  0x30   :  { %578 = vst.msk [vmem:[%s1348_s3 + $0x94] sm:$0xf] %vm540_vm0, %v712_v20  ;;  %579 = vst.msk [vmem:[%s1348_s3 + $0x98] sm:$0xf] %vm540_vm0, %v713_v21  ;;  %v129_v29 = vmul.f32 %v765_v1, %v58_v16  ;;  %v130_v30 = vmul.f32 %v765_v1, %v59_v17  ;;  %v131_v31 = vmul.f32 %v765_v1, %v60_v18 }
  0x31   :  { %580 = vst.msk [vmem:[%s1348_s3 + $0x9c] sm:$0xf] %vm540_vm0, %v714_v24  ;;  %v197_v32 = vadd.f32 %v770_v2, %v126_v25  ;;  %v198_v33 = vadd.f32 %v770_v2, %v127_v26  ;;  %v199_v34 = vadd.f32 %v770_v2, %v128_v27  ;;  %v132_v35 = vmul.f32 %v765_v1, %v61_v23  ;;  %v71_v27 = vld [vmem:[%s1345_s0 + $0x1c8] sm:$0xff] }
  0x32   :  { %v260_v36 = vmax.f32 %v196_v28, 0.0  ;;  %v200_v37 = vadd.f32 %v770_v2, %v129_v29  ;;  %v201_v38 = vadd.f32 %v770_v2, %v130_v30  ;;  %v202_v39 = vadd.f32 %v770_v2, %v131_v31  ;;  %v72_v28 = vld [vmem:[%s1345_s0 + $0x1d0] sm:$0xff]  ;;  %v73_v29 = vld [vmem:[%s1345_s0 + $0x1d8] sm:$0xff] }
  0x33   :  { %v261_v40 = vmax.f32 %v197_v32, 0.0  ;;  %v262_v41 = vmax.f32 %v198_v33, 0.0  ;;  %v263_v42 = vmax.f32 %v199_v34, 0.0  ;;  %v203_v43 = vadd.f32 %v770_v2, %v132_v35  ;;  %v74_v34 = vld [vmem:[%s1345_s0 + $0x1e0] sm:$0xff]  ;;  %v75_v35 = vld [vmem:[%s1345_s0 + $0x1e8] sm:$0xff] }
  0x34   :  { %v715_v45 = vpack.c.bf16 %v260_v36, %v260_v36  ;;  %v264_v46 = vmax.f32 %v200_v37, 0.0  ;;  %v265_v47 = vmax.f32 %v201_v38, 0.0  ;;  %v266_v48 = vmax.f32 %v202_v39, 0.0  ;;  %v76_v36 = vld [vmem:[%s1345_s0 + $0x1f0] sm:$0xff] }
  0x35   :  { %v716_v52 = vpack.c.bf16 %v261_v40, %v261_v40  ;;  %v717_v53 = vpack.c.bf16 %v262_v41, %v262_v41  ;;  %v718_v54 = vpack.c.bf16 %v263_v42, %v263_v42  ;;  %v267_v55 = vmax.f32 %v203_v43, 0.0  ;;  %v77_v41 = vld [vmem:[%s1345_s0 + $0x1f8] sm:$0xff] }
  0x36   :  { %581 = vst.msk [vmem:[%s1348_s3 + $0xa0] sm:$0xf] %vm540_vm0, %v715_v45  ;;  %v719_v59 = vpack.c.bf16 %v264_v46, %v264_v46  ;;  %v720_v60 = vpack.c.bf16 %v265_v47, %v265_v47  ;;  %v721_v61 = vpack.c.bf16 %v266_v48, %v266_v48  ;;  %v133_v62 = vmul.f32 %v765_v1, %v62_v44 }
  0x37   :  { %582 = vst.msk [vmem:[%s1348_s3 + $0xa4] sm:$0xf] %vm540_vm0, %v716_v52  ;;  %583 = vst.msk [vmem:[%s1348_s3 + $0xa8] sm:$0xf] %vm540_vm0, %v717_v53  ;;  %v722_v0 = vpack.c.bf16 %v267_v55, %v267_v55  ;;  %v134_v3 = vmul.f32 %v765_v1, %v63_v49  ;;  %v135_v4 = vmul.f32 %v765_v1, %v64_v50 }
  0x38   :  { %584 = vst.msk [vmem:[%s1348_s3 + $0xac] sm:$0xf] %vm540_vm0, %v718_v54  ;;  %v136_v5 = vmul.f32 %v765_v1, %v65_v51  ;;  %585 = vst.msk [vmem:[%s1348_s3 + $0xb0] sm:$0xf] %vm540_vm0, %v719_v59  ;;  %v204_v6 = vadd.f32 %v770_v2, %v133_v62  ;;  %v137_v7 = vmul.f32 %v765_v1, %v66_v56 }
  0x39   :  { %586 = vst.msk [vmem:[%s1348_s3 + $0xb4] sm:$0xf] %vm540_vm0, %v720_v60  ;;  %587 = vst.msk [vmem:[%s1348_s3 + $0xb8] sm:$0xf] %vm540_vm0, %v721_v61  ;;  %v138_v8 = vmul.f32 %v765_v1, %v67_v57  ;;  %v139_v9 = vmul.f32 %v765_v1, %v68_v58  ;;  %v205_v10 = vadd.f32 %v770_v2, %v134_v3 }
  0x3a   :  { %588 = vst.msk [vmem:[%s1348_s3 + $0xbc] sm:$0xf] %vm540_vm0, %v722_v0  ;;  %v206_v11 = vadd.f32 %v770_v2, %v135_v4  ;;  %v207_v12 = vadd.f32 %v770_v2, %v136_v5  ;;  %v140_v13 = vmul.f32 %v765_v1, %v69_v63  ;;  %v268_v14 = vmax.f32 %v204_v6, 0.0 }
  0x3b   :  { %v208_v15 = vadd.f32 %v770_v2, %v137_v7  ;;  %v209_v16 = vadd.f32 %v770_v2, %v138_v8  ;;  %v210_v17 = vadd.f32 %v770_v2, %v139_v9  ;;  %v269_v18 = vmax.f32 %v205_v10, 0.0 }
  0x3c   :  { %v270_v19 = vmax.f32 %v206_v11, 0.0  ;;  %v271_v20 = vmax.f32 %v207_v12, 0.0  ;;  %v211_v21 = vadd.f32 %v770_v2, %v140_v13  ;;  %v723_v23 = vpack.c.bf16 %v268_v14, %v268_v14 }
  0x3d   :  { %v272_v24 = vmax.f32 %v208_v15, 0.0  ;;  %v273_v25 = vmax.f32 %v209_v16, 0.0  ;;  %v274_v26 = vmax.f32 %v210_v17, 0.0  ;;  %v724_v30 = vpack.c.bf16 %v269_v18, %v269_v18 }
  0x3e   :  { %v725_v31 = vpack.c.bf16 %v270_v19, %v270_v19  ;;  %v726_v32 = vpack.c.bf16 %v271_v20, %v271_v20  ;;  %v275_v33 = vmax.f32 %v211_v21, 0.0  ;;  %589 = vst.msk [vmem:[%s1348_s3 + $0xc0] sm:$0xf] %vm540_vm0, %v723_v23  ;;  %v141_v40 = vmul.f32 %v765_v1, %v70_v22 }
  0x3f   :  { %v727_v37 = vpack.c.bf16 %v272_v24, %v272_v24  ;;  %v728_v38 = vpack.c.bf16 %v273_v25, %v273_v25  ;;  %v729_v39 = vpack.c.bf16 %v274_v26, %v274_v26  ;;  %590 = vst.msk [vmem:[%s1348_s3 + $0xc4] sm:$0xf] %vm540_vm0, %v724_v30  ;;  %v142_v43 = vmul.f32 %v765_v1, %v71_v27 }
  0x40   :  { %591 = vst.msk [vmem:[%s1348_s3 + $0xc8] sm:$0xf] %vm540_vm0, %v725_v31  ;;  %592 = vst.msk [vmem:[%s1348_s3 + $0xcc] sm:$0xf] %vm540_vm0, %v726_v32  ;;  %v730_v42 = vpack.c.bf16 %v275_v33, %v275_v33  ;;  %v143_v44 = vmul.f32 %v765_v1, %v72_v28  ;;  %v144_v45 = vmul.f32 %v765_v1, %v73_v29 }
  0x41   :  { %593 = vst.msk [vmem:[%s1348_s3 + $0xd0] sm:$0xf] %vm540_vm0, %v727_v37  ;;  %594 = vst.msk [vmem:[%s1348_s3 + $0xd4] sm:$0xf] %vm540_vm0, %v728_v38  ;;  %v212_v46 = vadd.f32 %v770_v2, %v141_v40  ;;  %v145_v47 = vmul.f32 %v765_v1, %v74_v34  ;;  %v146_v48 = vmul.f32 %v765_v1, %v75_v35 }
  0x42   :  { %595 = vst.msk [vmem:[%s1348_s3 + $0xd8] sm:$0xf] %vm540_vm0, %v729_v39  ;;  %v147_v49 = vmul.f32 %v765_v1, %v76_v36  ;;  %596 = vst.msk [vmem:[%s1348_s3 + $0xdc] sm:$0xf] %vm540_vm0, %v730_v42  ;;  %v213_v50 = vadd.f32 %v770_v2, %v142_v43  ;;  %v214_v51 = vadd.f32 %v770_v2, %v143_v44 }
  0x43   :  { %v215_v52 = vadd.f32 %v770_v2, %v144_v45  ;;  %v148_v53 = vmul.f32 %v765_v1, %v77_v41  ;;  %v276_v54 = vmax.f32 %v212_v46, 0.0  ;;  %v216_v55 = vadd.f32 %v770_v2, %v145_v47 }
  0x44   :  { %v217_v56 = vadd.f32 %v770_v2, %v146_v48  ;;  %v218_v57 = vadd.f32 %v770_v2, %v147_v49  ;;  %v277_v58 = vmax.f32 %v213_v50, 0.0  ;;  %v278_v59 = vmax.f32 %v214_v51, 0.0 }
  0x45   :  { %v279_v60 = vmax.f32 %v215_v52, 0.0  ;;  %v219_v61 = vadd.f32 %v770_v2, %v148_v53  ;;  %v731_v62 = vpack.c.bf16 %v276_v54, %v276_v54  ;;  %v280_v63 = vmax.f32 %v216_v55, 0.0 }
  0x46   :  { %v281_v0 = vmax.f32 %v217_v56, 0.0  ;;  %v282_v3 = vmax.f32 %v218_v57, 0.0  ;;  %v732_v4 = vpack.c.bf16 %v277_v58, %v277_v58  ;;  %v733_v5 = vpack.c.bf16 %v278_v59, %v278_v59 }
  0x47   :  { %v734_v6 = vpack.c.bf16 %v279_v60, %v279_v60  ;;  %v283_v1 = vmax.f32 %v219_v61, 0.0  ;;  %597 = vst.msk [vmem:[%s1348_s3 + $0xe0] sm:$0xf] %vm540_vm0, %v731_v62  ;;  %v735_v7 = vpack.c.bf16 %v280_v63, %v280_v63 }
  0x48   :  { %v736_v8 = vpack.c.bf16 %v281_v0, %v281_v0  ;;  %v737_v9 = vpack.c.bf16 %v282_v3, %v282_v3  ;;  %598 = vst.msk [vmem:[%s1348_s3 + $0xe4] sm:$0xf] %vm540_vm0, %v732_v4  ;;  %599 = vst.msk [vmem:[%s1348_s3 + $0xe8] sm:$0xf] %vm540_vm0, %v733_v5 }
  0x49   :  { %600 = vst.msk [vmem:[%s1348_s3 + $0xec] sm:$0xf] %vm540_vm0, %v734_v6  ;;  %v738_v2 = vpack.c.bf16 %v283_v1, %v283_v1  ;;  %601 = vst.msk [vmem:[%s1348_s3 + $0xf0] sm:$0xf] %vm540_vm0, %v735_v7 }
  0x4a   :  { %602 = vst.msk [vmem:[%s1348_s3 + $0xf4] sm:$0xf] %vm540_vm0, %v736_v8  ;;  %603 = vst.msk [vmem:[%s1348_s3 + $0xf8] sm:$0xf] %vm540_vm0, %v737_v9 }
  0x4b   :  { %604 = vst.msk [vmem:[%s1348_s3 + $0xfc] sm:$0xf] %vm540_vm0, %v738_v2 }

// kernel: netG_forward.25
= control target key start
LH: loop header
LB: loop body
LE: loop exit
PB: predicated region body
PF: predicated region fallthrough
CT: control target
= control target key end

     0   :  { %s1282_s12 = smov 0   ;;  %s1284_s13 = smov 0   ;;  %s1439_s0 = inlined_call_operand.vmem [shape: bf16[2048,72], index: 0, kind: input, shape index: {}]   ;;  %s1440_s1 = inlined_call_operand.vmem [shape: bf16[72,128], index: 1, kind: input, shape index: {}]   ;;  %s1441_s2 = inlined_call_operand.vmem [shape: f32[1,128], index: 2, kind: input, shape index: {}]   ;;  %s1442_s3 = inlined_call_operand.vmem [shape: f32[2048,128], index: 3, kind: output, shape index: {}]  }
   0x1   :  { %s1286_s14 = smov 0  }
   0x2 LB: > { %s32_s15 = sadd.s32 1, %s1256_s13  ;;  %p1009_p0 = scmp.ge.s32.totalorder %s1260_s14, 1  ;;  %s1260_s14 = sphi %s1286_s14, %s13_s14   ;;  %s1256_s13 = sphi %s1284_s13, %s1444_s13   ;;  %s1252_s12 = sphi %s1282_s12, %s1443_s12  }
   0x3   : > { %p34_p1 = scmp.ge.s32.totalorder %s32_s15, 8  ;;  %p188_p2 = scmp.lt.s32.totalorder %s1260_s14, 9 }
   0x5   : > { %s1446_s15 = smov (%p34_p1, %s32_s15), 0  ;;  %p189_p3 = pnand %p1009_p0, %p188_p2 }
   0x6   : > { %s1010_s20 = sshll.u32 (!%p189_p3), %s1252_s12, 5 }
   0x7   : > { %192 = sbr.rel (%p189_p3) target bundleno = 274 (0x112), region = 32  ;;  %p230_p4 = scmp.lt.s32.totalorder (!%p189_p3), %s1010_s20, 255 }
   0xc   : > { %v1153_v0 = vld [vmem:[%s1440_s1 + $0x20] ss:$0 sps:$4 sm:$0xff]   ;;  %vm525_vm0 = vcmask 1043456   ;;  %v1154_v1 = vld [vmem:[%s1440_s1 + $0x18] sm:$0xff]   ;;  %v1155_v3 = vld [vmem:[%s1440_s1 + $0x10] sm:$0xff]   ;;  %s1448_s20 = smov (!%p230_p4, %s1010_s20), 255 }
   0xd   : > { %1127 = vmatprep.subr.msk.bf16.mxu0 %vm525_vm0, %v1153_v0  ;;  %1128 = vmatprep.subr.msk.bf16.mxu1 %vm525_vm0, %v1153_v0  ;;  %v527_v2 = vsel %vm525_vm0, %v1153_v0, 0  ;;  %v1156_v4 = vld [vmem:[%s1440_s1 + $0x8] sm:$0xff]   ;;  %s1011_s25 = sshll.u32 %s1448_s20, 2  ;;  %vm476_vm1 = vcmask 588800   ;;  %v1157_v7 = vld [vmem:[%s1440_s1] sm:$0xff]   ;;  %s1013_s6 = sshll.u32 %s1448_s20, 3 }
   0xe   : > { %1076 = vmatpush3.bf16.msra.mxu0 %v527_v2  ;;  %1122 = vmatpush3.bf16.msra.mxu1 %v527_v2  ;;  %s1318_s28 = scalar_lea.vmem %s1439_s0, %s1011_s25  ;;  %v1358_v22 = vld [vmem:[%s1441_s2] ss:$0 sm:$0xff]  ;;  %s1378_s9 = scalar_lea.vmem %s1442_s3, %s1013_s6 }
   0xf   : > { %1077 = vmatprep.subr.bf16.mxu0 %v1154_v1  ;;  %1118 = vmatprep.subr.bf16.mxu1 %v1154_v1  ;;  %v1158_v5 = vld [vmem:[%s1318_s28] sm:$0xff]   ;;  %v1160_v8 = vld [vmem:[%s1318_s28 + $0x8] sm:$0xff]   ;;  %v1162_v10 = vld [vmem:[%s1318_s28 + $0x10] sm:$0xff]  }
  0x10   : > { %v1159_v6 = vld [vmem:[%s1318_s28 + $0x40] sm:$0xff]   ;;  %1085 = vmatprep.mubr.msk.bf16.mxu0 %vm476_vm1, %v1158_v5  ;;  %v1161_v9 = vld [vmem:[%s1318_s28 + $0x48] sm:$0xff]   ;;  %v1163_v11 = vld [vmem:[%s1318_s28 + $0x50] sm:$0xff]  }
  0x11   : > { %1101 = vmatprep.mubr.msk.bf16.mxu1 %vm476_vm1, %v1159_v6  ;;  %v1164_v12 = vld [vmem:[%s1318_s28 + $0x18] sm:$0xff]   ;;  %v1166_v14 = vld [vmem:[%s1318_s28 + $0x20] sm:$0xff]   ;;  %v1168_v16 = vld [vmem:[%s1318_s28 + $0x28] sm:$0xff]  }
  0x12   : > { %1078 = vmatpush3.bf16.msra.mxu0 %v1154_v1  ;;  %1123 = vmatpush3.bf16.msra.mxu1 %v1154_v1  ;;  %v1165_v13 = vld [vmem:[%s1318_s28 + $0x58] sm:$0xff]   ;;  %v1167_v15 = vld [vmem:[%s1318_s28 + $0x60] sm:$0xff]   ;;  %v1169_v17 = vld [vmem:[%s1318_s28 + $0x68] sm:$0xff]  }
  0x13   : > { %1079 = vmatprep.subr.bf16.mxu0 %v1155_v3  ;;  %1119 = vmatprep.subr.bf16.mxu1 %v1155_v3  ;;  %v1170_v18 = vld [vmem:[%s1318_s28 + $0x30] sm:$0xff]   ;;  %v1172_v20 = vld [vmem:[%s1318_s28 + $0x38] sm:$0xff]  }
  0x14   : > { %v1171_v19 = vld [vmem:[%s1318_s28 + $0x70] sm:$0xff]   ;;  %v1173_v21 = vld [vmem:[%s1318_s28 + $0x78] sm:$0xff]  }
  0x16   : > { %1080 = vmatpush3.bf16.msra.mxu0 %v1155_v3  ;;  %1124 = vmatpush3.bf16.msra.mxu1 %v1155_v3 }
  0x17   : > { %1081 = vmatprep.subr.bf16.mxu0 %v1156_v4  ;;  %1120 = vmatprep.subr.bf16.mxu1 %v1156_v4 }
  0x1a   : > { %1082 = vmatpush3.bf16.msra.mxu0 %v1156_v4  ;;  %1125 = vmatpush3.bf16.msra.mxu1 %v1156_v4 }
  0x1b   : > { %1083 = vmatprep.subr.bf16.mxu0 %v1157_v7  ;;  %1121 = vmatprep.subr.bf16.mxu1 %v1157_v7 }
  0x1e   : > { %1084 = vmatpush3.bf16.msra.mxu0 %v1157_v7  ;;  %1126 = vmatpush3.bf16.msra.mxu1 %v1157_v7 }
  0x21   : > { %1086 = vmatmul.mubr.msk.bf16.vlgmr.msra.gmra.mxu0 %vm476_vm1, %v1160_v8  ;;  %1102 = vmatmul.mubr.msk.bf16.vlgmr.msra.gmra.mxu1 %vm476_vm1, %v1161_v9 }
  0x22   : > { %1089 = vmatprep.mubr.msk.bf16.mxu0 %vm476_vm1, %v1162_v10  ;;  %1105 = vmatprep.mubr.msk.bf16.mxu1 %vm476_vm1, %v1163_v11 }
  0x29   : > { %1090 = vmatmul.mubr.msk.bf16.gmra.mxu0 %vm476_vm1, %v1164_v12  ;;  %1106 = vmatmul.mubr.msk.bf16.gmra.mxu1 %vm476_vm1, %v1165_v13 }
  0x2a   : > { %1093 = vmatprep.mubr.msk.bf16.mxu0 %vm476_vm1, %v1166_v14  ;;  %1109 = vmatprep.mubr.msk.bf16.mxu1 %vm476_vm1, %v1167_v15 }
  0x31   : > { %1094 = vmatmul.mubr.msk.bf16.gmra.mxu0 %vm476_vm1, %v1168_v16  ;;  %1110 = vmatmul.mubr.msk.bf16.gmra.mxu1 %vm476_vm1, %v1169_v17 }
  0x32   : > { %1097 = vmatprep.mubr.msk.bf16.mxu0 %vm476_vm1, %v1170_v18  ;;  %1113 = vmatprep.mubr.msk.bf16.mxu1 %vm476_vm1, %v1171_v19 }
  0x39   : > { %1098 = vmatmul.mubr.msk.bf16.gmra.mxu0 %vm476_vm1, %v1172_v20  ;;  %1114 = vmatmul.mubr.msk.bf16.gmra.mxu1 %vm476_vm1, %v1173_v21 }
  0xe1   : > { %v1087_v23 = vpop.f32.mrf.mxu0  ;;  %v1103_v24 = vpop.f32.mrf.mxu1 }
  0xe2   : > { %v798_v25 = vadd.f32 %v1087_v23, %v1358_v22  ;;  %v814_v26 = vadd.f32 %v1103_v24, %v1358_v22 }
  0xe3   : > { %v563_v27 = vpop.f32.mrf.mxu0  ;;  %v627_v28 = vpop.f32.mrf.mxu1 }
  0xe4   : > { %1174 = vtanh.f32 %v798_v25  ;;  %v796_v29 = vadd.f32 %v1358_v22, %v563_v27  ;;  %v812_v30 = vadd.f32 %v1358_v22, %v627_v28 }
  0xe5   : > { %1176 = vtanh.f32 %v814_v26  ;;  %v1088_v31 = vpop.f32.mrf.mxu0  ;;  %v1104_v32 = vpop.f32.mrf.mxu1 }
  0xe6   : > { %1178 = vtanh.f32 %v796_v29  ;;  %v799_v33 = vadd.f32 %v1088_v31, %v1358_v22  ;;  %v815_v34 = vadd.f32 %v1104_v32, %v1358_v22 }
  0xe7   : > { %1180 = vtanh.f32 %v812_v30  ;;  %v566_v35 = vpop.f32.mrf.mxu0  ;;  %v630_v36 = vpop.f32.mrf.mxu1 }
  0xe8   : > { %1182 = vtanh.f32 %v799_v33  ;;  %v797_v37 = vadd.f32 %v1358_v22, %v566_v35  ;;  %v813_v38 = vadd.f32 %v1358_v22, %v630_v36 }
  0xe9   : > { %1184 = vtanh.f32 %v815_v34  ;;  %v1091_v39 = vpop.f32.mrf.mxu0  ;;  %v1107_v40 = vpop.f32.mrf.mxu1 }
  0xea   : > { %1186 = vtanh.f32 %v797_v37  ;;  %v802_v41 = vadd.f32 %v1091_v39, %v1358_v22  ;;  %v818_v42 = vadd.f32 %v1107_v40, %v1358_v22 }
  0xeb   : > { %1188 = vtanh.f32 %v813_v38  ;;  %v579_v43 = vpop.f32.mrf.mxu0  ;;  %v643_v44 = vpop.f32.mrf.mxu1 }
  0xec   : > { %1190 = vtanh.f32 %v802_v41  ;;  %v800_v45 = vadd.f32 %v1358_v22, %v579_v43  ;;  %v816_v46 = vadd.f32 %v1358_v22, %v643_v44 }
  0xed   : > { %1192 = vtanh.f32 %v818_v42  ;;  %v1092_v47 = vpop.f32.mrf.mxu0  ;;  %v1108_v48 = vpop.f32.mrf.mxu1 }
  0xee   : > { %1194 = vtanh.f32 %v800_v45  ;;  %v803_v49 = vadd.f32 %v1092_v47, %v1358_v22  ;;  %v819_v50 = vadd.f32 %v1108_v48, %v1358_v22 }
  0xef   : > { %1196 = vtanh.f32 %v816_v46  ;;  %v582_v51 = vpop.f32.mrf.mxu0  ;;  %v646_v52 = vpop.f32.mrf.mxu1 }
  0xf0   : > { %1198 = vtanh.f32 %v803_v49  ;;  %v801_v53 = vadd.f32 %v1358_v22, %v582_v51  ;;  %v817_v54 = vadd.f32 %v1358_v22, %v646_v52 }
  0xf1   : > { %v1175_v55 = vpop.eup %1174  ;;  %1200 = vtanh.f32 %v819_v50  ;;  %v1095_v56 = vpop.f32.mrf.mxu0 }
  0xf2   : > { %v1111_v57 = vpop.f32.mrf.mxu1  ;;  %v1177_v58 = vpop.eup %1176  ;;  %862 = vst [vmem:[%s1378_s9 + $0x10] sm:$0xff] %v1175_v55  ;;  %1202 = vtanh.f32 %v801_v53  ;;  %v806_v59 = vadd.f32 %v1095_v56, %v1358_v22 }
  0xf3   : > { %v822_v60 = vadd.f32 %v1111_v57, %v1358_v22  ;;  %v1179_v61 = vpop.eup %1178  ;;  %878 = vst [vmem:[%s1378_s9 + $0x90] sm:$0xff] %v1177_v58  ;;  %1204 = vtanh.f32 %v817_v54  ;;  %v595_v62 = vpop.f32.mrf.mxu0 }
  0xf4   : > { %v659_v63 = vpop.f32.mrf.mxu1  ;;  %v1181_v0 = vpop.eup %1180  ;;  %860 = vst [vmem:[%s1378_s9] sm:$0xff] %v1179_v61  ;;  %1206 = vtanh.f32 %v806_v59  ;;  %v804_v1 = vadd.f32 %v1358_v22, %v595_v62 }
  0xf5   : > { %v820_v2 = vadd.f32 %v1358_v22, %v659_v63  ;;  %v1183_v3 = vpop.eup %1182  ;;  %876 = vst [vmem:[%s1378_s9 + $0x80] sm:$0xff] %v1181_v0  ;;  %1208 = vtanh.f32 %v822_v60  ;;  %v1096_v4 = vpop.f32.mrf.mxu0 }
  0xf6   : > { %v1112_v5 = vpop.f32.mrf.mxu1  ;;  %v1185_v6 = vpop.eup %1184  ;;  %863 = vst [vmem:[%s1378_s9 + $0x18] sm:$0xff] %v1183_v3  ;;  %1210 = vtanh.f32 %v804_v1  ;;  %v807_v7 = vadd.f32 %v1096_v4, %v1358_v22 }
  0xf7   : > { %v823_v8 = vadd.f32 %v1112_v5, %v1358_v22  ;;  %v1187_v9 = vpop.eup %1186  ;;  %879 = vst [vmem:[%s1378_s9 + $0x98] sm:$0xff] %v1185_v6  ;;  %1212 = vtanh.f32 %v820_v2  ;;  %v598_v10 = vpop.f32.mrf.mxu0 }
  0xf8   : > { %v662_v11 = vpop.f32.mrf.mxu1  ;;  %v1189_v12 = vpop.eup %1188  ;;  %861 = vst [vmem:[%s1378_s9 + $0x8] sm:$0xff] %v1187_v9  ;;  %1214 = vtanh.f32 %v807_v7  ;;  %v805_v13 = vadd.f32 %v1358_v22, %v598_v10 }
  0xf9   : > { %v821_v14 = vadd.f32 %v1358_v22, %v662_v11  ;;  %v1191_v15 = vpop.eup %1190  ;;  %877 = vst [vmem:[%s1378_s9 + $0x88] sm:$0xff] %v1189_v12  ;;  %1216 = vtanh.f32 %v823_v8  ;;  %v1099_v16 = vpop.f32.mrf.mxu0 }
  0xfa   : > { %v1115_v17 = vpop.f32.mrf.mxu1  ;;  %v1193_v18 = vpop.eup %1192  ;;  %866 = vst [vmem:[%s1378_s9 + $0x30] sm:$0xff] %v1191_v15  ;;  %1218 = vtanh.f32 %v805_v13  ;;  %v810_v19 = vadd.f32 %v1099_v16, %v1358_v22 }
  0xfb   : > { %v826_v20 = vadd.f32 %v1115_v17, %v1358_v22  ;;  %v1195_v21 = vpop.eup %1194  ;;  %882 = vst [vmem:[%s1378_s9 + $0xb0] sm:$0xff] %v1193_v18  ;;  %1220 = vtanh.f32 %v821_v14  ;;  %v611_v23 = vpop.f32.mrf.mxu0 }
  0xfc   : > { %v675_v24 = vpop.f32.mrf.mxu1  ;;  %v1197_v25 = vpop.eup %1196  ;;  %864 = vst [vmem:[%s1378_s9 + $0x20] sm:$0xff] %v1195_v21  ;;  %1222 = vtanh.f32 %v810_v19  ;;  %v808_v26 = vadd.f32 %v1358_v22, %v611_v23 }
  0xfd   : > { %v824_v27 = vadd.f32 %v1358_v22, %v675_v24  ;;  %v1199_v28 = vpop.eup %1198  ;;  %880 = vst [vmem:[%s1378_s9 + $0xa0] sm:$0xff] %v1197_v25  ;;  %1224 = vtanh.f32 %v826_v20  ;;  %v1100_v29 = vpop.f32.mrf.mxu0 }
  0xfe   : > { %v1116_v30 = vpop.f32.mrf.mxu1  ;;  %v1201_v31 = vpop.eup %1200  ;;  %867 = vst [vmem:[%s1378_s9 + $0x38] sm:$0xff] %v1199_v28  ;;  %1226 = vtanh.f32 %v808_v26  ;;  %v811_v32 = vadd.f32 %v1100_v29, %v1358_v22 }
  0xff   : > { %v827_v33 = vadd.f32 %v1116_v30, %v1358_v22  ;;  %v1203_v34 = vpop.eup %1202  ;;  %883 = vst [vmem:[%s1378_s9 + $0xb8] sm:$0xff] %v1201_v31  ;;  %1228 = vtanh.f32 %v824_v27  ;;  %v614_v35 = vpop.f32.mrf.mxu0 }
 0x100   : > { %v678_v36 = vpop.f32.mrf.mxu1  ;;  %v1205_v37 = vpop.eup %1204  ;;  %865 = vst [vmem:[%s1378_s9 + $0x28] sm:$0xff] %v1203_v34  ;;  %1230 = vtanh.f32 %v811_v32  ;;  %v809_v38 = vadd.f32 %v1358_v22, %v614_v35 }
 0x101   : > { %v825_v39 = vadd.f32 %v1358_v22, %v678_v36  ;;  %v1207_v40 = vpop.eup %1206  ;;  %881 = vst [vmem:[%s1378_s9 + $0xa8] sm:$0xff] %v1205_v37  ;;  %1232 = vtanh.f32 %v827_v33 }
 0x102   : > { %v1209_v41 = vpop.eup %1208  ;;  %870 = vst [vmem:[%s1378_s9 + $0x50] sm:$0xff] %v1207_v40  ;;  %1234 = vtanh.f32 %v809_v38 }
 0x103   : > { %v1211_v42 = vpop.eup %1210  ;;  %886 = vst [vmem:[%s1378_s9 + $0xd0] sm:$0xff] %v1209_v41  ;;  %1236 = vtanh.f32 %v825_v39 }
 0x104   : > { %v1213_v43 = vpop.eup %1212  ;;  %868 = vst [vmem:[%s1378_s9 + $0x40] sm:$0xff] %v1211_v42 }
 0x105   : > { %v1215_v44 = vpop.eup %1214  ;;  %884 = vst [vmem:[%s1378_s9 + $0xc0] sm:$0xff] %v1213_v43 }
 0x106   : > { %v1217_v22 = vpop.eup %1216  ;;  %871 = vst [vmem:[%s1378_s9 + $0x58] sm:$0xff] %v1215_v44 }
 0x107   : > { %v1219_v45 = vpop.eup %1218  ;;  %887 = vst [vmem:[%s1378_s9 + $0xd8] sm:$0xff] %v1217_v22 }
 0x108   : > { %v1221_v46 = vpop.eup %1220  ;;  %869 = vst [vmem:[%s1378_s9 + $0x48] sm:$0xff] %v1219_v45 }
 0x109   : > { %v1223_v47 = vpop.eup %1222  ;;  %885 = vst [vmem:[%s1378_s9 + $0xc8] sm:$0xff] %v1221_v46 }
 0x10a   : > { %v1225_v48 = vpop.eup %1224  ;;  %874 = vst [vmem:[%s1378_s9 + $0x70] sm:$0xff] %v1223_v47 }
 0x10b   : > { %v1227_v49 = vpop.eup %1226  ;;  %890 = vst [vmem:[%s1378_s9 + $0xf0] sm:$0xff] %v1225_v48 }
 0x10c   : > { %v1229_v50 = vpop.eup %1228  ;;  %872 = vst [vmem:[%s1378_s9 + $0x60] sm:$0xff] %v1227_v49 }
 0x10d   : > { %v1231_v51 = vpop.eup %1230  ;;  %888 = vst [vmem:[%s1378_s9 + $0xe0] sm:$0xff] %v1229_v50 }
 0x10e   : > { %v1233_v52 = vpop.eup %1232  ;;  %875 = vst [vmem:[%s1378_s9 + $0x78] sm:$0xff] %v1231_v51 }
 0x10f   : > { %v1235_v53 = vpop.eup %1234  ;;  %891 = vst [vmem:[%s1378_s9 + $0xf8] sm:$0xff] %v1233_v52 }
 0x110   : > { %v1237_v54 = vpop.eup %1236  ;;  %873 = vst [vmem:[%s1378_s9 + $0x68] sm:$0xff] %v1235_v53 }
 0x111   : > { %889 = vst [vmem:[%s1378_s9 + $0xe8] sm:$0xff] %v1237_v54 }
 0x112 PF: > { %s13_s14 = sadd.s32 1, %s1260_s14   ;;  %s1443_s12 = smov %s1256_s13 }
 0x113   : > { %p10_p5 = scmp.ge.s32.totalorder %s13_s14, 10   ;;  %s1444_s13 = smov %s1446_s15 }
 0x115   :  { %12 = sbr.rel (!%p10_p5) target bundleno = 2 (0x2), region = 76 }

</bundles_post_ra>
